<compile_context>
chip_gen: v5e
topology: v5e:2x2
jax: 0.10.0
libtpu: 0.0.40
codegen_flags: <defaults>
</compile_context>

<pallas_src>
import numpy as np

import jax
import jax.numpy as jnp
from jax import lax
from jax.experimental import pallas as pl
from jax.experimental.pallas import tpu as pltpu


# ----------------------------------------------------------------------------
# The fused Pallas kernel: whole MyLeNet5 forward, one launch, VMEM-resident.
# ----------------------------------------------------------------------------
def _lenet5_kernel(xp_ref, w1_ref, b1_ref, pool_ref, w3_ref, b3_ref,
                   w5_ref, b5_ref, w6_ref, b6_ref, wo_ref, bo_ref,
                   o_ref, h_s, g3_s):
    """Operand shapes (B = batch):
      xp_ref : (B, 32, 32) f32     zero-padded input image (C1 padding=2)
      w1_ref : (5, 32, 168) bf16   C1 banded-GEMM blocks; cols = (ow, cout)
      b1_ref : (1, 168) f32
      pool   : (14, 28) bf16       s2 average pool along H (entries = 0.5)
      w3_ref : (5, 168, 160) bf16  C3 blocks with s2 W-pool folded in
      b3_ref : (1, 160) f32
      w5_ref : (10, 160, 120) bf16 C5 with s4 pool folded, split per C3 row
      b5_ref : (1, 120) f32
      w6_ref : (120, 84) bf16,  b6_ref (1, 84) f32
      wo_ref : (84, 10) bf16,   bo_ref (1, 10) f32
      o_ref  : (B, 10) f32         output logits (only HBM write)
      h_s    : (14, 168) f32 VMEM scratch (H-pooled C1 activations)
      g3_s   : (10, 160) f32 VMEM scratch (C3 activations)
    """
    bf16 = jnp.bfloat16
    f32 = jnp.float32
    B = xp_ref.shape[0]

    for b in range(B):                      # small static batch -> full unroll
        # ---- C1 (5x5, pad=2) + sigmoid: sum of 5 row-shifted banded GEMMs ---
        g1 = b1_ref[...]                    # (1, 168), broadcasts over 28 rows
        for ki in range(5):
            g1 = g1 + jnp.dot(xp_ref[b, ki:ki + 28, :].astype(bf16),
                              w1_ref[ki], preferred_element_type=f32)
        g1 = jax.nn.sigmoid(g1)             # (28, 168) = (oh, ow*6 + c), f32

        # ---- s2 avg-pool: H half as a (14,28) matmul, W half folded in w3 ---
        h_s[...] = jnp.dot(pool_ref[...], g1.astype(bf16),
                           preferred_element_type=f32)         # (14, 168)

        # ---- C3 (5x5, valid) + sigmoid: sum of 5 banded GEMMs ---------------
        g3 = b3_ref[...]                    # (1, 160)
        for ki in range(5):
            g3 = g3 + jnp.dot(h_s[ki:ki + 10, :].astype(bf16),
                              w3_ref[ki], preferred_element_type=f32)
        g3_s[...] = jax.nn.sigmoid(g3)      # (10, 160) = (oh3, ow3*16 + c), f32

        # ---- head: s4 pool folded into C5 (flatten-free), then F6, OUT ------
        h5 = b5_ref[...]                    # (1, 120)
        for r in range(10):
            h5 = h5 + jnp.dot(g3_s[r:r + 1, :].astype(bf16),
                              w5_ref[r], preferred_element_type=f32)
        h6 = jnp.dot(h5.astype(bf16), w6_ref[...],
                     preferred_element_type=f32) + b6_ref[...]      # (1, 84)
        logits = jnp.dot(h6.astype(bf16), wo_ref[...],
                         preferred_element_type=f32) + bo_ref[...]  # (1, 10)
        o_ref[b:b + 1, :] = logits.astype(o_ref.dtype)


def lenet5_forward(x, pp):
    """x: (B, 1, 28, 28) float32 NCHW, exactly like the PyTorch module."""
    B = x.shape[0]
    # C == 1, so NCHW -> (B, 28, 28) is a free reshape; pad H/W by 2 for C1.
    xp = jnp.pad(x.reshape(B, 28, 28), ((0, 0), (2, 2), (2, 2)))
    return pl.pallas_call(
        _lenet5_kernel,
        out_shape=jax.ShapeDtypeStruct((B, 10), jnp.float32),
        scratch_shapes=[pltpu.VMEM((14, 168), jnp.float32),
                        pltpu.VMEM((10, 160), jnp.float32)],
    )(xp, pp["w1"], pp["b1"], pp["pool"], pp["w3"], pp["b3"],
      pp["w5"], pp["b5"], pp["w6"], pp["b6"], pp["wo"], pp["bo"])


# ----------------------------------------------------------------------------
# Parameters: PyTorch-layout init + one-time GEMM-ready re-layout (host side)
# ----------------------------------------------------------------------------
def init_params(key):
    ks = jax.random.split(key, 10)
    n = lambda k, shape, s: jax.random.normal(k, shape, jnp.float32) * s
    return {
        "c1_w": n(ks[0], (6, 1, 5, 5), 0.2),     "c1_b": n(ks[1], (6,), 0.1),
        "c3_w": n(ks[2], (16, 6, 5, 5), 0.08),   "c3_b": n(ks[3], (16,), 0.1),
        "c5_w": n(ks[4], (120, 16, 5, 5), 0.05), "c5_b": n(ks[5], (120,), 0.1),
        "f6_w": n(ks[6], (84, 120), 0.09),       "f6_b": n(ks[7], (84,), 0.1),
        "out_w": n(ks[8], (10, 84), 0.1),        "out_b": n(ks[9], (10,), 0.1),
    }


def prepare_params(p):
    """One-time host-side weight re-layout (NOT in the jitted hot path)."""
    c1_w = np.asarray(p["c1_w"], np.float32)   # (6, 1, 5, 5)  (cout, cin, kh, kw)
    c1_b = np.asarray(p["c1_b"], np.float32)
    c3_w = np.asarray(p["c3_w"], np.float32)   # (16, 6, 5, 5)
    c3_b = np.asarray(p["c3_b"], np.float32)
    c5_w = np.asarray(p["c5_w"], np.float32)   # (120, 16, 5, 5)
    c5_b = np.asarray(p["c5_b"], np.float32)

    # C1 as 5 banded blocks: w1[ki, wp, ow*6 + co] = c1_w[co, 0, ki, wp - ow].
    w1 = np.zeros((5, 32, 28 * 6), np.float32)
    for ki in range(5):
        for ow in range(28):
            for kj in range(5):
                w1[ki, ow + kj, ow * 6:(ow + 1) * 6] = c1_w[:, 0, ki, kj]

    # s2 average pool along H as a (14, 28) matrix with exact 0.5 entries.
    pool = np.zeros((14, 28), np.float32)
    for hp in range(14):
        pool[hp, 2 * hp] = 0.5
        pool[hp, 2 * hp + 1] = 0.5

    # C3 with the W half of s2 folded in:
    # w3[ki, w*6 + ci, ow3*16 + co] = 0.5 * c3_w[co, ci, ki, w//2 - ow3].
    w3 = np.zeros((5, 28 * 6, 10 * 16), np.float32)
    for ki in range(5):
        for w in range(28):
            for ci in range(6):
                for ow in range(10):
                    kj = w // 2 - ow
                    if 0 <= kj < 5:
                        w3[ki, w * 6 + ci, ow * 16:(ow + 1) * 16] = \
                            0.5 * c3_w[:, ci, ki, kj]

    # s4 pool folded into C5 (2x nearest-upsample of the 5x5 taps, / 4), split
    # per C3 output row: w5[h, w*16 + ci, co] = 0.25 * c5_w[co, ci, h//2, w//2].
    w5u = np.repeat(np.repeat(c5_w, 2, axis=2), 2, axis=3) * 0.25  # (120,16,10,10)
    w5 = np.transpose(w5u, (2, 3, 1, 0)).reshape(10, 10 * 16, 120)

    bf16, f32 = jnp.bfloat16, jnp.float32
    return {
        "w1": jnp.asarray(w1, bf16),
        "b1": jnp.asarray(np.tile(c1_b, 28)[None, :], f32),
        "pool": jnp.asarray(pool, bf16),
        "w3": jnp.asarray(w3, bf16),
        "b3": jnp.asarray(np.tile(c3_b, 10)[None, :], f32),
        "w5": jnp.asarray(w5, bf16),
        "b5": jnp.asarray(c5_b[None, :], f32),
        "w6": jnp.asarray(np.asarray(p["f6_w"], np.float32).T, bf16),
        "b6": jnp.asarray(np.asarray(p["f6_b"], np.float32)[None, :], f32),
        "wo": jnp.asarray(np.asarray(p["out_w"], np.float32).T, bf16),
        "bo": jnp.asarray(np.asarray(p["out_b"], np.float32)[None, :], f32),
    }


# ----------------------------------------------------------------------------
# Pure-JAX float32 reference (for the correctness check only)
# ----------------------------------------------------------------------------
def lenet5_reference(x, p):
    dn = ("NCHW", "OIHW", "NCHW")

    def pool(y):
        B, C, H, W = y.shape
        return y.reshape(B, C, H // 2, 2, W // 2, 2).mean(axis=(3, 5))

    y = lax.conv_general_dilated(x, p["c1_w"], (1, 1), ((2, 2), (2, 2)),
                                 dimension_numbers=dn) + p["c1_b"][None, :, None, None]
    y = pool(jax.nn.sigmoid(y))
    y = lax.conv_general_dilated(y, p["c3_w"], (1, 1), "VALID",
                                 dimension_numbers=dn) + p["c3_b"][None, :, None, None]
    y = pool(jax.nn.sigmoid(y))
    y = lax.conv_general_dilated(y, p["c5_w"], (1, 1), "VALID",
                                 dimension_numbers=dn) + p["c5_b"][None, :, None, None]
    y = y.reshape(y.shape[0], -1)
    y = y @ p["f6_w"].T + p["f6_b"]
    y = y @ p["out_w"].T + p["out_b"]
    return y


if __name__ == "__main__":
    key = jax.random.PRNGKey(0)
    k_x, k_p = jax.random.split(key)
    # Batch of 2 MNIST-sized images, NCHW -- the shape the flatten->120 implies.
    x = jax.random.normal(k_x, (2, 1, 28, 28), jnp.float32)
    params = init_params(k_p)
    prepared = prepare_params(params)     # one-time host-side weight re-layout

    fwd = jax.jit(lenet5_forward)
    out = jax.block_until_ready(fwd(x, prepared))
    assert out.shape == (2, 10) and out.dtype == jnp.float32

    ref = jax.block_until_ready(jax.jit(lenet5_reference)(x, params))
    err = float(jnp.max(jnp.abs(out - ref)))
    # bf16 MXU inputs with f32 accumulation vs. a pure-f32 reference.
    assert err < 7.5e-2, err

    print("KERNEL_OK")
</pallas_src>

<mosaic_0001>
module attributes {stable_mosaic.version = 11 : i64} {
  func.func @_lenet5_kernel(%arg0: memref<2x32x32xf32, #tpu.memory_space<vmem>>, %arg1: memref<5x32x168xbf16, #tpu.memory_space<vmem>>, %arg2: memref<1x168xf32, #tpu.memory_space<vmem>>, %arg3: memref<14x28xbf16, #tpu.memory_space<vmem>>, %arg4: memref<5x168x160xbf16, #tpu.memory_space<vmem>>, %arg5: memref<1x160xf32, #tpu.memory_space<vmem>>, %arg6: memref<10x160x120xbf16, #tpu.memory_space<vmem>>, %arg7: memref<1x120xf32, #tpu.memory_space<vmem>>, %arg8: memref<120x84xbf16, #tpu.memory_space<vmem>>, %arg9: memref<1x84xf32, #tpu.memory_space<vmem>>, %arg10: memref<84x10xbf16, #tpu.memory_space<vmem>>, %arg11: memref<1x10xf32, #tpu.memory_space<vmem>>, %arg12: memref<2x10xf32, #tpu.memory_space<vmem>>, %arg13: memref<14x168xf32, #tpu.memory_space<vmem>>, %arg14: memref<10x160xf32, #tpu.memory_space<vmem>>) attributes {dimension_semantics = [], scalar_prefetch = 0 : i64, scratch_operands = 2 : i64, tpu.core_type = #tpu.core_type<tc>} {
    %c0 = arith.constant 0 : index
    %c0_0 = arith.constant 0 : index
    %0 = vector.load %arg2[%c0, %c0_0] : memref<1x168xf32, #tpu.memory_space<vmem>>, vector<1x168xf32>
    %c0_1 = arith.constant 0 : index
    %c0_2 = arith.constant 0 : index
    %c0_3 = arith.constant 0 : index
    %1 = vector.load %arg0[%c0_1, %c0_2, %c0_3] : memref<2x32x32xf32, #tpu.memory_space<vmem>>, vector<1x28x32xf32>
    %2 = vector.shape_cast %1 : vector<1x28x32xf32> to vector<28x32xf32>
    %3 = arith.truncf %2 : vector<28x32xf32> to vector<28x32xbf16>
    %c0_4 = arith.constant 0 : index
    %c0_5 = arith.constant 0 : index
    %c0_6 = arith.constant 0 : index
    %4 = vector.load %arg1[%c0_4, %c0_5, %c0_6] : memref<5x32x168xbf16, #tpu.memory_space<vmem>>, vector<1x32x168xbf16>
    %5 = vector.shape_cast %4 : vector<1x32x168xbf16> to vector<32x168xbf16>
    %cst = arith.constant dense<0.000000e+00> : vector<28x168xf32>
    %6 = tpu.matmul %3, %5, %cst {dimension_numbers = #tpu.dot_dimension_numbers<[1], [0], [0], [1], [0, 0, 1, 1], [], []>} : vector<28x32xbf16>, vector<32x168xbf16>, vector<28x168xf32> -> vector<28x168xf32>
    %7 = vector.broadcast %0 : vector<1x168xf32> to vector<28x168xf32>
    %8 = arith.addf %7, %6 : vector<28x168xf32>
    %c0_7 = arith.constant 0 : index
    %c1 = arith.constant 1 : index
    %c0_8 = arith.constant 0 : index
    %9 = vector.load %arg0[%c0_7, %c1, %c0_8] : memref<2x32x32xf32, #tpu.memory_space<vmem>>, vector<1x28x32xf32>
    %10 = vector.shape_cast %9 : vector<1x28x32xf32> to vector<28x32xf32>
    %11 = arith.truncf %10 : vector<28x32xf32> to vector<28x32xbf16>
    %c1_9 = arith.constant 1 : index
    %c0_10 = arith.constant 0 : index
    %c0_11 = arith.constant 0 : index
    %12 = vector.load %arg1[%c1_9, %c0_10, %c0_11] : memref<5x32x168xbf16, #tpu.memory_space<vmem>>, vector<1x32x168xbf16>
    %13 = vector.shape_cast %12 : vector<1x32x168xbf16> to vector<32x168xbf16>
    %cst_12 = arith.constant dense<0.000000e+00> : vector<28x168xf32>
    %14 = tpu.matmul %11, %13, %cst_12 {dimension_numbers = #tpu.dot_dimension_numbers<[1], [0], [0], [1], [0, 0, 1, 1], [], []>} : vector<28x32xbf16>, vector<32x168xbf16>, vector<28x168xf32> -> vector<28x168xf32>
    %15 = arith.addf %8, %14 : vector<28x168xf32>
    %c0_13 = arith.constant 0 : index
    %c2 = arith.constant 2 : index
    %c0_14 = arith.constant 0 : index
    %16 = vector.load %arg0[%c0_13, %c2, %c0_14] : memref<2x32x32xf32, #tpu.memory_space<vmem>>, vector<1x28x32xf32>
    %17 = vector.shape_cast %16 : vector<1x28x32xf32> to vector<28x32xf32>
    %18 = arith.truncf %17 : vector<28x32xf32> to vector<28x32xbf16>
    %c2_15 = arith.constant 2 : index
    %c0_16 = arith.constant 0 : index
    %c0_17 = arith.constant 0 : index
    %19 = vector.load %arg1[%c2_15, %c0_16, %c0_17] : memref<5x32x168xbf16, #tpu.memory_space<vmem>>, vector<1x32x168xbf16>
    %20 = vector.shape_cast %19 : vector<1x32x168xbf16> to vector<32x168xbf16>
    %cst_18 = arith.constant dense<0.000000e+00> : vector<28x168xf32>
    %21 = tpu.matmul %18, %20, %cst_18 {dimension_numbers = #tpu.dot_dimension_numbers<[1], [0], [0], [1], [0, 0, 1, 1], [], []>} : vector<28x32xbf16>, vector<32x168xbf16>, vector<28x168xf32> -> vector<28x168xf32>
    %22 = arith.addf %15, %21 : vector<28x168xf32>
    %c0_19 = arith.constant 0 : index
    %c3 = arith.constant 3 : index
    %c0_20 = arith.constant 0 : index
    %23 = vector.load %arg0[%c0_19, %c3, %c0_20] : memref<2x32x32xf32, #tpu.memory_space<vmem>>, vector<1x28x32xf32>
    %24 = vector.shape_cast %23 : vector<1x28x32xf32> to vector<28x32xf32>
    %25 = arith.truncf %24 : vector<28x32xf32> to vector<28x32xbf16>
    %c3_21 = arith.constant 3 : index
    %c0_22 = arith.constant 0 : index
    %c0_23 = arith.constant 0 : index
    %26 = vector.load %arg1[%c3_21, %c0_22, %c0_23] : memref<5x32x168xbf16, #tpu.memory_space<vmem>>, vector<1x32x168xbf16>
    %27 = vector.shape_cast %26 : vector<1x32x168xbf16> to vector<32x168xbf16>
    %cst_24 = arith.constant dense<0.000000e+00> : vector<28x168xf32>
    %28 = tpu.matmul %25, %27, %cst_24 {dimension_numbers = #tpu.dot_dimension_numbers<[1], [0], [0], [1], [0, 0, 1, 1], [], []>} : vector<28x32xbf16>, vector<32x168xbf16>, vector<28x168xf32> -> vector<28x168xf32>
    %29 = arith.addf %22, %28 : vector<28x168xf32>
    %c0_25 = arith.constant 0 : index
    %c4 = arith.constant 4 : index
    %c0_26 = arith.constant 0 : index
    %30 = vector.load %arg0[%c0_25, %c4, %c0_26] : memref<2x32x32xf32, #tpu.memory_space<vmem>>, vector<1x28x32xf32>
    %31 = vector.shape_cast %30 : vector<1x28x32xf32> to vector<28x32xf32>
    %32 = arith.truncf %31 : vector<28x32xf32> to vector<28x32xbf16>
    %c4_27 = arith.constant 4 : index
    %c0_28 = arith.constant 0 : index
    %c0_29 = arith.constant 0 : index
    %33 = vector.load %arg1[%c4_27, %c0_28, %c0_29] : memref<5x32x168xbf16, #tpu.memory_space<vmem>>, vector<1x32x168xbf16>
    %34 = vector.shape_cast %33 : vector<1x32x168xbf16> to vector<32x168xbf16>
    %cst_30 = arith.constant dense<0.000000e+00> : vector<28x168xf32>
    %35 = tpu.matmul %32, %34, %cst_30 {dimension_numbers = #tpu.dot_dimension_numbers<[1], [0], [0], [1], [0, 0, 1, 1], [], []>} : vector<28x32xbf16>, vector<32x168xbf16>, vector<28x168xf32> -> vector<28x168xf32>
    %36 = arith.addf %29, %35 : vector<28x168xf32>
    %37 = arith.negf %36 : vector<28x168xf32>
    %38 = math.exp %37 : vector<28x168xf32>
    %cst_31 = arith.constant 1.000000e+00 : f32
    %39 = vector.broadcast %cst_31 : f32 to vector<28x168xf32>
    %40 = arith.addf %39, %38 : vector<28x168xf32>
    %41 = arith.divf %39, %40 : vector<28x168xf32>
    %c0_32 = arith.constant 0 : index
    %c0_33 = arith.constant 0 : index
    %42 = vector.load %arg3[%c0_32, %c0_33] : memref<14x28xbf16, #tpu.memory_space<vmem>>, vector<14x28xbf16>
    %43 = arith.truncf %41 : vector<28x168xf32> to vector<28x168xbf16>
    %cst_34 = arith.constant dense<0.000000e+00> : vector<14x168xf32>
    %44 = tpu.matmul %42, %43, %cst_34 {dimension_numbers = #tpu.dot_dimension_numbers<[1], [0], [0], [1], [0, 0, 1, 1], [], []>} : vector<14x28xbf16>, vector<28x168xbf16>, vector<14x168xf32> -> vector<14x168xf32>
    %c0_35 = arith.constant 0 : index
    %c0_36 = arith.constant 0 : index
    %45 = vector.load %arg13[%c0_35, %c0_36] : memref<14x168xf32, #tpu.memory_space<vmem>>, vector<14x168xf32>
    tpu.vector_store %arg13[%c0_35, %c0_36], %44 {strides = array<i32>} : memref<14x168xf32, #tpu.memory_space<vmem>>, vector<14x168xf32>,
    %c0_37 = arith.constant 0 : index
    %c0_38 = arith.constant 0 : index
    %46 = vector.load %arg5[%c0_37, %c0_38] : memref<1x160xf32, #tpu.memory_space<vmem>>, vector<1x160xf32>
    %c0_39 = arith.constant 0 : index
    %c0_40 = arith.constant 0 : index
    %47 = vector.load %arg13[%c0_39, %c0_40] : memref<14x168xf32, #tpu.memory_space<vmem>>, vector<10x168xf32>
    %48 = arith.truncf %47 : vector<10x168xf32> to vector<10x168xbf16>
    %c0_41 = arith.constant 0 : index
    %c0_42 = arith.constant 0 : index
    %c0_43 = arith.constant 0 : index
    %49 = vector.load %arg4[%c0_41, %c0_42, %c0_43] : memref<5x168x160xbf16, #tpu.memory_space<vmem>>, vector<1x168x160xbf16>
    %50 = vector.shape_cast %49 : vector<1x168x160xbf16> to vector<168x160xbf16>
    %cst_44 = arith.constant dense<0.000000e+00> : vector<10x160xf32>
    %51 = tpu.matmul %48, %50, %cst_44 {dimension_numbers = #tpu.dot_dimension_numbers<[1], [0], [0], [1], [0, 0, 1, 1], [], []>} : vector<10x168xbf16>, vector<168x160xbf16>, vector<10x160xf32> -> vector<10x160xf32>
    %52 = vector.broadcast %46 : vector<1x160xf32> to vector<10x160xf32>
    %53 = arith.addf %52, %51 : vector<10x160xf32>
    %c1_45 = arith.constant 1 : index
    %c0_46 = arith.constant 0 : index
    %54 = vector.load %arg13[%c1_45, %c0_46] : memref<14x168xf32, #tpu.memory_space<vmem>>, vector<10x168xf32>
    %55 = arith.truncf %54 : vector<10x168xf32> to vector<10x168xbf16>
    %c1_47 = arith.constant 1 : index
    %c0_48 = arith.constant 0 : index
    %c0_49 = arith.constant 0 : index
    %56 = vector.load %arg4[%c1_47, %c0_48, %c0_49] : memref<5x168x160xbf16, #tpu.memory_space<vmem>>, vector<1x168x160xbf16>
    %57 = vector.shape_cast %56 : vector<1x168x160xbf16> to vector<168x160xbf16>
    %cst_50 = arith.constant dense<0.000000e+00> : vector<10x160xf32>
    %58 = tpu.matmul %55, %57, %cst_50 {dimension_numbers = #tpu.dot_dimension_numbers<[1], [0], [0], [1], [0, 0, 1, 1], [], []>} : vector<10x168xbf16>, vector<168x160xbf16>, vector<10x160xf32> -> vector<10x160xf32>
    %59 = arith.addf %53, %58 : vector<10x160xf32>
    %c2_51 = arith.constant 2 : index
    %c0_52 = arith.constant 0 : index
    %60 = vector.load %arg13[%c2_51, %c0_52] : memref<14x168xf32, #tpu.memory_space<vmem>>, vector<10x168xf32>
    %61 = arith.truncf %60 : vector<10x168xf32> to vector<10x168xbf16>
    %c2_53 = arith.constant 2 : index
    %c0_54 = arith.constant 0 : index
    %c0_55 = arith.constant 0 : index
    %62 = vector.load %arg4[%c2_53, %c0_54, %c0_55] : memref<5x168x160xbf16, #tpu.memory_space<vmem>>, vector<1x168x160xbf16>
    %63 = vector.shape_cast %62 : vector<1x168x160xbf16> to vector<168x160xbf16>
    %cst_56 = arith.constant dense<0.000000e+00> : vector<10x160xf32>
    %64 = tpu.matmul %61, %63, %cst_56 {dimension_numbers = #tpu.dot_dimension_numbers<[1], [0], [0], [1], [0, 0, 1, 1], [], []>} : vector<10x168xbf16>, vector<168x160xbf16>, vector<10x160xf32> -> vector<10x160xf32>
    %65 = arith.addf %59, %64 : vector<10x160xf32>
    %c3_57 = arith.constant 3 : index
    %c0_58 = arith.constant 0 : index
    %66 = vector.load %arg13[%c3_57, %c0_58] : memref<14x168xf32, #tpu.memory_space<vmem>>, vector<10x168xf32>
    %67 = arith.truncf %66 : vector<10x168xf32> to vector<10x168xbf16>
    %c3_59 = arith.constant 3 : index
    %c0_60 = arith.constant 0 : index
    %c0_61 = arith.constant 0 : index
    %68 = vector.load %arg4[%c3_59, %c0_60, %c0_61] : memref<5x168x160xbf16, #tpu.memory_space<vmem>>, vector<1x168x160xbf16>
    %69 = vector.shape_cast %68 : vector<1x168x160xbf16> to vector<168x160xbf16>
    %cst_62 = arith.constant dense<0.000000e+00> : vector<10x160xf32>
    %70 = tpu.matmul %67, %69, %cst_62 {dimension_numbers = #tpu.dot_dimension_numbers<[1], [0], [0], [1], [0, 0, 1, 1], [], []>} : vector<10x168xbf16>, vector<168x160xbf16>, vector<10x160xf32> -> vector<10x160xf32>
    %71 = arith.addf %65, %70 : vector<10x160xf32>
    %c4_63 = arith.constant 4 : index
    %c0_64 = arith.constant 0 : index
    %72 = vector.load %arg13[%c4_63, %c0_64] : memref<14x168xf32, #tpu.memory_space<vmem>>, vector<10x168xf32>
    %73 = arith.truncf %72 : vector<10x168xf32> to vector<10x168xbf16>
    %c4_65 = arith.constant 4 : index
    %c0_66 = arith.constant 0 : index
    %c0_67 = arith.constant 0 : index
    %74 = vector.load %arg4[%c4_65, %c0_66, %c0_67] : memref<5x168x160xbf16, #tpu.memory_space<vmem>>, vector<1x168x160xbf16>
    %75 = vector.shape_cast %74 : vector<1x168x160xbf16> to vector<168x160xbf16>
    %cst_68 = arith.constant dense<0.000000e+00> : vector<10x160xf32>
    %76 = tpu.matmul %73, %75, %cst_68 {dimension_numbers = #tpu.dot_dimension_numbers<[1], [0], [0], [1], [0, 0, 1, 1], [], []>} : vector<10x168xbf16>, vector<168x160xbf16>, vector<10x160xf32> -> vector<10x160xf32>
    %77 = arith.addf %71, %76 : vector<10x160xf32>
    %78 = arith.negf %77 : vector<10x160xf32>
    %79 = math.exp %78 : vector<10x160xf32>
    %cst_69 = arith.constant 1.000000e+00 : f32
    %80 = vector.broadcast %cst_69 : f32 to vector<10x160xf32>
    %81 = arith.addf %80, %79 : vector<10x160xf32>
    %82 = arith.divf %80, %81 : vector<10x160xf32>
    %c0_70 = arith.constant 0 : index
    %c0_71 = arith.constant 0 : index
    %83 = vector.load %arg14[%c0_70, %c0_71] : memref<10x160xf32, #tpu.memory_space<vmem>>, vector<10x160xf32>
    tpu.vector_store %arg14[%c0_70, %c0_71], %82 {strides = array<i32>} : memref<10x160xf32, #tpu.memory_space<vmem>>, vector<10x160xf32>,
    %c0_72 = arith.constant 0 : index
    %c0_73 = arith.constant 0 : index
    %84 = vector.load %arg7[%c0_72, %c0_73] : memref<1x120xf32, #tpu.memory_space<vmem>>, vector<1x120xf32>
    %c0_74 = arith.constant 0 : index
    %c0_75 = arith.constant 0 : index
    %85 = vector.load %arg14[%c0_74, %c0_75] : memref<10x160xf32, #tpu.memory_space<vmem>>, vector<1x160xf32>
    %86 = arith.truncf %85 : vector<1x160xf32> to vector<1x160xbf16>
    %c0_76 = arith.constant 0 : index
    %c0_77 = arith.constant 0 : index
    %c0_78 = arith.constant 0 : index
    %87 = vector.load %arg6[%c0_76, %c0_77, %c0_78] : memref<10x160x120xbf16, #tpu.memory_space<vmem>>, vector<1x160x120xbf16>
    %88 = vector.shape_cast %87 : vector<1x160x120xbf16> to vector<160x120xbf16>
    %cst_79 = arith.constant dense<0.000000e+00> : vector<1x120xf32>
    %89 = tpu.matmul %86, %88, %cst_79 {dimension_numbers = #tpu.dot_dimension_numbers<[1], [0], [0], [1], [0, 0, 1, 1], [], []>} : vector<1x160xbf16>, vector<160x120xbf16>, vector<1x120xf32> -> vector<1x120xf32>
    %90 = arith.addf %84, %89 : vector<1x120xf32>
    %c1_80 = arith.constant 1 : index
    %c0_81 = arith.constant 0 : index
    %91 = vector.load %arg14[%c1_80, %c0_81] : memref<10x160xf32, #tpu.memory_space<vmem>>, vector<1x160xf32>
    %92 = arith.truncf %91 : vector<1x160xf32> to vector<1x160xbf16>
    %c1_82 = arith.constant 1 : index
    %c0_83 = arith.constant 0 : index
    %c0_84 = arith.constant 0 : index
    %93 = vector.load %arg6[%c1_82, %c0_83, %c0_84] : memref<10x160x120xbf16, #tpu.memory_space<vmem>>, vector<1x160x120xbf16>
    %94 = vector.shape_cast %93 : vector<1x160x120xbf16> to vector<160x120xbf16>
    %cst_85 = arith.constant dense<0.000000e+00> : vector<1x120xf32>
    %95 = tpu.matmul %92, %94, %cst_85 {dimension_numbers = #tpu.dot_dimension_numbers<[1], [0], [0], [1], [0, 0, 1, 1], [], []>} : vector<1x160xbf16>, vector<160x120xbf16>, vector<1x120xf32> -> vector<1x120xf32>
    %96 = arith.addf %90, %95 : vector<1x120xf32>
    %c2_86 = arith.constant 2 : index
    %c0_87 = arith.constant 0 : index
    %97 = vector.load %arg14[%c2_86, %c0_87] : memref<10x160xf32, #tpu.memory_space<vmem>>, vector<1x160xf32>
    %98 = arith.truncf %97 : vector<1x160xf32> to vector<1x160xbf16>
    %c2_88 = arith.constant 2 : index
    %c0_89 = arith.constant 0 : index
    %c0_90 = arith.constant 0 : index
    %99 = vector.load %arg6[%c2_88, %c0_89, %c0_90] : memref<10x160x120xbf16, #tpu.memory_space<vmem>>, vector<1x160x120xbf16>
    %100 = vector.shape_cast %99 : vector<1x160x120xbf16> to vector<160x120xbf16>
    %cst_91 = arith.constant dense<0.000000e+00> : vector<1x120xf32>
    %101 = tpu.matmul %98, %100, %cst_91 {dimension_numbers = #tpu.dot_dimension_numbers<[1], [0], [0], [1], [0, 0, 1, 1], [], []>} : vector<1x160xbf16>, vector<160x120xbf16>, vector<1x120xf32> -> vector<1x120xf32>
    %102 = arith.addf %96, %101 : vector<1x120xf32>
    %c3_92 = arith.constant 3 : index
    %c0_93 = arith.constant 0 : index
    %103 = vector.load %arg14[%c3_92, %c0_93] : memref<10x160xf32, #tpu.memory_space<vmem>>, vector<1x160xf32>
    %104 = arith.truncf %103 : vector<1x160xf32> to vector<1x160xbf16>
    %c3_94 = arith.constant 3 : index
    %c0_95 = arith.constant 0 : index
    %c0_96 = arith.constant 0 : index
    %105 = vector.load %arg6[%c3_94, %c0_95, %c0_96] : memref<10x160x120xbf16, #tpu.memory_space<vmem>>, vector<1x160x120xbf16>
    %106 = vector.shape_cast %105 : vector<1x160x120xbf16> to vector<160x120xbf16>
    %cst_97 = arith.constant dense<0.000000e+00> : vector<1x120xf32>
    %107 = tpu.matmul %104, %106, %cst_97 {dimension_numbers = #tpu.dot_dimension_numbers<[1], [0], [0], [1], [0, 0, 1, 1], [], []>} : vector<1x160xbf16>, vector<160x120xbf16>, vector<1x120xf32> -> vector<1x120xf32>
    %108 = arith.addf %102, %107 : vector<1x120xf32>
    %c4_98 = arith.constant 4 : index
    %c0_99 = arith.constant 0 : index
    %109 = vector.load %arg14[%c4_98, %c0_99] : memref<10x160xf32, #tpu.memory_space<vmem>>, vector<1x160xf32>
    %110 = arith.truncf %109 : vector<1x160xf32> to vector<1x160xbf16>
    %c4_100 = arith.constant 4 : index
    %c0_101 = arith.constant 0 : index
    %c0_102 = arith.constant 0 : index
    %111 = vector.load %arg6[%c4_100, %c0_101, %c0_102] : memref<10x160x120xbf16, #tpu.memory_space<vmem>>, vector<1x160x120xbf16>
    %112 = vector.shape_cast %111 : vector<1x160x120xbf16> to vector<160x120xbf16>
    %cst_103 = arith.constant dense<0.000000e+00> : vector<1x120xf32>
    %113 = tpu.matmul %110, %112, %cst_103 {dimension_numbers = #tpu.dot_dimension_numbers<[1], [0], [0], [1], [0, 0, 1, 1], [], []>} : vector<1x160xbf16>, vector<160x120xbf16>, vector<1x120xf32> -> vector<1x120xf32>
    %114 = arith.addf %108, %113 : vector<1x120xf32>
    %c5 = arith.constant 5 : index
    %c0_104 = arith.constant 0 : index
    %115 = vector.load %arg14[%c5, %c0_104] : memref<10x160xf32, #tpu.memory_space<vmem>>, vector<1x160xf32>
    %116 = arith.truncf %115 : vector<1x160xf32> to vector<1x160xbf16>
    %c5_105 = arith.constant 5 : index
    %c0_106 = arith.constant 0 : index
    %c0_107 = arith.constant 0 : index
    %117 = vector.load %arg6[%c5_105, %c0_106, %c0_107] : memref<10x160x120xbf16, #tpu.memory_space<vmem>>, vector<1x160x120xbf16>
    %118 = vector.shape_cast %117 : vector<1x160x120xbf16> to vector<160x120xbf16>
    %cst_108 = arith.constant dense<0.000000e+00> : vector<1x120xf32>
    %119 = tpu.matmul %116, %118, %cst_108 {dimension_numbers = #tpu.dot_dimension_numbers<[1], [0], [0], [1], [0, 0, 1, 1], [], []>} : vector<1x160xbf16>, vector<160x120xbf16>, vector<1x120xf32> -> vector<1x120xf32>
    %120 = arith.addf %114, %119 : vector<1x120xf32>
    %c6 = arith.constant 6 : index
    %c0_109 = arith.constant 0 : index
    %121 = vector.load %arg14[%c6, %c0_109] : memref<10x160xf32, #tpu.memory_space<vmem>>, vector<1x160xf32>
    %122 = arith.truncf %121 : vector<1x160xf32> to vector<1x160xbf16>
    %c6_110 = arith.constant 6 : index
    %c0_111 = arith.constant 0 : index
    %c0_112 = arith.constant 0 : index
    %123 = vector.load %arg6[%c6_110, %c0_111, %c0_112] : memref<10x160x120xbf16, #tpu.memory_space<vmem>>, vector<1x160x120xbf16>
    %124 = vector.shape_cast %123 : vector<1x160x120xbf16> to vector<160x120xbf16>
    %cst_113 = arith.constant dense<0.000000e+00> : vector<1x120xf32>
    %125 = tpu.matmul %122, %124, %cst_113 {dimension_numbers = #tpu.dot_dimension_numbers<[1], [0], [0], [1], [0, 0, 1, 1], [], []>} : vector<1x160xbf16>, vector<160x120xbf16>, vector<1x120xf32> -> vector<1x120xf32>
    %126 = arith.addf %120, %125 : vector<1x120xf32>
    %c7 = arith.constant 7 : index
    %c0_114 = arith.constant 0 : index
    %127 = vector.load %arg14[%c7, %c0_114] : memref<10x160xf32, #tpu.memory_space<vmem>>, vector<1x160xf32>
    %128 = arith.truncf %127 : vector<1x160xf32> to vector<1x160xbf16>
    %c7_115 = arith.constant 7 : index
    %c0_116 = arith.constant 0 : index
    %c0_117 = arith.constant 0 : index
    %129 = vector.load %arg6[%c7_115, %c0_116, %c0_117] : memref<10x160x120xbf16, #tpu.memory_space<vmem>>, vector<1x160x120xbf16>
    %130 = vector.shape_cast %129 : vector<1x160x120xbf16> to vector<160x120xbf16>
    %cst_118 = arith.constant dense<0.000000e+00> : vector<1x120xf32>
    %131 = tpu.matmul %128, %130, %cst_118 {dimension_numbers = #tpu.dot_dimension_numbers<[1], [0], [0], [1], [0, 0, 1, 1], [], []>} : vector<1x160xbf16>, vector<160x120xbf16>, vector<1x120xf32> -> vector<1x120xf32>
    %132 = arith.addf %126, %131 : vector<1x120xf32>
    %c8 = arith.constant 8 : index
    %c0_119 = arith.constant 0 : index
    %133 = vector.load %arg14[%c8, %c0_119] : memref<10x160xf32, #tpu.memory_space<vmem>>, vector<1x160xf32>
    %134 = arith.truncf %133 : vector<1x160xf32> to vector<1x160xbf16>
    %c8_120 = arith.constant 8 : index
    %c0_121 = arith.constant 0 : index
    %c0_122 = arith.constant 0 : index
    %135 = vector.load %arg6[%c8_120, %c0_121, %c0_122] : memref<10x160x120xbf16, #tpu.memory_space<vmem>>, vector<1x160x120xbf16>
    %136 = vector.shape_cast %135 : vector<1x160x120xbf16> to vector<160x120xbf16>
    %cst_123 = arith.constant dense<0.000000e+00> : vector<1x120xf32>
    %137 = tpu.matmul %134, %136, %cst_123 {dimension_numbers = #tpu.dot_dimension_numbers<[1], [0], [0], [1], [0, 0, 1, 1], [], []>} : vector<1x160xbf16>, vector<160x120xbf16>, vector<1x120xf32> -> vector<1x120xf32>
    %138 = arith.addf %132, %137 : vector<1x120xf32>
    %c9 = arith.constant 9 : index
    %c0_124 = arith.constant 0 : index
    %139 = vector.load %arg14[%c9, %c0_124] : memref<10x160xf32, #tpu.memory_space<vmem>>, vector<1x160xf32>
    %140 = arith.truncf %139 : vector<1x160xf32> to vector<1x160xbf16>
    %c9_125 = arith.constant 9 : index
    %c0_126 = arith.constant 0 : index
    %c0_127 = arith.constant 0 : index
    %141 = vector.load %arg6[%c9_125, %c0_126, %c0_127] : memref<10x160x120xbf16, #tpu.memory_space<vmem>>, vector<1x160x120xbf16>
    %142 = vector.shape_cast %141 : vector<1x160x120xbf16> to vector<160x120xbf16>
    %cst_128 = arith.constant dense<0.000000e+00> : vector<1x120xf32>
    %143 = tpu.matmul %140, %142, %cst_128 {dimension_numbers = #tpu.dot_dimension_numbers<[1], [0], [0], [1], [0, 0, 1, 1], [], []>} : vector<1x160xbf16>, vector<160x120xbf16>, vector<1x120xf32> -> vector<1x120xf32>
    %144 = arith.addf %138, %143 : vector<1x120xf32>
    %145 = arith.truncf %144 : vector<1x120xf32> to vector<1x120xbf16>
    %c0_129 = arith.constant 0 : index
    %c0_130 = arith.constant 0 : index
    %146 = vector.load %arg8[%c0_129, %c0_130] : memref<120x84xbf16, #tpu.memory_space<vmem>>, vector<120x84xbf16>
    %cst_131 = arith.constant dense<0.000000e+00> : vector<1x84xf32>
    %147 = tpu.matmul %145, %146, %cst_131 {dimension_numbers = #tpu.dot_dimension_numbers<[1], [0], [0], [1], [0, 0, 1, 1], [], []>} : vector<1x120xbf16>, vector<120x84xbf16>, vector<1x84xf32> -> vector<1x84xf32>
    %c0_132 = arith.constant 0 : index
    %c0_133 = arith.constant 0 : index
    %148 = vector.load %arg9[%c0_132, %c0_133] : memref<1x84xf32, #tpu.memory_space<vmem>>, vector<1x84xf32>
    %149 = arith.addf %147, %148 : vector<1x84xf32>
    %150 = arith.truncf %149 : vector<1x84xf32> to vector<1x84xbf16>
    %c0_134 = arith.constant 0 : index
    %c0_135 = arith.constant 0 : index
    %151 = vector.load %arg10[%c0_134, %c0_135] : memref<84x10xbf16, #tpu.memory_space<vmem>>, vector<84x10xbf16>
    %cst_136 = arith.constant dense<0.000000e+00> : vector<1x10xf32>
    %152 = tpu.matmul %150, %151, %cst_136 {dimension_numbers = #tpu.dot_dimension_numbers<[1], [0], [0], [1], [0, 0, 1, 1], [], []>} : vector<1x84xbf16>, vector<84x10xbf16>, vector<1x10xf32> -> vector<1x10xf32>
    %c0_137 = arith.constant 0 : index
    %c0_138 = arith.constant 0 : index
    %153 = vector.load %arg11[%c0_137, %c0_138] : memref<1x10xf32, #tpu.memory_space<vmem>>, vector<1x10xf32>
    %154 = arith.addf %152, %153 : vector<1x10xf32>
    %c0_139 = arith.constant 0 : index
    %c0_140 = arith.constant 0 : index
    %155 = vector.load %arg12[%c0_139, %c0_140] : memref<2x10xf32, #tpu.memory_space<vmem>>, vector<1x10xf32>
    tpu.vector_store %arg12[%c0_139, %c0_140], %154 {strides = array<i32>} : memref<2x10xf32, #tpu.memory_space<vmem>>, vector<1x10xf32>,
    %c0_141 = arith.constant 0 : index
    %c0_142 = arith.constant 0 : index
    %156 = vector.load %arg2[%c0_141, %c0_142] : memref<1x168xf32, #tpu.memory_space<vmem>>, vector<1x168xf32>
    %c1_143 = arith.constant 1 : index
    %c0_144 = arith.constant 0 : index
    %c0_145 = arith.constant 0 : index
    %157 = vector.load %arg0[%c1_143, %c0_144, %c0_145] : memref<2x32x32xf32, #tpu.memory_space<vmem>>, vector<1x28x32xf32>
    %158 = vector.shape_cast %157 : vector<1x28x32xf32> to vector<28x32xf32>
    %159 = arith.truncf %158 : vector<28x32xf32> to vector<28x32xbf16>
    %c0_146 = arith.constant 0 : index
    %c0_147 = arith.constant 0 : index
    %c0_148 = arith.constant 0 : index
    %160 = vector.load %arg1[%c0_146, %c0_147, %c0_148] : memref<5x32x168xbf16, #tpu.memory_space<vmem>>, vector<1x32x168xbf16>
    %161 = vector.shape_cast %160 : vector<1x32x168xbf16> to vector<32x168xbf16>
    %cst_149 = arith.constant dense<0.000000e+00> : vector<28x168xf32>
    %162 = tpu.matmul %159, %161, %cst_149 {dimension_numbers = #tpu.dot_dimension_numbers<[1], [0], [0], [1], [0, 0, 1, 1], [], []>} : vector<28x32xbf16>, vector<32x168xbf16>, vector<28x168xf32> -> vector<28x168xf32>
    %163 = vector.broadcast %156 : vector<1x168xf32> to vector<28x168xf32>
    %164 = arith.addf %163, %162 : vector<28x168xf32>
    %c1_150 = arith.constant 1 : index
    %c1_151 = arith.constant 1 : index
    %c0_152 = arith.constant 0 : index
    %165 = vector.load %arg0[%c1_150, %c1_151, %c0_152] : memref<2x32x32xf32, #tpu.memory_space<vmem>>, vector<1x28x32xf32>
    %166 = vector.shape_cast %165 : vector<1x28x32xf32> to vector<28x32xf32>
    %167 = arith.truncf %166 : vector<28x32xf32> to vector<28x32xbf16>
    %c1_153 = arith.constant 1 : index
    %c0_154 = arith.constant 0 : index
    %c0_155 = arith.constant 0 : index
    %168 = vector.load %arg1[%c1_153, %c0_154, %c0_155] : memref<5x32x168xbf16, #tpu.memory_space<vmem>>, vector<1x32x168xbf16>
    %169 = vector.shape_cast %168 : vector<1x32x168xbf16> to vector<32x168xbf16>
    %cst_156 = arith.constant dense<0.000000e+00> : vector<28x168xf32>
    %170 = tpu.matmul %167, %169, %cst_156 {dimension_numbers = #tpu.dot_dimension_numbers<[1], [0], [0], [1], [0, 0, 1, 1], [], []>} : vector<28x32xbf16>, vector<32x168xbf16>, vector<28x168xf32> -> vector<28x168xf32>
    %171 = arith.addf %164, %170 : vector<28x168xf32>
    %c1_157 = arith.constant 1 : index
    %c2_158 = arith.constant 2 : index
    %c0_159 = arith.constant 0 : index
    %172 = vector.load %arg0[%c1_157, %c2_158, %c0_159] : memref<2x32x32xf32, #tpu.memory_space<vmem>>, vector<1x28x32xf32>
    %173 = vector.shape_cast %172 : vector<1x28x32xf32> to vector<28x32xf32>
    %174 = arith.truncf %173 : vector<28x32xf32> to vector<28x32xbf16>
    %c2_160 = arith.constant 2 : index
    %c0_161 = arith.constant 0 : index
    %c0_162 = arith.constant 0 : index
    %175 = vector.load %arg1[%c2_160, %c0_161, %c0_162] : memref<5x32x168xbf16, #tpu.memory_space<vmem>>, vector<1x32x168xbf16>
    %176 = vector.shape_cast %175 : vector<1x32x168xbf16> to vector<32x168xbf16>
    %cst_163 = arith.constant dense<0.000000e+00> : vector<28x168xf32>
    %177 = tpu.matmul %174, %176, %cst_163 {dimension_numbers = #tpu.dot_dimension_numbers<[1], [0], [0], [1], [0, 0, 1, 1], [], []>} : vector<28x32xbf16>, vector<32x168xbf16>, vector<28x168xf32> -> vector<28x168xf32>
    %178 = arith.addf %171, %177 : vector<28x168xf32>
    %c1_164 = arith.constant 1 : index
    %c3_165 = arith.constant 3 : index
    %c0_166 = arith.constant 0 : index
    %179 = vector.load %arg0[%c1_164, %c3_165, %c0_166] : memref<2x32x32xf32, #tpu.memory_space<vmem>>, vector<1x28x32xf32>
    %180 = vector.shape_cast %179 : vector<1x28x32xf32> to vector<28x32xf32>
    %181 = arith.truncf %180 : vector<28x32xf32> to vector<28x32xbf16>
    %c3_167 = arith.constant 3 : index
    %c0_168 = arith.constant 0 : index
    %c0_169 = arith.constant 0 : index
    %182 = vector.load %arg1[%c3_167, %c0_168, %c0_169] : memref<5x32x168xbf16, #tpu.memory_space<vmem>>, vector<1x32x168xbf16>
    %183 = vector.shape_cast %182 : vector<1x32x168xbf16> to vector<32x168xbf16>
    %cst_170 = arith.constant dense<0.000000e+00> : vector<28x168xf32>
    %184 = tpu.matmul %181, %183, %cst_170 {dimension_numbers = #tpu.dot_dimension_numbers<[1], [0], [0], [1], [0, 0, 1, 1], [], []>} : vector<28x32xbf16>, vector<32x168xbf16>, vector<28x168xf32> -> vector<28x168xf32>
    %185 = arith.addf %178, %184 : vector<28x168xf32>
    %c1_171 = arith.constant 1 : index
    %c4_172 = arith.constant 4 : index
    %c0_173 = arith.constant 0 : index
    %186 = vector.load %arg0[%c1_171, %c4_172, %c0_173] : memref<2x32x32xf32, #tpu.memory_space<vmem>>, vector<1x28x32xf32>
    %187 = vector.shape_cast %186 : vector<1x28x32xf32> to vector<28x32xf32>
    %188 = arith.truncf %187 : vector<28x32xf32> to vector<28x32xbf16>
    %c4_174 = arith.constant 4 : index
    %c0_175 = arith.constant 0 : index
    %c0_176 = arith.constant 0 : index
    %189 = vector.load %arg1[%c4_174, %c0_175, %c0_176] : memref<5x32x168xbf16, #tpu.memory_space<vmem>>, vector<1x32x168xbf16>
    %190 = vector.shape_cast %189 : vector<1x32x168xbf16> to vector<32x168xbf16>
    %cst_177 = arith.constant dense<0.000000e+00> : vector<28x168xf32>
    %191 = tpu.matmul %188, %190, %cst_177 {dimension_numbers = #tpu.dot_dimension_numbers<[1], [0], [0], [1], [0, 0, 1, 1], [], []>} : vector<28x32xbf16>, vector<32x168xbf16>, vector<28x168xf32> -> vector<28x168xf32>
    %192 = arith.addf %185, %191 : vector<28x168xf32>
    %193 = arith.negf %192 : vector<28x168xf32>
    %194 = math.exp %193 : vector<28x168xf32>
    %cst_178 = arith.constant 1.000000e+00 : f32
    %195 = vector.broadcast %cst_178 : f32 to vector<28x168xf32>
    %196 = arith.addf %195, %194 : vector<28x168xf32>
    %197 = arith.divf %195, %196 : vector<28x168xf32>
    %c0_179 = arith.constant 0 : index
    %c0_180 = arith.constant 0 : index
    %198 = vector.load %arg3[%c0_179, %c0_180] : memref<14x28xbf16, #tpu.memory_space<vmem>>, vector<14x28xbf16>
    %199 = arith.truncf %197 : vector<28x168xf32> to vector<28x168xbf16>
    %cst_181 = arith.constant dense<0.000000e+00> : vector<14x168xf32>
    %200 = tpu.matmul %198, %199, %cst_181 {dimension_numbers = #tpu.dot_dimension_numbers<[1], [0], [0], [1], [0, 0, 1, 1], [], []>} : vector<14x28xbf16>, vector<28x168xbf16>, vector<14x168xf32> -> vector<14x168xf32>
    %c0_182 = arith.constant 0 : index
    %c0_183 = arith.constant 0 : index
    %201 = vector.load %arg13[%c0_182, %c0_183] : memref<14x168xf32, #tpu.memory_space<vmem>>, vector<14x168xf32>
    tpu.vector_store %arg13[%c0_182, %c0_183], %200 {strides = array<i32>} : memref<14x168xf32, #tpu.memory_space<vmem>>, vector<14x168xf32>,
    %c0_184 = arith.constant 0 : index
    %c0_185 = arith.constant 0 : index
    %202 = vector.load %arg5[%c0_184, %c0_185] : memref<1x160xf32, #tpu.memory_space<vmem>>, vector<1x160xf32>
    %c0_186 = arith.constant 0 : index
    %c0_187 = arith.constant 0 : index
    %203 = vector.load %arg13[%c0_186, %c0_187] : memref<14x168xf32, #tpu.memory_space<vmem>>, vector<10x168xf32>
    %204 = arith.truncf %203 : vector<10x168xf32> to vector<10x168xbf16>
    %c0_188 = arith.constant 0 : index
    %c0_189 = arith.constant 0 : index
    %c0_190 = arith.constant 0 : index
    %205 = vector.load %arg4[%c0_188, %c0_189, %c0_190] : memref<5x168x160xbf16, #tpu.memory_space<vmem>>, vector<1x168x160xbf16>
    %206 = vector.shape_cast %205 : vector<1x168x160xbf16> to vector<168x160xbf16>
    %cst_191 = arith.constant dense<0.000000e+00> : vector<10x160xf32>
    %207 = tpu.matmul %204, %206, %cst_191 {dimension_numbers = #tpu.dot_dimension_numbers<[1], [0], [0], [1], [0, 0, 1, 1], [], []>} : vector<10x168xbf16>, vector<168x160xbf16>, vector<10x160xf32> -> vector<10x160xf32>
    %208 = vector.broadcast %202 : vector<1x160xf32> to vector<10x160xf32>
    %209 = arith.addf %208, %207 : vector<10x160xf32>
    %c1_192 = arith.constant 1 : index
    %c0_193 = arith.constant 0 : index
    %210 = vector.load %arg13[%c1_192, %c0_193] : memref<14x168xf32, #tpu.memory_space<vmem>>, vector<10x168xf32>
    %211 = arith.truncf %210 : vector<10x168xf32> to vector<10x168xbf16>
    %c1_194 = arith.constant 1 : index
    %c0_195 = arith.constant 0 : index
    %c0_196 = arith.constant 0 : index
    %212 = vector.load %arg4[%c1_194, %c0_195, %c0_196] : memref<5x168x160xbf16, #tpu.memory_space<vmem>>, vector<1x168x160xbf16>
    %213 = vector.shape_cast %212 : vector<1x168x160xbf16> to vector<168x160xbf16>
    %cst_197 = arith.constant dense<0.000000e+00> : vector<10x160xf32>
    %214 = tpu.matmul %211, %213, %cst_197 {dimension_numbers = #tpu.dot_dimension_numbers<[1], [0], [0], [1], [0, 0, 1, 1], [], []>} : vector<10x168xbf16>, vector<168x160xbf16>, vector<10x160xf32> -> vector<10x160xf32>
    %215 = arith.addf %209, %214 : vector<10x160xf32>
    %c2_198 = arith.constant 2 : index
    %c0_199 = arith.constant 0 : index
    %216 = vector.load %arg13[%c2_198, %c0_199] : memref<14x168xf32, #tpu.memory_space<vmem>>, vector<10x168xf32>
    %217 = arith.truncf %216 : vector<10x168xf32> to vector<10x168xbf16>
    %c2_200 = arith.constant 2 : index
    %c0_201 = arith.constant 0 : index
    %c0_202 = arith.constant 0 : index
    %218 = vector.load %arg4[%c2_200, %c0_201, %c0_202] : memref<5x168x160xbf16, #tpu.memory_space<vmem>>, vector<1x168x160xbf16>
    %219 = vector.shape_cast %218 : vector<1x168x160xbf16> to vector<168x160xbf16>
    %cst_203 = arith.constant dense<0.000000e+00> : vector<10x160xf32>
    %220 = tpu.matmul %217, %219, %cst_203 {dimension_numbers = #tpu.dot_dimension_numbers<[1], [0], [0], [1], [0, 0, 1, 1], [], []>} : vector<10x168xbf16>, vector<168x160xbf16>, vector<10x160xf32> -> vector<10x160xf32>
    %221 = arith.addf %215, %220 : vector<10x160xf32>
    %c3_204 = arith.constant 3 : index
    %c0_205 = arith.constant 0 : index
    %222 = vector.load %arg13[%c3_204, %c0_205] : memref<14x168xf32, #tpu.memory_space<vmem>>, vector<10x168xf32>
    %223 = arith.truncf %222 : vector<10x168xf32> to vector<10x168xbf16>
    %c3_206 = arith.constant 3 : index
    %c0_207 = arith.constant 0 : index
    %c0_208 = arith.constant 0 : index
    %224 = vector.load %arg4[%c3_206, %c0_207, %c0_208] : memref<5x168x160xbf16, #tpu.memory_space<vmem>>, vector<1x168x160xbf16>
    %225 = vector.shape_cast %224 : vector<1x168x160xbf16> to vector<168x160xbf16>
    %cst_209 = arith.constant dense<0.000000e+00> : vector<10x160xf32>
    %226 = tpu.matmul %223, %225, %cst_209 {dimension_numbers = #tpu.dot_dimension_numbers<[1], [0], [0], [1], [0, 0, 1, 1], [], []>} : vector<10x168xbf16>, vector<168x160xbf16>, vector<10x160xf32> -> vector<10x160xf32>
    %227 = arith.addf %221, %226 : vector<10x160xf32>
    %c4_210 = arith.constant 4 : index
    %c0_211 = arith.constant 0 : index
    %228 = vector.load %arg13[%c4_210, %c0_211] : memref<14x168xf32, #tpu.memory_space<vmem>>, vector<10x168xf32>
    %229 = arith.truncf %228 : vector<10x168xf32> to vector<10x168xbf16>
    %c4_212 = arith.constant 4 : index
    %c0_213 = arith.constant 0 : index
    %c0_214 = arith.constant 0 : index
    %230 = vector.load %arg4[%c4_212, %c0_213, %c0_214] : memref<5x168x160xbf16, #tpu.memory_space<vmem>>, vector<1x168x160xbf16>
    %231 = vector.shape_cast %230 : vector<1x168x160xbf16> to vector<168x160xbf16>
    %cst_215 = arith.constant dense<0.000000e+00> : vector<10x160xf32>
    %232 = tpu.matmul %229, %231, %cst_215 {dimension_numbers = #tpu.dot_dimension_numbers<[1], [0], [0], [1], [0, 0, 1, 1], [], []>} : vector<10x168xbf16>, vector<168x160xbf16>, vector<10x160xf32> -> vector<10x160xf32>
    %233 = arith.addf %227, %232 : vector<10x160xf32>
    %234 = arith.negf %233 : vector<10x160xf32>
    %235 = math.exp %234 : vector<10x160xf32>
    %cst_216 = arith.constant 1.000000e+00 : f32
    %236 = vector.broadcast %cst_216 : f32 to vector<10x160xf32>
    %237 = arith.addf %236, %235 : vector<10x160xf32>
    %238 = arith.divf %236, %237 : vector<10x160xf32>
    %c0_217 = arith.constant 0 : index
    %c0_218 = arith.constant 0 : index
    %239 = vector.load %arg14[%c0_217, %c0_218] : memref<10x160xf32, #tpu.memory_space<vmem>>, vector<10x160xf32>
    tpu.vector_store %arg14[%c0_217, %c0_218], %238 {strides = array<i32>} : memref<10x160xf32, #tpu.memory_space<vmem>>, vector<10x160xf32>,
    %c0_219 = arith.constant 0 : index
    %c0_220 = arith.constant 0 : index
    %240 = vector.load %arg7[%c0_219, %c0_220] : memref<1x120xf32, #tpu.memory_space<vmem>>, vector<1x120xf32>
    %c0_221 = arith.constant 0 : index
    %c0_222 = arith.constant 0 : index
    %241 = vector.load %arg14[%c0_221, %c0_222] : memref<10x160xf32, #tpu.memory_space<vmem>>, vector<1x160xf32>
    %242 = arith.truncf %241 : vector<1x160xf32> to vector<1x160xbf16>
    %c0_223 = arith.constant 0 : index
    %c0_224 = arith.constant 0 : index
    %c0_225 = arith.constant 0 : index
    %243 = vector.load %arg6[%c0_223, %c0_224, %c0_225] : memref<10x160x120xbf16, #tpu.memory_space<vmem>>, vector<1x160x120xbf16>
    %244 = vector.shape_cast %243 : vector<1x160x120xbf16> to vector<160x120xbf16>
    %cst_226 = arith.constant dense<0.000000e+00> : vector<1x120xf32>
    %245 = tpu.matmul %242, %244, %cst_226 {dimension_numbers = #tpu.dot_dimension_numbers<[1], [0], [0], [1], [0, 0, 1, 1], [], []>} : vector<1x160xbf16>, vector<160x120xbf16>, vector<1x120xf32> -> vector<1x120xf32>
    %246 = arith.addf %240, %245 : vector<1x120xf32>
    %c1_227 = arith.constant 1 : index
    %c0_228 = arith.constant 0 : index
    %247 = vector.load %arg14[%c1_227, %c0_228] : memref<10x160xf32, #tpu.memory_space<vmem>>, vector<1x160xf32>
    %248 = arith.truncf %247 : vector<1x160xf32> to vector<1x160xbf16>
    %c1_229 = arith.constant 1 : index
    %c0_230 = arith.constant 0 : index
    %c0_231 = arith.constant 0 : index
    %249 = vector.load %arg6[%c1_229, %c0_230, %c0_231] : memref<10x160x120xbf16, #tpu.memory_space<vmem>>, vector<1x160x120xbf16>
    %250 = vector.shape_cast %249 : vector<1x160x120xbf16> to vector<160x120xbf16>
    %cst_232 = arith.constant dense<0.000000e+00> : vector<1x120xf32>
    %251 = tpu.matmul %248, %250, %cst_232 {dimension_numbers = #tpu.dot_dimension_numbers<[1], [0], [0], [1], [0, 0, 1, 1], [], []>} : vector<1x160xbf16>, vector<160x120xbf16>, vector<1x120xf32> -> vector<1x120xf32>
    %252 = arith.addf %246, %251 : vector<1x120xf32>
    %c2_233 = arith.constant 2 : index
    %c0_234 = arith.constant 0 : index
    %253 = vector.load %arg14[%c2_233, %c0_234] : memref<10x160xf32, #tpu.memory_space<vmem>>, vector<1x160xf32>
    %254 = arith.truncf %253 : vector<1x160xf32> to vector<1x160xbf16>
    %c2_235 = arith.constant 2 : index
    %c0_236 = arith.constant 0 : index
    %c0_237 = arith.constant 0 : index
    %255 = vector.load %arg6[%c2_235, %c0_236, %c0_237] : memref<10x160x120xbf16, #tpu.memory_space<vmem>>, vector<1x160x120xbf16>
    %256 = vector.shape_cast %255 : vector<1x160x120xbf16> to vector<160x120xbf16>
    %cst_238 = arith.constant dense<0.000000e+00> : vector<1x120xf32>
    %257 = tpu.matmul %254, %256, %cst_238 {dimension_numbers = #tpu.dot_dimension_numbers<[1], [0], [0], [1], [0, 0, 1, 1], [], []>} : vector<1x160xbf16>, vector<160x120xbf16>, vector<1x120xf32> -> vector<1x120xf32>
    %258 = arith.addf %252, %257 : vector<1x120xf32>
    %c3_239 = arith.constant 3 : index
    %c0_240 = arith.constant 0 : index
    %259 = vector.load %arg14[%c3_239, %c0_240] : memref<10x160xf32, #tpu.memory_space<vmem>>, vector<1x160xf32>
    %260 = arith.truncf %259 : vector<1x160xf32> to vector<1x160xbf16>
    %c3_241 = arith.constant 3 : index
    %c0_242 = arith.constant 0 : index
    %c0_243 = arith.constant 0 : index
    %261 = vector.load %arg6[%c3_241, %c0_242, %c0_243] : memref<10x160x120xbf16, #tpu.memory_space<vmem>>, vector<1x160x120xbf16>
    %262 = vector.shape_cast %261 : vector<1x160x120xbf16> to vector<160x120xbf16>
    %cst_244 = arith.constant dense<0.000000e+00> : vector<1x120xf32>
    %263 = tpu.matmul %260, %262, %cst_244 {dimension_numbers = #tpu.dot_dimension_numbers<[1], [0], [0], [1], [0, 0, 1, 1], [], []>} : vector<1x160xbf16>, vector<160x120xbf16>, vector<1x120xf32> -> vector<1x120xf32>
    %264 = arith.addf %258, %263 : vector<1x120xf32>
    %c4_245 = arith.constant 4 : index
    %c0_246 = arith.constant 0 : index
    %265 = vector.load %arg14[%c4_245, %c0_246] : memref<10x160xf32, #tpu.memory_space<vmem>>, vector<1x160xf32>
    %266 = arith.truncf %265 : vector<1x160xf32> to vector<1x160xbf16>
    %c4_247 = arith.constant 4 : index
    %c0_248 = arith.constant 0 : index
    %c0_249 = arith.constant 0 : index
    %267 = vector.load %arg6[%c4_247, %c0_248, %c0_249] : memref<10x160x120xbf16, #tpu.memory_space<vmem>>, vector<1x160x120xbf16>
    %268 = vector.shape_cast %267 : vector<1x160x120xbf16> to vector<160x120xbf16>
    %cst_250 = arith.constant dense<0.000000e+00> : vector<1x120xf32>
    %269 = tpu.matmul %266, %268, %cst_250 {dimension_numbers = #tpu.dot_dimension_numbers<[1], [0], [0], [1], [0, 0, 1, 1], [], []>} : vector<1x160xbf16>, vector<160x120xbf16>, vector<1x120xf32> -> vector<1x120xf32>
    %270 = arith.addf %264, %269 : vector<1x120xf32>
    %c5_251 = arith.constant 5 : index
    %c0_252 = arith.constant 0 : index
    %271 = vector.load %arg14[%c5_251, %c0_252] : memref<10x160xf32, #tpu.memory_space<vmem>>, vector<1x160xf32>
    %272 = arith.truncf %271 : vector<1x160xf32> to vector<1x160xbf16>
    %c5_253 = arith.constant 5 : index
    %c0_254 = arith.constant 0 : index
    %c0_255 = arith.constant 0 : index
    %273 = vector.load %arg6[%c5_253, %c0_254, %c0_255] : memref<10x160x120xbf16, #tpu.memory_space<vmem>>, vector<1x160x120xbf16>
    %274 = vector.shape_cast %273 : vector<1x160x120xbf16> to vector<160x120xbf16>
    %cst_256 = arith.constant dense<0.000000e+00> : vector<1x120xf32>
    %275 = tpu.matmul %272, %274, %cst_256 {dimension_numbers = #tpu.dot_dimension_numbers<[1], [0], [0], [1], [0, 0, 1, 1], [], []>} : vector<1x160xbf16>, vector<160x120xbf16>, vector<1x120xf32> -> vector<1x120xf32>
    %276 = arith.addf %270, %275 : vector<1x120xf32>
    %c6_257 = arith.constant 6 : index
    %c0_258 = arith.constant 0 : index
    %277 = vector.load %arg14[%c6_257, %c0_258] : memref<10x160xf32, #tpu.memory_space<vmem>>, vector<1x160xf32>
    %278 = arith.truncf %277 : vector<1x160xf32> to vector<1x160xbf16>
    %c6_259 = arith.constant 6 : index
    %c0_260 = arith.constant 0 : index
    %c0_261 = arith.constant 0 : index
    %279 = vector.load %arg6[%c6_259, %c0_260, %c0_261] : memref<10x160x120xbf16, #tpu.memory_space<vmem>>, vector<1x160x120xbf16>
    %280 = vector.shape_cast %279 : vector<1x160x120xbf16> to vector<160x120xbf16>
    %cst_262 = arith.constant dense<0.000000e+00> : vector<1x120xf32>
    %281 = tpu.matmul %278, %280, %cst_262 {dimension_numbers = #tpu.dot_dimension_numbers<[1], [0], [0], [1], [0, 0, 1, 1], [], []>} : vector<1x160xbf16>, vector<160x120xbf16>, vector<1x120xf32> -> vector<1x120xf32>
    %282 = arith.addf %276, %281 : vector<1x120xf32>
    %c7_263 = arith.constant 7 : index
    %c0_264 = arith.constant 0 : index
    %283 = vector.load %arg14[%c7_263, %c0_264] : memref<10x160xf32, #tpu.memory_space<vmem>>, vector<1x160xf32>
    %284 = arith.truncf %283 : vector<1x160xf32> to vector<1x160xbf16>
    %c7_265 = arith.constant 7 : index
    %c0_266 = arith.constant 0 : index
    %c0_267 = arith.constant 0 : index
    %285 = vector.load %arg6[%c7_265, %c0_266, %c0_267] : memref<10x160x120xbf16, #tpu.memory_space<vmem>>, vector<1x160x120xbf16>
    %286 = vector.shape_cast %285 : vector<1x160x120xbf16> to vector<160x120xbf16>
    %cst_268 = arith.constant dense<0.000000e+00> : vector<1x120xf32>
    %287 = tpu.matmul %284, %286, %cst_268 {dimension_numbers = #tpu.dot_dimension_numbers<[1], [0], [0], [1], [0, 0, 1, 1], [], []>} : vector<1x160xbf16>, vector<160x120xbf16>, vector<1x120xf32> -> vector<1x120xf32>
    %288 = arith.addf %282, %287 : vector<1x120xf32>
    %c8_269 = arith.constant 8 : index
    %c0_270 = arith.constant 0 : index
    %289 = vector.load %arg14[%c8_269, %c0_270] : memref<10x160xf32, #tpu.memory_space<vmem>>, vector<1x160xf32>
    %290 = arith.truncf %289 : vector<1x160xf32> to vector<1x160xbf16>
    %c8_271 = arith.constant 8 : index
    %c0_272 = arith.constant 0 : index
    %c0_273 = arith.constant 0 : index
    %291 = vector.load %arg6[%c8_271, %c0_272, %c0_273] : memref<10x160x120xbf16, #tpu.memory_space<vmem>>, vector<1x160x120xbf16>
    %292 = vector.shape_cast %291 : vector<1x160x120xbf16> to vector<160x120xbf16>
    %cst_274 = arith.constant dense<0.000000e+00> : vector<1x120xf32>
    %293 = tpu.matmul %290, %292, %cst_274 {dimension_numbers = #tpu.dot_dimension_numbers<[1], [0], [0], [1], [0, 0, 1, 1], [], []>} : vector<1x160xbf16>, vector<160x120xbf16>, vector<1x120xf32> -> vector<1x120xf32>
    %294 = arith.addf %288, %293 : vector<1x120xf32>
    %c9_275 = arith.constant 9 : index
    %c0_276 = arith.constant 0 : index
    %295 = vector.load %arg14[%c9_275, %c0_276] : memref<10x160xf32, #tpu.memory_space<vmem>>, vector<1x160xf32>
    %296 = arith.truncf %295 : vector<1x160xf32> to vector<1x160xbf16>
    %c9_277 = arith.constant 9 : index
    %c0_278 = arith.constant 0 : index
    %c0_279 = arith.constant 0 : index
    %297 = vector.load %arg6[%c9_277, %c0_278, %c0_279] : memref<10x160x120xbf16, #tpu.memory_space<vmem>>, vector<1x160x120xbf16>
    %298 = vector.shape_cast %297 : vector<1x160x120xbf16> to vector<160x120xbf16>
    %cst_280 = arith.constant dense<0.000000e+00> : vector<1x120xf32>
    %299 = tpu.matmul %296, %298, %cst_280 {dimension_numbers = #tpu.dot_dimension_numbers<[1], [0], [0], [1], [0, 0, 1, 1], [], []>} : vector<1x160xbf16>, vector<160x120xbf16>, vector<1x120xf32> -> vector<1x120xf32>
    %300 = arith.addf %294, %299 : vector<1x120xf32>
    %301 = arith.truncf %300 : vector<1x120xf32> to vector<1x120xbf16>
    %c0_281 = arith.constant 0 : index
    %c0_282 = arith.constant 0 : index
    %302 = vector.load %arg8[%c0_281, %c0_282] : memref<120x84xbf16, #tpu.memory_space<vmem>>, vector<120x84xbf16>
    %cst_283 = arith.constant dense<0.000000e+00> : vector<1x84xf32>
    %303 = tpu.matmul %301, %302, %cst_283 {dimension_numbers = #tpu.dot_dimension_numbers<[1], [0], [0], [1], [0, 0, 1, 1], [], []>} : vector<1x120xbf16>, vector<120x84xbf16>, vector<1x84xf32> -> vector<1x84xf32>
    %c0_284 = arith.constant 0 : index
    %c0_285 = arith.constant 0 : index
    %304 = vector.load %arg9[%c0_284, %c0_285] : memref<1x84xf32, #tpu.memory_space<vmem>>, vector<1x84xf32>
    %305 = arith.addf %303, %304 : vector<1x84xf32>
    %306 = arith.truncf %305 : vector<1x84xf32> to vector<1x84xbf16>
    %c0_286 = arith.constant 0 : index
    %c0_287 = arith.constant 0 : index
    %307 = vector.load %arg10[%c0_286, %c0_287] : memref<84x10xbf16, #tpu.memory_space<vmem>>, vector<84x10xbf16>
    %cst_288 = arith.constant dense<0.000000e+00> : vector<1x10xf32>
    %308 = tpu.matmul %306, %307, %cst_288 {dimension_numbers = #tpu.dot_dimension_numbers<[1], [0], [0], [1], [0, 0, 1, 1], [], []>} : vector<1x84xbf16>, vector<84x10xbf16>, vector<1x10xf32> -> vector<1x10xf32>
    %c0_289 = arith.constant 0 : index
    %c0_290 = arith.constant 0 : index
    %309 = vector.load %arg11[%c0_289, %c0_290] : memref<1x10xf32, #tpu.memory_space<vmem>>, vector<1x10xf32>
    %310 = arith.addf %308, %309 : vector<1x10xf32>
    %c1_291 = arith.constant 1 : index
    %c0_292 = arith.constant 0 : index
    %311 = vector.load %arg12[%c1_291, %c0_292] : memref<2x10xf32, #tpu.memory_space<vmem>>, vector<1x10xf32>
    tpu.vector_store %arg12[%c1_291, %c0_292], %310 {strides = array<i32>} : memref<2x10xf32, #tpu.memory_space<vmem>>, vector<1x10xf32>,
    return
  }
}

</mosaic_0001>

<bundles_post_ra>
// kernel: lenet5_forward.1
= control target key start
LH: loop header
LB: loop body
LE: loop exit
PB: predicated region body
PF: predicated region fallthrough
CT: control target
= control target key end

     0   :  { %vm74_vm0 = vcmask 261120   ;;  %s12393_s0 = inlined_call_operand.vmem [shape: f32[2,32,32], index: 0, kind: input, shape index: {}]   ;;  %s12394_s1 = inlined_call_operand.vmem [shape: bf16[5,32,168], index: 1, kind: input, shape index: {}]   ;;  %s12395_s2 = inlined_call_operand.vmem [shape: f32[1,168], index: 2, kind: input, shape index: {}]   ;;  %s12396_s3 = inlined_call_operand.vmem [shape: bf16[14,28], index: 3, kind: input, shape index: {}]   ;;  %s12397_s4 = inlined_call_operand.vmem [shape: bf16[5,168,160], index: 4, kind: input, shape index: {}]   ;;  %s12398_s5 = inlined_call_operand.vmem [shape: f32[1,160], index: 5, kind: input, shape index: {}]   ;;  %s12399_s6 = inlined_call_operand.vmem [shape: bf16[10,160,120], index: 6, kind: input, shape index: {}]   ;;  %s12400_s7 = inlined_call_operand.vmem [shape: f32[1,120], index: 7, kind: input, shape index: {}]   ;;  %s12401_s8 = inlined_call_operand.vmem [shape: bf16[120,84], index: 8, kind: input, shape index: {}]   ;;  %s12402_s9 = inlined_call_operand.vmem [shape: f32[1,84], index: 9, kind: input, shape index: {}]   ;;  %s12403_s10 = inlined_call_operand.vmem [shape: bf16[84,10], index: 10, kind: input, shape index: {}]   ;;  %s12404_s11 = inlined_call_operand.vmem [shape: f32[1,10], index: 11, kind: input, shape index: {}]   ;;  %s12405_s12 = inlined_call_operand.hbm [shape: f32[2,10], index: 12, kind: output, shape index: {}]  }
   0x1   :  { %v6269_v0 = vld [vmem:[%s12394_s1 + $0x10] sm:$0xf]  ;;  %v8818_v1 = vld [vmem:[%s12394_s1 + $0x14] sm:$0xf0]  ;;  %v8817_v2 = vld [vmem:[%s12394_s1 + $0x14] sm:$0xf] }
   0x2   :  { %v6270_v3 = vor.u32 %v8818_v1, %v6269_v0  ;;  %v6271_v4 = vld [vmem:[%s12394_s1 + $0x18] sm:$0xf0]  ;;  %v8821_v5 = vld [vmem:[%s12394_s1 + $0x34] sm:$0xf]  ;;  %v6261_v9 = vld [vmem:[%s12394_s1] sm:$0xf] }
   0x3   :  { %v6295_v6 = vld [vmem:[%s12394_s1 + $0x38] sm:$0xf0]  ;;  %v6274_v7 = vor.u32 %v8817_v2, %v6271_v4  ;;  %v8816_v10 = vld [vmem:[%s12394_s1 + $0x4] sm:$0xf0]  ;;  %v8815_v11 = vld [vmem:[%s12394_s1 + $0x4] sm:$0xf] }
   0x4   :  { %v6298_v8 = vor.u32 %v8821_v5, %v6295_v6  ;;  %9281 = vmatpush.bf16.msra.mxu2 %v6270_v3  ;;  %v6262_v12 = vor.u32 %v8816_v10, %v6261_v9  ;;  %v6263_v13 = vld [vmem:[%s12394_s1 + $0x8] sm:$0xf0]  ;;  %v8819_v14 = vld [vmem:[%s12394_s1 + $0x24] sm:$0xf]  ;;  %87 = vmatpush.bf16.msra.mxu0 %v6270_v3  ;;  %v46_v18 = vld [vmem:[%s12393_s0 + $0x10] sm:$0xff] }
   0x5   :  { %v6287_v15 = vld [vmem:[%s12394_s1 + $0x28] sm:$0xf0]  ;;  %106 = vmatpush.bf16.msra.mxu1 %v6274_v7  ;;  %v6266_v16 = vor.u32 %v8815_v11, %v6263_v13  ;;  %v47_v19 = vld [vmem:[%s12393_s0 + $0x18] sm:$0xf]  ;;  %v44_v20 = vld [vmem:[%s12393_s0] sm:$0xff] }
   0x6   :  { %194 = vmatpush.bf16.msra.mxu3 %v6298_v8  ;;  %v6290_v17 = vor.u32 %v8819_v14, %v6287_v15  ;;  %v45_v21 = vld [vmem:[%s12393_s0 + $0x8] sm:$0xff]  ;;  %v9526_v24 = vpack.c.bf16 %v47_v19, %v46_v18  ;;  %v6293_v25 = vld [vmem:[%s12394_s1 + $0x30] sm:$0xf]  ;;  %v8822_v26 = vld [vmem:[%s12394_s1 + $0x34] sm:$0xf0] }
   0x7   :  { %v132_v22 = vld [vmem:[%s12393_s0 + $0x1] sm:$0xff]  ;;  %v133_v23 = vld [vmem:[%s12393_s0 + $0x9] sm:$0xff]  ;;  %v48_v28 = vpack.c.bf16 %v45_v21, %v44_v20  ;;  %v6294_v30 = vor.u32 %v8822_v26, %v6293_v25  ;;  %v8826_v33 = vld [vmem:[%s12394_s1 + $0x54] sm:$0xf0] }
   0x8   :  { %v6285_v27 = vld [vmem:[%s12394_s1 + $0x20] sm:$0xf]  ;;  %9282 = vmatpush.bf16.msra.mxu2 %v6262_v12  ;;  %v136_v29 = vpack.c.bf16 %v133_v23, %v132_v22  ;;  %88 = vmatpush.bf16.msra.mxu0 %v6262_v12  ;;  %v8820_v31 = vld [vmem:[%s12394_s1 + $0x24] sm:$0xf0]  ;;  %v6317_v32 = vld [vmem:[%s12394_s1 + $0x50] sm:$0xf] }
   0x9   :  { %107 = vmatpush.bf16.msra.mxu1 %v6266_v16  ;;  %v6286_v34 = vor.u32 %v8820_v31, %v6285_v27  ;;  %v6318_v35 = vor.u32 %v8826_v33, %v6317_v32  ;;  %v6309_v36 = vld [vmem:[%s12394_s1 + $0x40] sm:$0xf]  ;;  %v8824_v37 = vld [vmem:[%s12394_s1 + $0x44] sm:$0xf0]  ;;  %v8825_v38 = vld [vmem:[%s12394_s1 + $0x54] sm:$0xf] }
   0xa   :  { %195 = vmatpush.bf16.msra.mxu3 %v6290_v17  ;;  %v6319_v39 = vld [vmem:[%s12394_s1 + $0x58] sm:$0xf0]  ;;  %v8829_v40 = vld [vmem:[%s12394_s1 + $0x74] sm:$0xf]  ;;  %v8823_v43 = vld [vmem:[%s12394_s1 + $0x44] sm:$0xf]  ;;  %v6310_v45 = vor.u32 %v8824_v37, %v6309_v36 }
   0xb   :  { %6276 = vmatmul.msk.bf16.vlgmr.msra.gmra.mxu2 %vm74_vm0, %v9526_v24  ;;  %6275 = vmatmul.msk.bf16.vlgmr.msra.gmra.mxu0 %vm74_vm0, %v48_v28  ;;  %v6322_v41 = vor.u32 %v8825_v38, %v6319_v39  ;;  %v6343_v42 = vld [vmem:[%s12394_s1 + $0x78] sm:$0xf0]  ;;  %v6311_v44 = vld [vmem:[%s12394_s1 + $0x48] sm:$0xf0]  ;;  %v8827_v47 = vld [vmem:[%s12394_s1 + $0x64] sm:$0xf] }
   0xc   :  { %175 = vmatpush.bf16.msrb.mxu2 %v6294_v30  ;;  %6277 = vmatmul.msk.bf16.vlgmr.msra.gmra.mxu1 %vm74_vm0, %v48_v28  ;;  %v6346_v46 = vor.u32 %v8829_v40, %v6343_v42  ;;  %v6335_v48 = vld [vmem:[%s12394_s1 + $0x68] sm:$0xf0]  ;;  %v6314_v49 = vor.u32 %v8823_v43, %v6311_v44  ;;  %v6341_v51 = vld [vmem:[%s12394_s1 + $0x70] sm:$0xf]  ;;  %v8830_v52 = vld [vmem:[%s12394_s1 + $0x74] sm:$0xf0] }
   0xd   :  { %6301 = vmatmul.msk.bf16.vlgmr.msra.gmra.mxu3 %vm74_vm0, %v136_v29  ;;  %258 = vmatpush.bf16.msrb.mxu0 %v6318_v35  ;;  %v6338_v50 = vor.u32 %v8827_v47, %v6335_v48  ;;  %v6333_v53 = vld [vmem:[%s12394_s1 + $0x60] sm:$0xf]  ;;  %v6342_v54 = vor.u32 %v8830_v52, %v6341_v51  ;;  %v8828_v55 = vld [vmem:[%s12394_s1 + $0x64] sm:$0xf0] }
   0xe   :  { %277 = vmatpush.bf16.msrb.mxu1 %v6322_v41  ;;  %360 = vmatpush.bf16.msrb.mxu3 %v6346_v46 }
  0x10   :  { %176 = vmatpush.bf16.msrb.mxu2 %v6286_v34 }
  0x11   :  { %17 = vsyncpa [#allocation5], 0  ;;  %259 = vmatpush.bf16.msrb.mxu0 %v6310_v45  ;;  %v6334_v56 = vor.u32 %v8828_v55, %v6333_v53  ;;  %v215_v57 = vld [vmem:[%s12393_s0 + $0x2] sm:$0xff]  ;;  %v216_v58 = vld [vmem:[%s12393_s0 + $0xa] sm:$0xff]  ;;  %vm631_vm8 = vcmask 1045504   ;;  %s9406_s19 = smov [#allocation4]  }
  0x12   :  { %278 = vmatpush.bf16.msrb.mxu1 %v6314_v49  ;;  %361 = vmatpush.bf16.msrb.mxu3 %v6338_v50  ;;  %v134_v59 = vld [vmem:[%s12393_s0 + $0x11] sm:$0xff]  ;;  %v135_v60 = vld [vmem:[%s12393_s0 + $0x19] sm:$0xf]  ;;  %v219_v61 = vpack.c.bf16 %v216_v58, %v215_v57  ;;  %v6357_v2 = vld [vmem:[%s12394_s1 + $0x80] sm:$0xf]  ;;  %s6248_s20 = sshll.u32 %s9406_s19, 4  ;;  %s6249_s20 = int_to_ptr.vmem [resolvable:$true] %s6248_s20 }
  0x13   :  { %v137_v62 = vpack.c.bf16 %v135_v60, %v134_v59  ;;  %v6365_v63 = vld [vmem:[%s12394_s1 + $0x90] sm:$0xf]  ;;  %v8834_v0 = vld [vmem:[%s12394_s1 + $0x94] sm:$0xf0]  ;;  %v8832_v3 = vld [vmem:[%s12394_s1 + $0x84] sm:$0xf0] }
  0x14   :  { %341 = vmatpush.bf16.msra.mxu2 %v6342_v54  ;;  %v6366_v1 = vor.u32 %v8834_v0, %v6365_v63  ;;  %v6358_v4 = vor.u32 %v8832_v3, %v6357_v2  ;;  %v8833_v5 = vld [vmem:[%s12394_s1 + $0x94] sm:$0xf]  ;;  %v6367_v6 = vld [vmem:[%s12394_s1 + $0x98] sm:$0xf0]  ;;  %v8831_v8 = vld [vmem:[%s12394_s1 + $0x84] sm:$0xf] }
  0x15   :  { %v6370_v7 = vor.u32 %v8833_v5, %v6367_v6  ;;  %v6359_v9 = vld [vmem:[%s12394_s1 + $0x88] sm:$0xf0]  ;;  %v217_v11 = vld [vmem:[%s12393_s0 + $0x12] sm:$0xff]  ;;  %v218_v12 = vld [vmem:[%s12393_s0 + $0x1a] sm:$0xf] }
  0x16   :  { %424 = vmatpush.bf16.msra.mxu0 %v6366_v1  ;;  %v6362_v10 = vor.u32 %v8831_v8, %v6359_v9  ;;  %v298_v13 = vld [vmem:[%s12393_s0 + $0x3] sm:$0xff]  ;;  %v299_v14 = vld [vmem:[%s12393_s0 + $0xb] sm:$0xff]  ;;  %v220_v15 = vpack.c.bf16 %v218_v12, %v217_v11  ;;  %v300_v19 = vld [vmem:[%s12393_s0 + $0x13] sm:$0xff] }
  0x17   :  { %443 = vmatpush.bf16.msra.mxu1 %v6370_v7  ;;  %v302_v16 = vpack.c.bf16 %v299_v14, %v298_v13  ;;  %v381_v17 = vld [vmem:[%s12393_s0 + $0x4] sm:$0xff]  ;;  %v382_v18 = vld [vmem:[%s12393_s0 + $0xc] sm:$0xff]  ;;  %v301_v20 = vld [vmem:[%s12393_s0 + $0x1b] sm:$0xf] }
  0x18   :  { %342 = vmatpush.bf16.msra.mxu2 %v6334_v56  ;;  %v385_v21 = vpack.c.bf16 %v382_v18, %v381_v17  ;;  %v303_v22 = vpack.c.bf16 %v301_v20, %v300_v19  ;;  %v383_v23 = vld [vmem:[%s12393_s0 + $0x14] sm:$0xff]  ;;  %v43_v46 = vld [vmem:[%s12395_s2] sm:$0x3] }
  0x19   :  { %v120_v47 = vperm.slane %v43_v46, 0  ;;  %v121_v63 = vperm.slane %v43_v46, 1 }
  0x1a   :  { %425 = vmatpush.bf16.msra.mxu0 %v6358_v4 }
  0x1b   :  { %6299 = vmatmul.msk.bf16.vlgmr.msrb.gmra.mxu2 %vm74_vm0, %v136_v29  ;;  %6323 = vmatmul.msk.bf16.vlgmr.msrb.gmra.mxu0 %vm74_vm0, %v219_v61 }
  0x1c   :  { %6278 = vmatmul.msk.bf16.gmra.mxu1 %vm74_vm0, %v9526_v24  ;;  %v384_v24 = vld [vmem:[%s12393_s0 + $0x1c] sm:$0xf] }
  0x1d   :  { %6302 = vmatmul.msk.bf16.gmra.mxu3 %vm74_vm0, %v137_v62  ;;  %444 = vmatpush.bf16.msra.mxu1 %v6362_v10  ;;  %v386_v25 = vpack.c.bf16 %v384_v24, %v383_v23 }
  0x2b   :  { %6300 = vmatmul.msk.bf16.gmra.mxu2 %vm74_vm0, %v137_v62  ;;  %6324 = vmatmul.msk.bf16.gmra.mxu0 %vm74_vm0, %v220_v15 }
  0x2c   :  { %6325 = vmatmul.msk.bf16.vlgmr.msrb.gmra.mxu1 %vm74_vm0, %v219_v61 }
  0x2d   :  { %6349 = vmatmul.msk.bf16.vlgmr.msrb.gmra.mxu3 %vm74_vm0, %v302_v16 }
  0x3b   :  { %6347 = vmatmul.msk.bf16.vlgmr.msra.gmra.mxu2 %vm74_vm0, %v302_v16  ;;  %6371 = vmatmul.msk.bf16.vlgmr.msra.gmra.mxu0 %vm74_vm0, %v385_v21 }
  0x3c   :  { %6326 = vmatmul.msk.bf16.gmra.mxu1 %vm74_vm0, %v220_v15 }
  0x3d   :  { %6350 = vmatmul.msk.bf16.gmra.mxu3 %vm74_vm0, %v303_v22 }
  0x4b   :  { %6348 = vmatmul.msk.bf16.gmra.mxu2 %vm74_vm0, %v303_v22  ;;  %6372 = vmatmul.msk.bf16.gmra.mxu0 %vm74_vm0, %v386_v25 }
  0x4c   :  { %6373 = vmatmul.msk.bf16.vlgmr.msra.gmra.mxu1 %vm74_vm0, %v385_v21 }
  0x5c   :  { %6374 = vmatmul.msk.bf16.gmra.mxu1 %vm74_vm0, %v386_v25 }
  0x88   :  { %v90_v26 = vpop.f32.mrf.mxu0 }
  0x89   :  { %v109_v27 = vpop.f32.mrf.mxu1  ;;  %v124_v48 = vadd.f32 %v120_v47, %v90_v26 }
  0x8a   :  { %v125_v3 = vadd.f32 %v121_v63, %v109_v27 }
  0x8e   :  { %v95_v28 = vpop.f32.mrf.mxu2 }
  0x8f   :  { %v128_v4 = vadd.f32 %v120_v47, %v95_v28 }
  0x90   :  { %v92_v29 = vpop.f32.mrf.mxu0  ;;  %v197_v32 = vpop.f32.mrf.mxu3 }
  0x91   :  { %v111_v30 = vpop.f32.mrf.mxu1  ;;  %v126_v54 = vadd.f32 %v120_v47, %v92_v29  ;;  %v208_v6 = vadd.f32 %v197_v32, %v125_v3 }
  0x92   :  { %v127_v11 = vadd.f32 %v121_v63, %v111_v30 }
  0x96   :  { %v97_v31 = vpop.f32.mrf.mxu2 }
  0x97   :  { %v130_v22 = vadd.f32 %v120_v47, %v97_v31 }
  0x98   :  { %v261_v33 = vpop.f32.mrf.mxu0  ;;  %v199_v37 = vpop.f32.mrf.mxu3 }
  0x99   :  { %v114_v34 = vpop.f32.mrf.mxu1  ;;  %v210_v15 = vadd.f32 %v199_v37, %v127_v11 }
  0x9a   :  { %v129_v29 = vadd.f32 %v121_v63, %v114_v34 }
  0x9e   :  { %v178_v35 = vpop.f32.mrf.mxu2 }
  0x9f   :  { %v207_v52 = vadd.f32 %v178_v35, %v124_v48 }
  0xa0   :  { %v263_v36 = vpop.f32.mrf.mxu0  ;;  %v202_v42 = vpop.f32.mrf.mxu3 }
  0xa1   :  { %v9676_v38 = vpop.f32.mrf.mxu1  ;;  %v290_v55 = vadd.f32 %v261_v33, %v207_v52  ;;  %v212_v37 = vadd.f32 %v202_v42, %v129_v29  ;;  %v8851_v29 = vld [vmem:[%s12397_s4 + $0x74] sm:$0xf0] }
  0xa2   :  { %v131_v42 = vadd.f32 %v121_v63, %v9676_v38 }
  0xa6   :  { %v180_v39 = vpop.f32.mrf.mxu2 }
  0xa7   :  { %v209_v59 = vadd.f32 %v180_v39, %v126_v54 }
  0xa8   :  { %v266_v40 = vpop.f32.mrf.mxu0  ;;  %v9681_v49 = vpop.f32.mrf.mxu3 }
  0xa9   :  { %v280_v41 = vpop.f32.mrf.mxu1  ;;  %v292_v1 = vadd.f32 %v263_v36, %v209_v59  ;;  %v214_v54 = vadd.f32 %v9681_v49, %v131_v42 }
  0xaa   :  { %v291_v13 = vadd.f32 %v280_v41, %v208_v6 }
  0xae   :  { %v183_v43 = vpop.f32.mrf.mxu2 }
  0xaf   :  { %v211_v7 = vadd.f32 %v183_v43, %v128_v4 }
  0xb0   :  { %v268_v44 = vpop.f32.mrf.mxu0  ;;  %v363_v57 = vpop.f32.mrf.mxu3 }
  0xb1   :  { %v282_v45 = vpop.f32.mrf.mxu1  ;;  %v374_v17 = vadd.f32 %v363_v57, %v291_v13  ;;  %v294_v18 = vadd.f32 %v266_v40, %v211_v7 }
  0xb2   :  { %v293_v19 = vadd.f32 %v282_v45, %v210_v15 }
  0xb6   :  { %v185_v50 = vpop.f32.mrf.mxu2 }
  0xb7   :  { %v213_v26 = vadd.f32 %v185_v50, %v130_v22 }
  0xb8   :  { %v427_v51 = vpop.f32.mrf.mxu0  ;;  %v365_v8 = vpop.f32.mrf.mxu3 }
  0xb9   :  { %v285_v53 = vpop.f32.mrf.mxu1  ;;  %v376_v25 = vadd.f32 %v365_v8, %v293_v19  ;;  %v296_v40 = vadd.f32 %v268_v44, %v213_v26 }
  0xba   :  { %v295_v31 = vadd.f32 %v285_v53, %v212_v37 }
  0xbe   :  { %v344_v56 = vpop.f32.mrf.mxu2 }
  0xbf   :  { %v373_v58 = vadd.f32 %v344_v56, %v290_v55 }
  0xc0   :  { %v429_v62 = vpop.f32.mrf.mxu0  ;;  %v368_v33 = vpop.f32.mrf.mxu3 }
  0xc1   :  { %v9683_v60 = vpop.f32.mrf.mxu1  ;;  %v456_v61 = vadd.f32 %v427_v51, %v373_v58  ;;  %v378_v34 = vadd.f32 %v368_v33, %v295_v31 }
  0xc3   :  { %v6375_v0 = vmul.f32 -1.442695, %v456_v61  ;;  %v297_v61 = vadd.f32 %v9683_v60, %v214_v54  ;;  %v6407_v54 = vld [vmem:[%s12397_s4 + $0x20] sm:$0xf] }
  0xc5   :  { %9284 = vpow2.f32 %v6375_v0 }
  0xc6   :  { %v346_v2 = vpop.f32.mrf.mxu2 }
  0xc7   :  { %v375_v5 = vadd.f32 %v346_v2, %v292_v1 }
  0xc8   :  { %v432_v16 = vpop.f32.mrf.mxu0  ;;  %v370_v58 = vpop.f32.mrf.mxu3 }
  0xc9   :  { %v458_v9 = vadd.f32 %v429_v62, %v375_v5  ;;  %v446_v10 = vpop.f32.mrf.mxu1  ;;  %v380_v63 = vadd.f32 %v370_v58, %v297_v61 }
  0xca   :  { %v457_v23 = vadd.f32 %v446_v10, %v374_v17 }
  0xcb   :  { %v9285_v12 = vpop.eup %9284  ;;  %v6377_v14 = vmul.f32 -1.442695, %v458_v9 }
  0xcc   :  { %v9685_v20 = vadd.f32 1.0, %v9285_v12  ;;  %v6376_v35 = vmul.f32 -1.442695, %v457_v23 }
  0xcd   :  { %9286 = vpow2.f32 %v6377_v14 }
  0xce   :  { %v349_v21 = vpop.f32.mrf.mxu2  ;;  %9288 = vrcp.f32 %v9685_v20  ;;  %v505_v10 = vand.u32 2147483647, %v9685_v20  ;;  %v507_v11 = vand.u32 2147483648, %v9685_v20  ;;  %vm501_vm2 = vweird.f32 %v9685_v20 }
  0xcf   :  { %v377_v24 = vadd.f32 %v349_v21, %v294_v18 }
  0xd0   :  { %v434_v45 = vpop.f32.mrf.mxu0  ;;  %vm9734_vm4 = vcmp.eq.f32.partialorder %v505_v10, 8.507059e+37  ;;  %v508_v21 = vor.u32 1.1754944e-38, %v507_v11  ;;  %v6441_v10 = vld [vmem:[%s12397_s4 + $0x68] sm:$0xf0] }
  0xd1   :  { %v460_v27 = vadd.f32 %v432_v16, %v377_v24  ;;  %v448_v28 = vpop.f32.mrf.mxu1 }
  0xd2   :  { %v459_v30 = vadd.f32 %v448_v28, %v376_v25  ;;  %v6447_v28 = vld [vmem:[%s12397_s4 + $0x70] sm:$0xf] }
  0xd3   :  { %v9287_v32 = vpop.eup %9286  ;;  %v6379_v36 = vmul.f32 -1.442695, %v460_v27  ;;  %v6448_v33 = vor.u32 %v8851_v29, %v6447_v28 }
  0xd4   :  { %v6378_v39 = vmul.f32 -1.442695, %v459_v30  ;;  %v9688_v41 = vadd.f32 1.0, %v9287_v32  ;;  %v9690_v47 = vpop.eup %9288 }
  0xd5   :  { %9290 = vpow2.f32 %v6379_v36  ;;  %v497_v52 = vmul.f32 %v9690_v47, %v9685_v20  ;;  %vm502_vm1 = vweird.f32 %v9690_v47  ;;  %v8849_v36 = vld [vmem:[%s12397_s4 + $0x64] sm:$0xf0]  ;;  %815 = vmatpush.bf16.msrb.mxu0 %v6448_v33 }
  0xd6   :  { %v351_v43 = vpop.f32.mrf.mxu2  ;;  %9292 = vpow2.f32 %v6376_v35  ;;  %v537_v16 = vand.u32 2147483648, %v9688_v41  ;;  %vm9730_vm3 = vmor %vm501_vm2, %vm502_vm1  ;;  %v535_v23 = vand.u32 2147483647, %v9688_v41  ;;  %vm531_vm5 = vweird.f32 %v9688_v41  ;;  %v6439_v35 = vld [vmem:[%s12397_s4 + $0x60] sm:$0xf] }
  0xd7   :  { %v379_v46 = vadd.f32 %v351_v43, %v296_v40  ;;  %9294 = vpow2.f32 %v6378_v39  ;;  %v498_v62 = vsub.f32 1.0, %v497_v52  ;;  %v8847_v52 = vld [vmem:[%s12397_s4 + $0x54] sm:$0xf0] }
  0xd8   :  { %9296 = vrcp.f32 %v9688_v41  ;;  %v9746_v26 = vor.u32 1.1754944e-38, %v537_v16  ;;  %vm9785_vm9 = vcmp.eq.f32.partialorder %v535_v23, 8.507059e+37  ;;  %v6433_v23 = vld [vmem:[%s12397_s4 + $0x58] sm:$0xf0] }
  0xd9   :  { %v462_v48 = vadd.f32 %v434_v45, %v379_v46  ;;  %v451_v50 = vpop.f32.mrf.mxu1  ;;  %v499_v5 = vmul.f32 %v9690_v47, %v498_v62 }
  0xda   :  { %v461_v51 = vadd.f32 %v451_v50, %v378_v34  ;;  %v6431_v50 = vld [vmem:[%s12397_s4 + $0x50] sm:$0xf] }
  0xdb   :  { %v9291_v44 = vpop.eup %9290  ;;  %v6381_v53 = vmul.f32 -1.442695, %v462_v48  ;;  %v500_v15 = vadd.f32 %v9690_v47, %v499_v5  ;;  %v6440_v48 = vor.u32 %v8849_v36, %v6439_v35 }
  0xdc   :  { %v9697_v55 = vadd.f32 1.0, %v9291_v44  ;;  %v6380_v56 = vmul.f32 -1.442695, %v461_v51  ;;  %v9293_v57 = vpop.eup %9292 }
  0xdd   :  { %9298 = vpow2.f32 %v6381_v53  ;;  %v9295_v59 = vpop.eup %9294  ;;  %v9703_v0 = vadd.f32 1.0, %v9293_v57  ;;  %v504_v20 = vsel %vm9730_vm3, %v9690_v47, %v500_v15  ;;  %v8850_v53 = vld [vmem:[%s12397_s4 + $0x74] sm:$0xf]  ;;  %v6385_v57 = vld [vmem:[%s12396_s3] sm:$0xf]  ;;  %816 = vmatpush.bf16.msrb.mxu0 %v6440_v48  ;;  %vm627_vm3 = vcmask 228352  }
  0xde   :  { %9300 = vrcp.f32 %v9697_v55  ;;  %v9701_v38 = vpop.eup %9296  ;;  %v9705_v1 = vadd.f32 1.0, %v9295_v59  ;;  %v565_v32 = vand.u32 2147483647, %v9697_v55  ;;  %vm561_vm7 = vweird.f32 %v9697_v55  ;;  %v6449_v59 = vld [vmem:[%s12397_s4 + $0x78] sm:$0xf0] }
  0xdf   :  { %9302 = vpow2.f32 %v6380_v56  ;;  %v527_v3 = vmul.f32 %v9701_v38, %v9688_v41  ;;  %v522_v27 = vand.u32 2147483648, %v9703_v0  ;;  %vm532_vm6 = vweird.f32 %v9701_v38  ;;  %v8845_v15 = vld [vmem:[%s12397_s4 + $0x44] sm:$0xf0] }
  0xe0   :  { %9304 = vrcp.f32 %v9703_v0  ;;  %v567_v31 = vand.u32 2147483648, %v9697_v55  ;;  %v9780_v46 = vsel %vm9734_vm4, %v508_v21, %v504_v20  ;;  %vm9803_vm11 = vcmp.eq.f32.partialorder %v565_v32, 8.507059e+37  ;;  %vm9823_vm13 = vmor %vm531_vm5, %vm532_vm6 }
  0xe1   :  { %v453_v49 = vpop.f32.mrf.mxu1  ;;  %9306 = vrcp.f32 %v9705_v1  ;;  %v528_v13 = vsub.f32 1.0, %v527_v3  ;;  %v9833_v3 = vld [vmem:[%s12397_s4 + $0xa0] sm:$0xff]  ;;  %vm546_vm5 = vweird.f32 %v9705_v1  ;;  %v550_v29 = vand.u32 2147483647, %v9705_v1 }
  0xe2   :  { %v463_v2 = vadd.f32 %v453_v49, %v380_v63  ;;  %v568_v41 = vor.u32 1.1754944e-38, %v567_v31  ;;  %vm516_vm6 = vweird.f32 %v9703_v0  ;;  %v552_v49 = vand.u32 2147483648, %v9705_v1 }
  0xe3   :  { %v9299_v4 = vpop.eup %9298  ;;  %v529_v22 = vmul.f32 %v9701_v38, %v528_v13 }
  0xe4   :  { %v9710_v60 = vpop.eup %9300  ;;  %v9713_v6 = vadd.f32 1.0, %v9299_v4  ;;  %v6382_v7 = vmul.f32 -1.442695, %v463_v2  ;;  %v8835_v2 = vld [vmem:[%s12396_s3] sm:$0x70] }
  0xe5   :  { %v9303_v8 = vpop.eup %9302  ;;  %v557_v9 = vmul.f32 %v9710_v60, %v9697_v55  ;;  %v9783_v47 = vadd.f32 %v9701_v38, %v529_v22  ;;  %vm562_vm10 = vweird.f32 %v9710_v60  ;;  %v8846_v22 = vld [vmem:[%s12397_s4 + $0x54] sm:$0xf] }
  0xe6   :  { %9308 = vrcp.f32 %v9713_v6  ;;  %v9721_v12 = vadd.f32 1.0, %v9303_v8  ;;  %v9728_v17 = vpop.eup %9304  ;;  %v597_v56 = vand.u32 2147483648, %v9713_v6  ;;  %v595_v63 = vand.u32 2147483647, %v9713_v6  ;;  %vm9839_vm14 = vmor %vm561_vm7, %vm562_vm10 }
  0xe7   :  { %v558_v14 = vsub.f32 1.0, %v557_v9  ;;  %9310 = vpow2.f32 %v6382_v7  ;;  %v9740_v24 = vpop.eup %9306  ;;  %v9768_v39 = vmul.f32 %v9728_v17, %v9703_v0  ;;  %v6432_v7 = vor.u32 %v8847_v52, %v6431_v50  ;;  %v8848_v9 = vld [vmem:[%s12397_s4 + $0x64] sm:$0xf] }
  0xe8   :  { %9312 = vrcp.f32 %v9721_v12  ;;  %v542_v58 = vmul.f32 %v9740_v24, %v9705_v1  ;;  %v6452_v8 = vor.u32 %v8850_v53, %v6449_v59  ;;  %vm591_vm15 = vweird.f32 %v9713_v6 }
  0xe9   :  { %v559_v25 = vmul.f32 %v9710_v60, %v558_v14  ;;  %v513_v5 = vsub.f32 1.0, %v9768_v39  ;;  %v534_v13 = vsel %vm9823_vm13, %v9701_v38, %v9783_v47  ;;  %v6423_v14 = vld [vmem:[%s12397_s4 + $0x40] sm:$0xf]  ;;  %v6444_v18 = vor.u32 %v8848_v9, %v6441_v10  ;;  %817 = vmatpush.bf16.msrb.mxu0 %v6432_v7  ;;  %v8843_v39 = vld [vmem:[%s12397_s4 + $0x34] sm:$0xf0] }
  0xea   :  { %v543_v16 = vsub.f32 1.0, %v542_v58  ;;  %843 = vmatpush.bf16.msrb.mxu1 %v6452_v8  ;;  %vm596_vm2 = vcmp.eq.f32.partialorder %v595_v63, 8.507059e+37  ;;  %v9869_v38 = vor.u32 %v8835_v2, %v6385_v57  ;;  %vm517_vm4 = vweird.f32 %v9728_v17  ;;  %v8839_v8 = vld [vmem:[%s12397_s4 + $0x14] sm:$0xf0] }
  0xeb   :  { %v560_v51 = vadd.f32 %v9710_v60, %v559_v25  ;;  %v539_v35 = vsel %vm9785_vm9, %v9746_v26, %v534_v13  ;;  %v514_v36 = vmul.f32 %v9728_v17, %v513_v5  ;;  %vm808_vm7 = vcmask 1043456  }
  0xec   :  { %v9755_v30 = vpop.eup %9308  ;;  %v6436_v47 = vor.u32 %v8846_v22, %v6433_v23  ;;  %v580_v50 = vand.u32 2147483647, %v9721_v12  ;;  %vm576_vm10 = vweird.f32 %v9721_v12  ;;  %v618_v57 = vpack.c.bf16 %v539_v35, %v9780_v46  ;;  %v8855_v46 = vld [vmem:[%s12397_s4 + $0x94] sm:$0xf0]  ;;  %v8844_v35 = vld [vmem:[%s12397_s4 + $0x44] sm:$0xf] }
  0xed   :  { %v9311_v37 = vpop.eup %9310  ;;  %v587_v40 = vmul.f32 %v9755_v30, %v9713_v6  ;;  %vm592_vm12 = vweird.f32 %v9755_v30  ;;  %v564_v55 = vsel %vm9839_vm14, %v9710_v60, %v560_v51  ;;  %v598_v60 = vor.u32 1.1754944e-38, %v597_v56  ;;  %v8841_v56 = vld [vmem:[%s12397_s4 + $0x24] sm:$0xf0] }
  0xee   :  { %v9774_v43 = vpop.eup %9312  ;;  %v9776_v45 = vadd.f32 1.0, %v9311_v37  ;;  %vm593_vm1 = vmor %vm591_vm15, %vm592_vm12  ;;  %v761_v6 = vunpack.c.l.b16 %v9833_v3  ;;  %v569_v20 = vsel %vm9803_vm11, %v568_v41, %v564_v55  ;;  %v6415_v37 = vld [vmem:[%s12397_s4 + $0x30] sm:$0xf]  ;;  %844 = vmatpush.bf16.msrb.mxu1 %v6444_v18  ;;  %vm547_vm13 = vweird.f32 %v9740_v24  ;;  %v8871_v18 = vld [vmem:[%s12397_s4 + $0x11c] sm:$0xf0] }
  0xef   :  { %v572_v42 = vmul.f32 %v9774_v43, %v9721_v12  ;;  %v588_v44 = vsub.f32 1.0, %v587_v40  ;;  %v544_v40 = vmul.f32 %v9740_v24, %v543_v16  ;;  %vm577_vm9 = vweird.f32 %v9774_v43  ;;  %v8852_v16 = vld [vmem:[%s12397_s4 + $0x84] sm:$0xf] }
  0xf0   :  { %9314 = vrcp.f32 %v9776_v45  ;;  %v783_v31 = vpack.c.b16 %v761_v6, %v761_v6  ;;  %v612_v51 = vand.u32 2147483648, %v9776_v45  ;;  %v610_v53 = vand.u32 2147483647, %v9776_v45  ;;  %vm9918_vm12 = vmor %vm576_vm10, %vm577_vm9  ;;  %v6550_v6 = vld [vmem:[%s12397_s4 + $0x118] sm:$0xf] }
  0xf1   :  { %v573_v61 = vsub.f32 1.0, %v572_v42  ;;  %v589_v62 = vmul.f32 %v9755_v30, %v588_v44  ;;  %v582_v42 = vand.u32 2147483648, %v9721_v12  ;;  %v6416_v44 = vor.u32 %v8843_v39, %v6415_v37  ;;  %vm9945_vm9 = vmor %vm546_vm5, %vm547_vm13  ;;  %v6542_v37 = vld [vmem:[%s12397_s4 + $0x108] sm:$0xf]  ;;  %v6409_v12 = vld [vmem:[%s12397_s4 + $0x28] sm:$0xf0] }
  0xf2   :  { %v545_v58 = vadd.f32 %v9740_v24, %v544_v40  ;;  %v810_v59 = vsel %vm808_vm7, %v783_v31, 0  ;;  %845 = vmatpush.bf16.msrb.mxu1 %v6436_v47  ;;  %vm606_vm14 = vweird.f32 %v9776_v45  ;;  %v613_v4 = vor.u32 1.1754944e-38, %v612_v51  ;;  %vm9971_vm5 = vmor %vm516_vm6, %vm517_vm4  ;;  %v8869_v40 = vld [vmem:[%s12397_s4 + $0x10c] sm:$0xf0]  ;;  %v6544_v31 = vld [vmem:[%s12397_s4 + $0x110] sm:$0xf0] }
  0xf3   :  { %v590_v11 = vadd.f32 %v9755_v30, %v589_v62  ;;  %v574_v21 = vmul.f32 %v9774_v43, %v573_v61  ;;  %v6463_v61 = vld [vmem:[%s12397_s4 + $0x90] sm:$0xf]  ;;  %v583_v2 = vor.u32 1.1754944e-38, %v582_v42  ;;  %v515_v41 = vadd.f32 %v9728_v17, %v514_v36  ;;  %v6425_v36 = vld [vmem:[%s12397_s4 + $0x48] sm:$0xf0] }
  0xf4   :  { %v6408_v5 = vor.u32 %v8841_v56, %v6407_v54  ;;  %v6464_v9 = vor.u32 %v8855_v46, %v6463_v61  ;;  %v549_v13 = vsel %vm9945_vm9, %v9740_v24, %v545_v58  ;;  %v553_v24 = vor.u32 1.1754944e-38, %v552_v49  ;;  %v8867_v51 = vld [vmem:[%s12397_s4 + $0xfc] sm:$0xf0]  ;;  %v6526_v58 = vld [vmem:[%s12397_s4 + $0xe8] sm:$0xf] }
  0xf5   :  { %v594_v19 = vsel %vm593_vm1, %v9755_v30, %v590_v11  ;;  %v6424_v30 = vor.u32 %v8845_v15, %v6423_v14  ;;  %v575_v34 = vadd.f32 %v9774_v43, %v574_v21  ;;  %vm581_vm1 = vcmp.eq.f32.partialorder %v580_v50, 8.507059e+37  ;;  %v6455_v14 = vld [vmem:[%s12397_s4 + $0x80] sm:$0xf]  ;;  %v8853_v15 = vld [vmem:[%s12397_s4 + $0x84] sm:$0xf0] }
  0xf6   :  { %v9878_v25 = vpop.eup %9314  ;;  %v599_v28 = vsel %vm596_vm2, %v598_v60, %v594_v19  ;;  %vm611_vm2 = vcmp.eq.f32.partialorder %v610_v53, 8.507059e+37  ;;  %v520_v11 = vand.u32 2147483647, %v9703_v0  ;;  %v519_v19 = vsel %vm9971_vm5, %v9728_v17, %v515_v41  ;;  %v8837_v17 = vld [vmem:[%s12397_s4 + $0x4] sm:$0xf0] }
  0xf7   :  { %v602_v32 = vmul.f32 %v9878_v25, %v9776_v45  ;;  %v620_v33 = vpack.c.bf16 %v599_v28, %v569_v20  ;;  %818 = vmatpush.bf16.msrb.mxu0 %v6424_v30  ;;  %vm607_vm11 = vweird.f32 %v9878_v25  ;;  %v579_v62 = vsel %vm9918_vm12, %v9774_v43, %v575_v34  ;;  %v6399_v45 = vld [vmem:[%s12397_s4 + $0x10] sm:$0xf]  ;;  %v6391_v20 = vld [vmem:[%s12397_s4] sm:$0xf]  ;;  %v6552_v0 = vld [vmem:[%s12397_s4 + $0x120] sm:$0xf0] }
  0xf8   :  { %vm608_vm15 = vmor %vm606_vm14, %vm607_vm11  ;;  %v584_v10 = vsel %vm581_vm1, %v583_v2, %v579_v62  ;;  %vm551_vm10 = vcmp.eq.f32.partialorder %v550_v29, 8.507059e+37  ;;  %v6400_v21 = vor.u32 %v8839_v8, %v6399_v45  ;;  %v523_v23 = vor.u32 1.1754944e-38, %v522_v27  ;;  %v8870_v29 = vld [vmem:[%s12397_s4 + $0x11c] sm:$0xf]  ;;  %v8842_v34 = vld [vmem:[%s12397_s4 + $0x34] sm:$0xf] }
  0xf9   :  { %v633_v26 = vsel %vm631_vm8, %v620_v33, 0  ;;  %v603_v48 = vsub.f32 1.0, %v602_v32  ;;  %v6456_v28 = vor.u32 %v8853_v15, %v6455_v14  ;;  %vm521_vm4 = vcmp.eq.f32.partialorder %v520_v11, 8.507059e+37  ;;  %v6534_v50 = vld [vmem:[%s12397_s4 + $0xf8] sm:$0xf]  ;;  %v6491_v14 = vld [vmem:[%s12397_s4 + $0x148] sm:$0xff] }
  0xfa   :  { %644 = vmatpush.bf16.msrb.mxu2 %v633_v26  ;;  %v6551_v1 = vor.u32 %v8871_v18, %v6550_v6  ;;  %v524_v27 = vsel %vm521_vm4, %v523_v23, %v519_v19  ;;  %v6392_v32 = vor.u32 %v8837_v17, %v6391_v20  ;;  %v6555_v33 = vor.u32 %v8870_v29, %v6552_v0  ;;  %v8865_v46 = vld [vmem:[%s12397_s4 + $0xec] sm:$0xf0]  ;;  %v6528_v62 = vld [vmem:[%s12397_s4 + $0xf0] sm:$0xf0]  ;;  %v6465_v43 = vld [vmem:[%s12397_s4 + $0x98] sm:$0xf0] }
  0xfb   :  { %v604_v52 = vmul.f32 %v9878_v25, %v603_v48  ;;  %819 = vmatpush.bf16.msrb.mxu0 %v6416_v44  ;;  %v6428_v39 = vor.u32 %v8844_v35, %v6425_v36  ;;  %v6543_v47 = vor.u32 %v8869_v40, %v6542_v37  ;;  %v6417_v48 = vld [vmem:[%s12397_s4 + $0x38] sm:$0xf0]  ;;  %v6535_v53 = vor.u32 %v8867_v51, %v6534_v50  ;;  %v8838_v2 = vld [vmem:[%s12397_s4 + $0x14] sm:$0xf]  ;;  %v6518_v45 = vld [vmem:[%s12397_s4 + $0xd8] sm:$0xf] }
  0xfc   :  { %v6420_v42 = vor.u32 %v8842_v34, %v6417_v48  ;;  %v8866_v44 = vld [vmem:[%s12397_s4 + $0xfc] sm:$0xf]  ;;  %v762_v56 = vunpack.c.h.b16 %v9833_v3  ;;  %v8864_v3 = vld [vmem:[%s12397_s4 + $0xec] sm:$0xf]  ;;  %v8854_v41 = vld [vmem:[%s12397_s4 + $0x94] sm:$0xf]  ;;  %v985_v6 = vunpack.c.h.b16 %v6491_v14 }
  0xfd   :  { %v605_v63 = vadd.f32 %v9878_v25, %v604_v52  ;;  %846 = vmatpush.bf16.msrb.mxu1 %v6428_v39  ;;  %v6536_v52 = vld [vmem:[%s12397_s4 + $0x100] sm:$0xf0]  ;;  %v6531_v49 = vor.u32 %v8864_v3, %v6528_v62  ;;  %v6468_v8 = vor.u32 %v8854_v41, %v6465_v43  ;;  %v6457_v19 = vld [vmem:[%s12397_s4 + $0x88] sm:$0xf0]  ;;  %v6502_v29 = vld [vmem:[%s12397_s4 + $0xb8] sm:$0xf] }
  0xfe   :  { %645 = vmatpush.bf16.msrb.mxu2 %v618_v57  ;;  %v6539_v54 = vor.u32 %v8866_v44, %v6536_v52  ;;  %v8840_v57 = vld [vmem:[%s12397_s4 + $0x24] sm:$0xf]  ;;  %v784_v61 = vpack.c.b16 %v762_v56, %v762_v56  ;;  %v6460_v23 = vor.u32 %v8852_v16, %v6457_v19  ;;  %v8860_v17 = vld [vmem:[%s12397_s4 + $0xcc] sm:$0xf]  ;;  %v8858_v37 = vld [vmem:[%s12397_s4 + $0xbc] sm:$0xf] }
  0xff   :  { %v609_v7 = vsel %vm608_vm15, %v9878_v25, %v605_v63  ;;  %820 = vmatpush.bf16.msrb.mxu0 %v6408_v5  ;;  %v554_v25 = vsel %vm551_vm10, %v553_v24, %v549_v13  ;;  %v6527_v63 = vor.u32 %v8865_v46, %v6526_v58  ;;  %v8836_v15 = vld [vmem:[%s12397_s4 + $0x4] sm:$0xf]  ;;  %v984_v24 = vunpack.c.l.b16 %v6491_v14  ;;  %v8857_v48 = vld [vmem:[%s12397_s4 + $0xac] sm:$0xf0]  ;;  %v6558_v50 = vld [vmem:[%s12397_s4 + $0x128] sm:$0xf] }
 0x100   :  { %v614_v55 = vsel %vm611_vm2, %v613_v4, %v609_v7  ;;  %v619_v30 = vpack.c.bf16 %v554_v25, %v524_v27  ;;  %v6401_v4 = vld [vmem:[%s12397_s4 + $0x18] sm:$0xf0]  ;;  %v813_v5 = vsel %vm808_vm7, %v784_v61, 0  ;;  %v8859_v27 = vld [vmem:[%s12397_s4 + $0xbc] sm:$0xf0]  ;;  %vm667_vm6 = vcmask 326656  }
 0x101   :  { %6387 = vmatmul.msk.bf16.vlgmr.msrb.gmra.mxu2 %vm627_vm3, %v9869_v38  ;;  %v621_v60 = vpack.c.bf16 %v614_v55, %v584_v10  ;;  %847 = vmatpush.bf16.msrb.mxu1 %v6420_v42  ;;  %v6404_v7 = vor.u32 %v8838_v2, %v6401_v4  ;;  %v8862_v10 = vld [vmem:[%s12397_s4 + $0xdc] sm:$0xf]  ;;  %v6520_v55 = vld [vmem:[%s12397_s4 + $0xe0] sm:$0xf0]  ;;  %v1006_v20 = vpack.c.b16 %v984_v24, %v984_v24  ;;  %v8873_v42 = vld [vmem:[%s12397_s4 + $0x12c] sm:$0xf0] }
 0x102   :  { %834 = vmatpush.bf16.msra.mxu2 %v810_v59  ;;  %v6412_v59 = vor.u32 %v8840_v57, %v6409_v12  ;;  %v6523_v13 = vor.u32 %v8862_v10, %v6520_v55  ;;  %v6503_v36 = vor.u32 %v8859_v27, %v6502_v29  ;;  %v6504_v39 = vld [vmem:[%s12397_s4 + $0xc0] sm:$0xf0]  ;;  %v8856_v51 = vld [vmem:[%s12397_s4 + $0xac] sm:$0xf]  ;;  %v6496_v44 = vld [vmem:[%s12397_s4 + $0xb0] sm:$0xf0]  ;;  %v6559_v56 = vor.u32 %v8873_v42, %v6558_v50 }
 0x103   :  { %v636_v22 = vsel %vm631_vm8, %v621_v60, 0  ;;  %821 = vmatpush.bf16.msrb.mxu0 %v6400_v21  ;;  %v6393_v60 = vld [vmem:[%s12397_s4 + $0x8] sm:$0xf0]  ;;  %v6510_v21 = vld [vmem:[%s12397_s4 + $0xc8] sm:$0xf]  ;;  %v6499_v57 = vor.u32 %v8856_v51, %v6496_v44  ;;  %vm670_vm11 = vcmask 324608  }
 0x104   :  { %658 = vmatpush.bf16.msra.mxu3 %v636_v22  ;;  %v6396_v18 = vor.u32 %v8836_v15, %v6393_v60  ;;  %v8861_v22 = vld [vmem:[%s12397_s4 + $0xcc] sm:$0xf0]  ;;  %v8872_v52 = vld [vmem:[%s12397_s4 + $0x12c] sm:$0xf]  ;;  %v6669_v41 = vld [vmem:[%s12397_s4 + $0x1e0] sm:$0xf] }
 0x105   :  { %848 = vmatpush.bf16.msrb.mxu1 %v6412_v59  ;;  %v6511_v25 = vor.u32 %v8861_v22, %v6510_v21  ;;  %v6594_v59 = vld [vmem:[%s12397_s4 + $0x1f0] sm:$0xff]  ;;  %v6671_v10 = vld [vmem:[%s12397_s4 + $0x1e8] sm:$0xf0]  ;;  %v8893_v60 = vld [vmem:[%s12397_s4 + $0x1d4] sm:$0xf0] }
 0x106   :  { %835 = vmatpush.bf16.msra.mxu2 %v6464_v9  ;;  %v8863_v9 = vld [vmem:[%s12397_s4 + $0xdc] sm:$0xf0]  ;;  %v1191_v61 = vunpack.c.l.b16 %v6594_v59  ;;  %v1192_v46 = vunpack.c.h.b16 %v6594_v59  ;;  %v6661_v15 = vld [vmem:[%s12397_s4 + $0x1d0] sm:$0xf]  ;;  %v8892_v16 = vld [vmem:[%s12397_s4 + $0x1d4] sm:$0xf] }
 0x107   :  { %822 = vmatpush.bf16.msrb.mxu0 %v6392_v32  ;;  %v6519_v11 = vor.u32 %v8863_v9, %v6518_v45  ;;  %v8875_v32 = vld [vmem:[%s12397_s4 + $0x13c] sm:$0xf0]  ;;  %v8894_v9 = vld [vmem:[%s12397_s4 + $0x1e4] sm:$0xf]  ;;  %v6663_v24 = vld [vmem:[%s12397_s4 + $0x1d8] sm:$0xf0] }
 0x108   :  { %659 = vmatpush.bf16.msra.mxu3 %v619_v30  ;;  %v6566_v30 = vld [vmem:[%s12397_s4 + $0x138] sm:$0xf]  ;;  %v6674_v14 = vor.u32 %v8894_v9, %v6671_v10  ;;  %v8890_v19 = vld [vmem:[%s12397_s4 + $0x1c4] sm:$0xf]  ;;  %v6655_v21 = vld [vmem:[%s12397_s4 + $0x1c8] sm:$0xf0] }
 0x109   :  { %849 = vmatpush.bf16.msrb.mxu1 %v6404_v7  ;;  %v6567_v40 = vor.u32 %v8875_v32, %v6566_v30  ;;  %v6637_v50 = vld [vmem:[%s12397_s4 + $0x1a0] sm:$0xf]  ;;  %v8887_v42 = vld [vmem:[%s12397_s4 + $0x1a4] sm:$0xf0] }
 0x10a   :  { %836 = vmatpush.bf16.msra.mxu2 %v6456_v28  ;;  %v6512_v28 = vld [vmem:[%s12397_s4 + $0xd0] sm:$0xf0]  ;;  %v8909_v59 = vld [vmem:[%s12397_s4 + $0x25c] sm:$0xf0] }
 0x10b   :  { %6388 = vmatmul.msk.bf16.vlgmr.msra.gmra.mxu3 %vm627_vm3, %v9869_v38  ;;  %1065 = vmatpush.bf16.msra.mxu0 %v6555_v33  ;;  %v8868_v38 = vld [vmem:[%s12397_s4 + $0x10c] sm:$0xf]  ;;  %v6515_v0 = vor.u32 %v8860_v17, %v6512_v28  ;;  %v1032_v33 = vsel %vm808_vm7, %v1006_v20, 0  ;;  %v6645_v17 = vld [vmem:[%s12397_s4 + $0x1b0] sm:$0xf] }
 0x10c   :  { %v6547_v26 = vor.u32 %v8868_v38, %v6544_v31  ;;  %862 = vmatpush.bf16.msrb.mxu3 %v813_v5  ;;  %v6507_v38 = vor.u32 %v8858_v37, %v6504_v39  ;;  %v8874_v31 = vld [vmem:[%s12397_s4 + $0x13c] sm:$0xf]  ;;  %v8889_v28 = vld [vmem:[%s12397_s4 + $0x1b4] sm:$0xf0] }
 0x10d   :  { %850 = vmatpush.bf16.msrb.mxu1 %v6396_v18  ;;  %v8891_v18 = vld [vmem:[%s12397_s4 + $0x1c4] sm:$0xf0] }
 0x10e   :  { %1037 = vmatpush.bf16.msrb.mxu2 %v6551_v1  ;;  %v1007_v1 = vpack.c.b16 %v985_v6, %v985_v6  ;;  %v6653_v6 = vld [vmem:[%s12397_s4 + $0x1c0] sm:$0xf] }
 0x10f   :  { %1066 = vmatpush.bf16.msra.mxu0 %v6547_v26  ;;  %v6494_v26 = vld [vmem:[%s12397_s4 + $0xa8] sm:$0xf]  ;;  %v6654_v29 = vor.u32 %v8891_v18, %v6653_v6  ;;  %v8904_v6 = vld [vmem:[%s12397_s4 + $0x23c] sm:$0xf]  ;;  %v6734_v18 = vld [vmem:[%s12397_s4 + $0x240] sm:$0xf0] }
 0x110   :  { %863 = vmatpush.bf16.msrb.mxu3 %v6468_v8  ;;  %v1035_v35 = vsel %vm808_vm7, %v1007_v1, 0  ;;  %v8895_v8 = vld [vmem:[%s12397_s4 + $0x1e4] sm:$0xf0] }
 0x111   :  { %1084 = vmatpush.bf16.msra.mxu1 %v1035_v35  ;;  %v6647_v35 = vld [vmem:[%s12397_s4 + $0x1b8] sm:$0xf0] }
 0x112   :  { %1038 = vmatpush.bf16.msrb.mxu2 %v6543_v47  ;;  %v6568_v47 = vld [vmem:[%s12397_s4 + $0x140] sm:$0xf0] }
 0x113   :  { %1067 = vmatpush.bf16.msra.mxu0 %v6539_v54  ;;  %v6571_v34 = vor.u32 %v8874_v31, %v6568_v47  ;;  %v6560_v54 = vld [vmem:[%s12397_s4 + $0x130] sm:$0xf0]  ;;  %v8910_v47 = vld [vmem:[%s12397_s4 + $0x26c] sm:$0xf] }
 0x114   :  { %864 = vmatpush.bf16.msrb.mxu3 %v6460_v23  ;;  %v6563_v12 = vor.u32 %v8872_v52, %v6560_v54  ;;  %v6662_v23 = vor.u32 %v8893_v60, %v6661_v15  ;;  %v6639_v54 = vld [vmem:[%s12397_s4 + $0x1a8] sm:$0xf0] }
 0x115   :  { %1085 = vmatpush.bf16.msra.mxu1 %v6571_v34  ;;  %v6646_v34 = vor.u32 %v8889_v28, %v6645_v17  ;;  %v6615_v17 = vld [vmem:[%s12397_s4 + $0x178] sm:$0xf0] }
 0x116   :  { %1039 = vmatpush.bf16.msrb.mxu2 %v6535_v53  ;;  %v6495_v53 = vor.u32 %v8857_v48, %v6494_v26  ;;  %v6758_v26 = vld [vmem:[%s12397_s4 + $0x270] sm:$0xf0]  ;;  %v6697_v28 = vld [vmem:[%s12397_s4 + $0x298] sm:$0xff] }
 0x117   :  { %1068 = vmatpush.bf16.msra.mxu0 %v6531_v49  ;;  %v1214_v49 = vpack.c.b16 %v1192_v46, %v1192_v46  ;;  %v6750_v46 = vld [vmem:[%s12397_s4 + $0x260] sm:$0xf0] }
 0x118   :  { %1056 = vmatpush.bf16.msra.mxu3 %v1032_v33  ;;  %v8888_v33 = vld [vmem:[%s12397_s4 + $0x1b4] sm:$0xf] }
 0x119   :  { %1086 = vmatpush.bf16.msra.mxu1 %v6563_v12  ;;  %v1242_v4 = vsel %vm808_vm7, %v1214_v49, 0  ;;  %v6650_v48 = vor.u32 %v8888_v33, %v6647_v35  ;;  %v6748_v12 = vld [vmem:[%s12397_s4 + $0x258] sm:$0xf]  ;;  %v8902_v33 = vld [vmem:[%s12397_s4 + $0x22c] sm:$0xf] }
 0x11a   :  { %1040 = vmatpush.bf16.msrb.mxu2 %v6527_v63  ;;  %v1213_v63 = vpack.c.b16 %v1191_v61, %v1191_v61  ;;  %v8908_v61 = vld [vmem:[%s12397_s4 + $0x25c] sm:$0xf]  ;;  %v8885_v49 = vld [vmem:[%s12397_s4 + $0x194] sm:$0xf0]  ;;  %v6726_v35 = vld [vmem:[%s12397_s4 + $0x230] sm:$0xf0] }
 0x11b   :  { %1069 = vmatpush.bf16.msra.mxu0 %v6523_v13  ;;  %v6670_v13 = vor.u32 %v8895_v8, %v6669_v41  ;;  %v6749_v41 = vor.u32 %v8909_v59, %v6748_v12  ;;  %v6742_v8 = vld [vmem:[%s12397_s4 + $0x250] sm:$0xf0]  ;;  %v6597_v12 = vld [vmem:[%s12397_s4 + $0x150] sm:$0xf] }
 0x11c   :  { %1057 = vmatpush.bf16.msra.mxu3 %v6567_v40  ;;  %v1239_v2 = vsel %vm808_vm7, %v1213_v63, 0  ;;  %v6756_v40 = vld [vmem:[%s12397_s4 + $0x268] sm:$0xf]  ;;  %v6629_v63 = vld [vmem:[%s12397_s4 + $0x190] sm:$0xf] }
 0x11d   :  { %v6630_v9 = vor.u32 %v8885_v49, %v6629_v63  ;;  %v6800_v63 = vld [vmem:[%s12397_s4 + $0x340] sm:$0xff] }
 0x11e   :  { %1041 = vmatpush.bf16.msrb.mxu2 %v6519_v11 }
 0x11f   :  { %1070 = vmatpush.bf16.msra.mxu0 %v6515_v0  ;;  %v6658_v0 = vor.u32 %v8890_v19, %v6655_v21 }
 0x120   :  { %1058 = vmatpush.bf16.msra.mxu3 %v6559_v56 }
 0x122   :  { %1042 = vmatpush.bf16.msrb.mxu2 %v6511_v25  ;;  %v6666_v25 = vor.u32 %v8892_v16, %v6663_v24  ;;  %v6732_v16 = vld [vmem:[%s12397_s4 + $0x238] sm:$0xf]  ;;  %v8905_v24 = vld [vmem:[%s12397_s4 + $0x23c] sm:$0xf0] }
 0x123   :  { %1071 = vmatpush.bf16.msra.mxu0 %v6507_v38  ;;  %v8911_v38 = vld [vmem:[%s12397_s4 + $0x26c] sm:$0xf0] }
 0x124   :  { %v6757_v56 = vor.u32 %v8911_v38, %v6756_v40  ;;  %v1410_v40 = vunpack.c.l.b16 %v6697_v28 }
 0x126   :  { %1043 = vmatpush.bf16.msrb.mxu2 %v6503_v36  ;;  %v1432_v59 = vpack.c.b16 %v1410_v40, %v1410_v40  ;;  %v6766_v40 = vld [vmem:[%s12397_s4 + $0x280] sm:$0xf0] }
 0x127   :  { %1072 = vmatpush.bf16.msra.mxu0 %v6499_v57  ;;  %v6761_v57 = vor.u32 %v8910_v47, %v6758_v26  ;;  %v8878_v47 = vld [vmem:[%s12397_s4 + $0x164] sm:$0xf]  ;;  %v6607_v26 = vld [vmem:[%s12397_s4 + $0x168] sm:$0xf0] }
 0x12a   :  { %1044 = vmatpush.bf16.msrb.mxu2 %v6495_v53  ;;  %v8886_v53 = vld [vmem:[%s12397_s4 + $0x1a4] sm:$0xf] }
 0x184   :  { %v647_v58 = vpop.f32.mrf.mxu2 }
 0x185   :  { %666 = vst [vmem:[#allocation2] sm:$0xff] %v647_v58 }
 0x18c   :  { %v649_v3 = vpop.f32.mrf.mxu2  ;;  %v880_v7 = vld [vmem:[#allocation2] sm:$0xfe] }
 0x18d   :  { %669 = vst [vmem:[#allocation2 + $0x10] sm:$0x3f] %v649_v3  ;;  %v6638_v3 = vor.u32 %v8887_v42, %v6637_v50  ;;  %v1304_v38 = vld [vmem:[#allocation2] sm:$0xf8]  ;;  %v6729_v50 = vor.u32 %v8902_v33, %v6726_v35  ;;  %v6716_v42 = vld [vmem:[%s12397_s4 + $0x218] sm:$0xf] }
 0x18e   :  { %v661_v62 = vpop.f32.mrf.mxu3 }
 0x18f   :  { %668 = vst.msk [vmem:[#allocation2 + $0x8] sm:$0xff] %vm667_vm6, %v661_v62  ;;  %v6642_v62 = vor.u32 %v8886_v53, %v6639_v54  ;;  %v8900_v53 = vld [vmem:[%s12397_s4 + $0x21c] sm:$0xf]  ;;  %v6718_v54 = vld [vmem:[%s12397_s4 + $0x220] sm:$0xf0] }
 0x194   :  { %v675_v5 = vld [vmem:[#allocation2 + $0x10] sm:$0x3] }
 0x195   :  { %v882_v43 = vld [vmem:[#allocation2 + $0x10] sm:$0x7]  ;;  %v677_v45 = vpack.c.bf16 %v675_v5, %v647_v58  ;;  %v6753_v5 = vor.u32 %v8908_v61, %v6750_v46  ;;  %v8876_v61 = vld [vmem:[%s12397_s4 + $0x154] sm:$0xf]  ;;  %v6599_v46 = vld [vmem:[%s12397_s4 + $0x158] sm:$0xf0] }
 0x196   :  { %v663_v55 = vpop.f32.mrf.mxu3  ;;  %v884_v11 = vpack.c.bf16 %v882_v43, %v880_v7  ;;  %v674_v20 = vld [vmem:[#allocation2 + $0x8] sm:$0xff]  ;;  %v8907_v43 = vld [vmem:[%s12397_s4 + $0x24c] sm:$0xf0] }
 0x197   :  { %671 = vst.msk [vmem:[#allocation2 + $0x18] sm:$0x3f] %vm670_vm11, %v663_v55  ;;  %823 = vmatmul.bf16.vlgmr.msrb.gmra.mxu0 %v677_v45  ;;  %851 = vmatmul.bf16.vlgmr.msrb.gmra.mxu1 %v677_v45  ;;  %v881_v27 = vld [vmem:[#allocation2 + $0x8] sm:$0xfe]  ;;  %v6621_v55 = vld [vmem:[%s12397_s4 + $0x180] sm:$0xf] }
 0x198   :  { %1263 = vmatpush.bf16.msrb.mxu1 %v1239_v2  ;;  %1291 = vmatpush.bf16.msrb.mxu0 %v1242_v4  ;;  %v911_v22 = vshll.u32 %v884_v11, 16  ;;  %v909_v36 = vshrl.u32 %v884_v11, 16  ;;  %v8884_v2 = vld [vmem:[%s12397_s4 + $0x194] sm:$0xf]  ;;  %v6631_v4 = vld [vmem:[%s12397_s4 + $0x198] sm:$0xf0] }
 0x199   :  { %v6740_v7 = vld [vmem:[%s12397_s4 + $0x248] sm:$0xf]  ;;  %v8906_v45 = vld [vmem:[%s12397_s4 + $0x24c] sm:$0xf]  ;;  %v6634_v10 = vor.u32 %v8884_v2, %v6631_v4  ;;  %v6721_v2 = vor.u32 %v8900_v53, %v6718_v54  ;;  %v1097_v4 = vld [vmem:[#allocation2] sm:$0xfc] }
 0x19a   :  { %v913_v37 = vrot.slane %v911_v22, 1  ;;  %v8883_v11 = vld [vmem:[%s12397_s4 + $0x184] sm:$0xf0]  ;;  %v6741_v15 = vor.u32 %v8907_v43, %v6740_v7  ;;  %v6745_v60 = vor.u32 %v8906_v45, %v6742_v8  ;;  %v6613_v22 = vld [vmem:[%s12397_s4 + $0x170] sm:$0xf] }
 0x19b   :  { %v6622_v19 = vor.u32 %v8883_v11, %v6621_v55  ;;  %v8899_v43 = vld [vmem:[%s12397_s4 + $0x20c] sm:$0xf0]  ;;  %v8898_v45 = vld [vmem:[%s12397_s4 + $0x20c] sm:$0xf]  ;;  %v6710_v8 = vld [vmem:[%s12397_s4 + $0x210] sm:$0xf0]  ;;  %v1617_v55 = vunpack.c.l.b16 %v6800_v63  ;;  %v1618_v11 = vunpack.c.h.b16 %v6800_v63 }
 0x19c   :  { %1264 = vmatpush.bf16.msrb.mxu1 %v6670_v13  ;;  %1292 = vmatpush.bf16.msrb.mxu0 %v6674_v14  ;;  %v914_v51 = vor.u32 %v913_v37, %v909_v36  ;;  %v8882_v13 = vld [vmem:[%s12397_s4 + $0x184] sm:$0xf]  ;;  %v6623_v14 = vld [vmem:[%s12397_s4 + $0x188] sm:$0xf0]  ;;  %v8935_v53 = vld [vmem:[%s12397_s4 + $0x334] sm:$0xf0] }
 0x19d   :  { %v6626_v21 = vor.u32 %v8882_v13, %v6623_v14  ;;  %v1305_v33 = vld [vmem:[#allocation2 + $0x8] sm:$0xf8]  ;;  %v8934_v54 = vld [vmem:[%s12397_s4 + $0x334] sm:$0xf] }
 0x19e   :  { %v676_v1 = vld [vmem:[#allocation2 + $0x18] sm:$0x3] }
 0x19f   :  { %v883_v30 = vld [vmem:[#allocation2 + $0x18] sm:$0x7]  ;;  %v678_v32 = vpack.c.bf16 %v676_v1, %v674_v20  ;;  %v8880_v20 = vld [vmem:[%s12397_s4 + $0x174] sm:$0xf]  ;;  %v6733_v1 = vor.u32 %v8905_v24, %v6732_v16 }
 0x1a0   :  { %v885_v39 = vpack.c.bf16 %v883_v30, %v881_v27  ;;  %1265 = vmatpush.bf16.msrb.mxu1 %v6662_v23  ;;  %1293 = vmatpush.bf16.msrb.mxu0 %v6666_v25  ;;  %v8881_v23 = vld [vmem:[%s12397_s4 + $0x174] sm:$0xf0]  ;;  %v6724_v27 = vld [vmem:[%s12397_s4 + $0x228] sm:$0xf]  ;;  %v6618_v37 = vor.u32 %v8880_v20, %v6615_v17  ;;  %v8913_v17 = vld [vmem:[%s12397_s4 + $0x27c] sm:$0xf0] }
 0x1a1   :  { %6469 = vmatmul.msk.bf16.vlgmr.msra.gmra.mxu2 %vm667_vm6, %v678_v32  ;;  %6470 = vmatmul.msk.bf16.vlgmr.msrb.gmra.mxu3 %vm667_vm6, %v678_v32  ;;  %v1100_v25 = vld [vmem:[#allocation2 + $0x18] sm:$0xf]  ;;  %v8903_v32 = vld [vmem:[%s12397_s4 + $0x22c] sm:$0xf0]  ;;  %v6614_v36 = vor.u32 %v8881_v23, %v6613_v22  ;;  %v8897_v22 = vld [vmem:[%s12397_s4 + $0x1fc] sm:$0xf0] }
 0x1a2   :  { %v918_v31 = vshll.u32 %v885_v39, 16  ;;  %1244 = vmatpush.bf16.msrb.mxu3 %v6654_v29  ;;  %1272 = vmatpush.bf16.msra.mxu2 %v6658_v0  ;;  %v916_v44 = vshrl.u32 %v885_v39, 16  ;;  %v6737_v29 = vor.u32 %v8904_v6, %v6734_v18  ;;  %v1098_v0 = vld [vmem:[#allocation2 + $0x8] sm:$0xfc]  ;;  %v6605_v39 = vld [vmem:[%s12397_s4 + $0x160] sm:$0xf]  ;;  %v6713_v6 = vor.u32 %v8898_v45, %v6710_v8 }
 0x1a3   :  { %v1102_v30 = vpack.c.bf16 %v1100_v25, %v1098_v0  ;;  %v8914_v18 = vld [vmem:[%s12397_s4 + $0x28c] sm:$0xf]  ;;  %v8896_v23 = vld [vmem:[%s12397_s4 + $0x1fc] sm:$0xf]  ;;  %v6702_v25 = vld [vmem:[%s12397_s4 + $0x200] sm:$0xf0] }
 0x1a4   :  { %v920_v52 = vrot.slane %v918_v31, 1  ;;  %v8879_v31 = vld [vmem:[%s12397_s4 + $0x164] sm:$0xf0]  ;;  %v6764_v20 = vld [vmem:[%s12397_s4 + $0x278] sm:$0xf] }
 0x1a5   :  { %v1307_v35 = vld [vmem:[#allocation2 + $0x18] sm:$0x1f]  ;;  %v6843_v8 = vld [vmem:[%s12397_s4 + $0x2f0] sm:$0xf] }
 0x1a6   :  { %v921_v58 = vor.u32 %v920_v52, %v916_v44  ;;  %1245 = vmatpush.bf16.msrb.mxu3 %v6646_v34  ;;  %1273 = vmatpush.bf16.msra.mxu2 %v6650_v48  ;;  %v1411_v34 = vunpack.c.h.b16 %v6697_v28  ;;  %v6725_v48 = vor.u32 %v8903_v32, %v6724_v27  ;;  %v1306_v44 = vld [vmem:[#allocation2 + $0x10] sm:$0x1f]  ;;  %v1128_v52 = vrot.slane %v1102_v30, 1 }
 0x1a7   :  { %1073 = vmatmul.bf16.vlgmr.msra.gmra.mxu0 %v914_v51 }
 0x1a8   :  { %6573 = vmatmul.msk.bf16.vlgmr.msra.gmra.mxu1 %vm667_vm6, %v921_v58  ;;  %1491 = vmatpush.bf16.msra.mxu0 %v6761_v57  ;;  %v6610_v57 = vor.u32 %v8878_v47, %v6607_v26  ;;  %v8930_v47 = vld [vmem:[%s12397_s4 + $0x314] sm:$0xf]  ;;  %v6861_v26 = vld [vmem:[%s12397_s4 + $0x318] sm:$0xf0] }
 0x1a9   :  { %1463 = vmatpush.bf16.msra.mxu1 %v6757_v56  ;;  %v6606_v56 = vor.u32 %v8879_v31, %v6605_v39  ;;  %v8912_v39 = vld [vmem:[%s12397_s4 + $0x27c] sm:$0xf]  ;;  %v8931_v31 = vld [vmem:[%s12397_s4 + $0x314] sm:$0xf0] }
 0x1aa   :  { %1246 = vmatpush.bf16.msrb.mxu3 %v6638_v3  ;;  %1274 = vmatpush.bf16.msra.mxu2 %v6642_v62  ;;  %v1433_v3 = vpack.c.b16 %v1411_v34, %v1411_v34  ;;  %v1308_v62 = vpack.c.bf16 %v1306_v44, %v1304_v38  ;;  %v6859_v38 = vld [vmem:[%s12397_s4 + $0x310] sm:$0xf]  ;;  %v6765_v44 = vor.u32 %v8913_v17, %v6764_v20  ;;  %v1526_v20 = vld [vmem:[#allocation2 + $0x18] sm:$0x3f] }
 0x1ab   :  { %v8923_v17 = vld [vmem:[%s12397_s4 + $0x2d4] sm:$0xf0] }
 0x1ac   :  { %1492 = vmatpush.bf16.msra.mxu0 %v6753_v5  ;;  %v6708_v5 = vld [vmem:[%s12397_s4 + $0x208] sm:$0xf]  ;;  %v1461_v13 = vsel %vm808_vm7, %v1433_v3, 0  ;;  %v1333_v16 = vshrl.u32 %v1308_v62, 16  ;;  %v1336_v28 = vshll.u32 %v1308_v62, 16 }
 0x1ad   :  { %1464 = vmatpush.bf16.msra.mxu1 %v6749_v41  ;;  %v1099_v41 = vld [vmem:[#allocation2 + $0x10] sm:$0xf]  ;;  %v6709_v24 = vor.u32 %v8899_v43, %v6708_v5  ;;  %v8932_v5 = vld [vmem:[%s12397_s4 + $0x324] sm:$0xf] }
 0x1ae   :  { %1247 = vmatpush.bf16.msrb.mxu3 %v6630_v9  ;;  %1275 = vmatpush.bf16.msra.mxu2 %v6634_v10  ;;  %v6602_v9 = vor.u32 %v8876_v61, %v6599_v46  ;;  %v1458_v10 = vsel %vm808_vm7, %v1432_v59, 0  ;;  %v1101_v14 = vpack.c.bf16 %v1099_v41, %v1097_v4  ;;  %v1335_v32 = vrot.slane %v1333_v16, 1  ;;  %v8929_v59 = vld [vmem:[%s12397_s4 + $0x304] sm:$0xf0]  ;;  %v8928_v61 = vld [vmem:[%s12397_s4 + $0x304] sm:$0xf] }
 0x1af   :  { %v1338_v34 = vrot.slane %v1336_v28, 2  ;;  %v6853_v46 = vld [vmem:[%s12397_s4 + $0x308] sm:$0xf0]  ;;  %v8933_v41 = vld [vmem:[%s12397_s4 + $0x324] sm:$0xf0] }
 0x1b0   :  { %1493 = vmatpush.bf16.msra.mxu0 %v6745_v60  ;;  %v8915_v60 = vld [vmem:[%s12397_s4 + $0x28c] sm:$0xf0]  ;;  %v1127_v0 = vrot.slane %v1101_v14, 1  ;;  %v6856_v45 = vor.u32 %v8928_v61, %v6853_v46  ;;  %v8922_v28 = vld [vmem:[%s12397_s4 + $0x2d4] sm:$0xf] }
 0x1b1   :  { %1465 = vmatpush.bf16.msra.mxu1 %v6741_v15  ;;  %1045 = vmatmul.bf16.vlgmr.msrb.gmra.mxu2 %v914_v51  ;;  %v8901_v51 = vld [vmem:[%s12397_s4 + $0x21c] sm:$0xf0]  ;;  %v6772_v15 = vld [vmem:[%s12397_s4 + $0x288] sm:$0xf]  ;;  %v1339_v4 = vor.u32 %v1338_v34, %v1335_v32 }
 0x1b2   :  { %6572 = vmatmul.msk.bf16.vlgmr.msra.gmra.mxu3 %vm667_vm6, %v921_v58  ;;  %1276 = vmatpush.bf16.msra.mxu2 %v6626_v21  ;;  %v8877_v58 = vld [vmem:[%s12397_s4 + $0x154] sm:$0xf0]  ;;  %v6717_v49 = vor.u32 %v8901_v51, %v6716_v42  ;;  %v6773_v27 = vor.u32 %v8915_v60, %v6772_v15  ;;  %v1309_v42 = vpack.c.bf16 %v1307_v35, %v1305_v33  ;;  %v6875_v51 = vld [vmem:[%s12397_s4 + $0x330] sm:$0xf]  ;;  %v6819_v32 = vld [vmem:[%s12397_s4 + $0x2c0] sm:$0xf] }
 0x1b3   :  { %1248 = vmatpush.bf16.msrb.mxu3 %v6622_v19  ;;  %v6598_v7 = vor.u32 %v8877_v58, %v6597_v12  ;;  %v6774_v19 = vld [vmem:[%s12397_s4 + $0x290] sm:$0xf0]  ;;  %v6700_v21 = vld [vmem:[%s12397_s4 + $0x1f8] sm:$0xf]  ;;  %v6864_v12 = vor.u32 %v8930_v47, %v6861_v26  ;;  %v6851_v58 = vld [vmem:[%s12397_s4 + $0x300] sm:$0xf]  ;;  %v6876_v63 = vor.u32 %v8935_v53, %v6875_v51 }
 0x1b4   :  { %1494 = vmatpush.bf16.msra.mxu0 %v6737_v29  ;;  %v1640_v29 = vpack.c.b16 %v1618_v11, %v1618_v11  ;;  %v6777_v30 = vor.u32 %v8914_v18, %v6774_v19  ;;  %v1341_v3 = vshrl.u32 %v1309_v42, 16  ;;  %v1344_v62 = vshll.u32 %v1309_v42, 16  ;;  %v8924_v18 = vld [vmem:[%s12397_s4 + $0x2e4] sm:$0xf]  ;;  %v6837_v19 = vld [vmem:[%s12397_s4 + $0x2e8] sm:$0xf0] }
 0x1b5   :  { %1466 = vmatpush.bf16.msra.mxu1 %v6733_v1  ;;  %v1639_v1 = vpack.c.b16 %v1617_v55, %v1617_v55  ;;  %v6852_v43 = vor.u32 %v8929_v59, %v6851_v58  ;;  %v6845_v55 = vld [vmem:[%s12397_s4 + $0x2f8] sm:$0xf0]  ;;  %v8921_v33 = vld [vmem:[%s12397_s4 + $0x2c4] sm:$0xf0]  ;;  %v8920_v35 = vld [vmem:[%s12397_s4 + $0x2c4] sm:$0xf] }
 0x1b6   :  { %1277 = vmatpush.bf16.msra.mxu2 %v6618_v37  ;;  %v6705_v37 = vor.u32 %v8896_v23, %v6702_v25  ;;  %v1343_v14 = vrot.slane %v1341_v3, 1  ;;  %v1346_v15 = vrot.slane %v1344_v62, 2  ;;  %v6840_v23 = vor.u32 %v8924_v18, %v6837_v19  ;;  %v6827_v25 = vld [vmem:[%s12397_s4 + $0x2d0] sm:$0xf]  ;;  %v8918_v47 = vld [vmem:[%s12397_s4 + $0x2b4] sm:$0xf] }
 0x1b7   :  { %1249 = vmatpush.bf16.msrb.mxu3 %v6614_v36  ;;  %6676 = vmatmul.msk.bf16.vlgmr.msrb.gmra.mxu0 %vm667_vm6, %v1128_v52  ;;  %v6701_v36 = vor.u32 %v8897_v22, %v6700_v21  ;;  %v6813_v26 = vld [vmem:[%s12397_s4 + $0x2b8] sm:$0xf0]  ;;  %v8917_v42 = vld [vmem:[%s12397_s4 + $0x2a4] sm:$0xf0]  ;;  %v8916_v51 = vld [vmem:[%s12397_s4 + $0x2a4] sm:$0xf] }
 0x1b8   :  { %6675 = vmatmul.msk.bf16.vlgmr.msrb.gmra.mxu1 %vm667_vm6, %v1128_v52  ;;  %1495 = vmatpush.bf16.msra.mxu0 %v6729_v50  ;;  %v1668_v50 = vsel %vm808_vm7, %v1640_v29, 0  ;;  %v6769_v52 = vor.u32 %v8912_v39, %v6766_v40  ;;  %v1347_v21 = vor.u32 %v1346_v15, %v1343_v14  ;;  %v1524_v29 = vld [vmem:[#allocation2 + $0x8] sm:$0xf0]  ;;  %v6820_v39 = vor.u32 %v8921_v33, %v6819_v32  ;;  %v1525_v53 = vld [vmem:[#allocation2 + $0x10] sm:$0x3f] }
 0x1b9   :  { %1467 = vmatpush.bf16.msra.mxu1 %v6725_v48  ;;  %v1665_v48 = vsel %vm808_vm7, %v1639_v1, 0  ;;  %v6829_v1 = vld [vmem:[%s12397_s4 + $0x2d8] sm:$0xf0]  ;;  %v672_v19 = vld [vmem:[%s12398_s5] sm:$0x3] }
 0x1ba   :  { %1278 = vmatpush.bf16.msra.mxu2 %v6610_v57  ;;  %v6860_v57 = vor.u32 %v8931_v31, %v6859_v38  ;;  %v6811_v38 = vld [vmem:[%s12397_s4 + $0x2b0] sm:$0xf]  ;;  %v8919_v31 = vld [vmem:[%s12397_s4 + $0x2b4] sm:$0xf0] }
 0x1bb   :  { %1250 = vmatpush.bf16.msrb.mxu3 %v6606_v56  ;;  %v6877_v56 = vld [vmem:[%s12397_s4 + $0x338] sm:$0xf0]  ;;  %v6812_v34 = vor.u32 %v8919_v31, %v6811_v38 }
 0x1bc   :  { %1496 = vmatpush.bf16.msra.mxu0 %v6721_v2  ;;  %v6867_v2 = vld [vmem:[%s12397_s4 + $0x320] sm:$0xf] }
 0x1bd   :  { %1468 = vmatpush.bf16.msra.mxu1 %v6717_v49  ;;  %v6880_v49 = vor.u32 %v8934_v54, %v6877_v56  ;;  %v6868_v11 = vor.u32 %v8933_v41, %v6867_v2 }
 0x1be   :  { %1279 = vmatpush.bf16.msra.mxu2 %v6602_v9  ;;  %v8927_v9 = vld [vmem:[%s12397_s4 + $0x2f4] sm:$0xf0] }
 0x1bf   :  { %1251 = vmatpush.bf16.msrb.mxu3 %v6598_v7  ;;  %v6869_v7 = vld [vmem:[%s12397_s4 + $0x328] sm:$0xf0]  ;;  %v6844_v60 = vor.u32 %v8927_v9, %v6843_v8 }
 0x1c0   :  { %1497 = vmatpush.bf16.msra.mxu0 %v6713_v6  ;;  %v8925_v6 = vld [vmem:[%s12397_s4 + $0x2e4] sm:$0xf0] }
 0x1c1   :  { %1469 = vmatpush.bf16.msra.mxu1 %v6709_v24  ;;  %1280 = vmatmul.bf16.vlgmr.msra.gmra.mxu2 %v1127_v0  ;;  %v6835_v24 = vld [vmem:[%s12397_s4 + $0x2e0] sm:$0xf] }
 0x1c2   :  { %1510 = vmatpush.bf16.msrb.mxu2 %v1461_v13  ;;  %1252 = vmatmul.bf16.vlgmr.msrb.gmra.mxu3 %v1127_v0  ;;  %v6872_v13 = vor.u32 %v8932_v5, %v6869_v7  ;;  %v6836_v22 = vor.u32 %v8925_v6, %v6835_v24  ;;  %v1528_v0 = vpack.c.bf16 %v1526_v20, %v1524_v29 }
 0x1c3   :  { %1482 = vmatpush.bf16.msra.mxu3 %v1458_v10  ;;  %v8926_v10 = vld [vmem:[%s12397_s4 + $0x2f4] sm:$0xf] }
 0x1c4   :  { %1498 = vmatpush.bf16.msra.mxu0 %v6705_v37  ;;  %v6848_v16 = vor.u32 %v8926_v10, %v6845_v55  ;;  %v1554_v37 = vrot.slane %v1528_v0, 2 }
 0x1c5   :  { %1470 = vmatpush.bf16.msra.mxu1 %v6701_v36  ;;  %v6821_v36 = vld [vmem:[%s12397_s4 + $0x2c8] sm:$0xf0] }
 0x1c6   :  { %1511 = vmatpush.bf16.msrb.mxu2 %v6777_v30  ;;  %v6832_v30 = vor.u32 %v8922_v28, %v6829_v1  ;;  %v6824_v40 = vor.u32 %v8920_v35, %v6821_v36 }
 0x1c7   :  { %1483 = vmatpush.bf16.msra.mxu3 %v6773_v27  ;;  %1499 = vmatmul.bf16.vlgmr.msra.gmra.mxu0 %v1339_v4  ;;  %v6828_v27 = vor.u32 %v8923_v17, %v6827_v25  ;;  %v873_v25 = vperm.slane %v672_v19, 1  ;;  %v872_v17 = vperm.slane %v672_v19, 0  ;;  %v8955_v19 = vld [vmem:[%s12399_s6 + $0x98] sm:$0xff] }
 0x1c8   :  { %1717 = vmatpush.bf16.msrb.mxu0 %v1668_v50  ;;  %1471 = vmatmul.bf16.vlgmr.msra.gmra.mxu1 %v1339_v4  ;;  %v6803_v50 = vld [vmem:[%s12397_s4 + $0x2a0] sm:$0xf] }
 0x1c9   :  { %1689 = vmatpush.bf16.msrb.mxu1 %v1665_v48  ;;  %v6816_v48 = vor.u32 %v8918_v47, %v6813_v26  ;;  %v6804_v54 = vor.u32 %v8917_v42, %v6803_v50  ;;  %v8943_v47 = vld [vmem:[%s12399_s6 + $0x38] sm:$0xff]  ;;  %v8953_v26 = vld [vmem:[%s12399_s6 + $0x88] sm:$0xff] }
 0x1ca   :  { %1512 = vmatpush.bf16.msrb.mxu2 %v6769_v52  ;;  %v1523_v52 = vld [vmem:[#allocation2] sm:$0xf0] }
 0x1cb   :  { %1484 = vmatpush.bf16.msra.mxu3 %v6765_v44  ;;  %v6805_v44 = vld [vmem:[%s12397_s4 + $0x2a8] sm:$0xf0] }
 0x1cc   :  { %1718 = vmatpush.bf16.msrb.mxu0 %v6880_v49  ;;  %v6808_v56 = vor.u32 %v8916_v51, %v6805_v44 }
 0x1cd   :  { %1690 = vmatpush.bf16.msrb.mxu1 %v6876_v63 }
 0x1ce   :  { %1698 = vmatpush.bf16.msra.mxu2 %v6864_v12 }
 0x1cf   :  { %1670 = vmatpush.bf16.msrb.mxu3 %v6860_v57  ;;  %v1527_v57 = vpack.c.bf16 %v1525_v53, %v1523_v52 }
 0x1d0   :  { %1719 = vmatpush.bf16.msrb.mxu0 %v6872_v13 }
 0x1d1   :  { %1691 = vmatpush.bf16.msrb.mxu1 %v6868_v11  ;;  %6779 = vmatmul.msk.bf16.vlgmr.msrb.gmra.mxu2 %vm667_vm6, %v1347_v21  ;;  %v1553_v12 = vrot.slane %v1527_v57, 2 }
 0x1d2   :  { %1699 = vmatpush.bf16.msra.mxu2 %v6856_v45  ;;  %6778 = vmatmul.msk.bf16.vlgmr.msra.gmra.mxu3 %vm667_vm6, %v1347_v21 }
 0x1d3   :  { %1671 = vmatpush.bf16.msrb.mxu3 %v6852_v43 }
 0x1d4   :  { %2023 = vmatpush.bf16.msra.mxu0 %v8953_v26  ;;  %v8971_v26 = vld [vmem:[%s12399_s6 + $0x118] sm:$0xff] }
 0x1d5   :  { %1903 = vmatpush.bf16.msra.mxu1 %v8943_v47  ;;  %v8961_v47 = vld [vmem:[%s12399_s6 + $0xc8] sm:$0xff] }
 0x1d6   :  { %1700 = vmatpush.bf16.msra.mxu2 %v6848_v16 }
 0x1d7   :  { %1672 = vmatpush.bf16.msrb.mxu3 %v6844_v60  ;;  %6882 = vmatmul.msk.bf16.vlgmr.msrb.gmra.mxu0 %vm667_vm6, %v1554_v37 }
 0x1d8   :  { %6881 = vmatmul.msk.bf16.vlgmr.msrb.gmra.mxu1 %vm667_vm6, %v1554_v37 }
 0x1da   :  { %1701 = vmatpush.bf16.msra.mxu2 %v6840_v23 }
 0x1db   :  { %1673 = vmatpush.bf16.msrb.mxu3 %v6836_v22 }
 0x1de   :  { %1702 = vmatpush.bf16.msra.mxu2 %v6832_v30 }
 0x1df   :  { %1674 = vmatpush.bf16.msrb.mxu3 %v6828_v27 }
 0x1e2   :  { %1703 = vmatpush.bf16.msra.mxu2 %v6824_v40 }
 0x1e3   :  { %1675 = vmatpush.bf16.msrb.mxu3 %v6820_v39 }
 0x1e6   :  { %1704 = vmatpush.bf16.msra.mxu2 %v6816_v48 }
 0x1e7   :  { %1676 = vmatpush.bf16.msrb.mxu3 %v6812_v34 }
 0x1ea   :  { %1705 = vmatpush.bf16.msra.mxu2 %v6808_v56 }
 0x1eb   :  { %1677 = vmatpush.bf16.msrb.mxu3 %v6804_v54 }
 0x1ed   :  { %1706 = vmatmul.bf16.vlgmr.msra.gmra.mxu2 %v1553_v12 }
 0x1ee   :  { %1678 = vmatmul.bf16.vlgmr.msrb.gmra.mxu3 %v1553_v12  ;;  %2042 = vmatpush.bf16.msrb.mxu2 %v8955_v19 }
 0x214   :  { %v824_v58 = vpop.f32.mrf.mxu0  ;;  %v852_v59 = vpop.f32.mrf.mxu1 }
 0x21c   :  { %v826_v61 = vpop.f32.mrf.mxu0  ;;  %v854_v46 = vpop.f32.mrf.mxu1 }
 0x224   :  { %v838_v3 = vpop.f32.mrf.mxu2  ;;  %v866_v62 = vpop.f32.mrf.mxu3 }
 0x225   :  { %v1074_v63 = vpop.f32.mrf.mxu0  ;;  %v1088_v49 = vpop.f32.mrf.mxu1  ;;  %v867_v23 = vadd.f32 %v866_v62, %v852_v59  ;;  %v839_v20 = vadd.f32 %v838_v3, %v824_v58  ;;  %v8942_v58 = vld [vmem:[%s12399_s6 + $0x30] sm:$0xff]  ;;  %v8952_v59 = vld [vmem:[%s12399_s6 + $0x80] sm:$0xff] }
 0x226   :  { %v1089_v0 = vadd.f32 %v1088_v49, %v1074_v63  ;;  %1904 = vmatpush.bf16.msra.mxu1 %v8942_v58  ;;  %2024 = vmatpush.bf16.msra.mxu0 %v8952_v59  ;;  %v8970_v58 = vld [vmem:[%s12399_s6 + $0x110] sm:$0xff] }
 0x227   :  { %v877_v29 = vadd.f32 %v873_v25, %v867_v23  ;;  %v876_v30 = vadd.f32 %v872_v17, %v839_v20  ;;  %v8939_v23 = vld [vmem:[%s12399_s6 + $0x18] sm:$0xff]  ;;  %v8949_v20 = vld [vmem:[%s12399_s6 + $0x68] sm:$0xff] }
 0x229   :  { %v1094_v36 = vadd.f32 %v1089_v0, %v877_v29  ;;  %v8963_v29 = vld [vmem:[%s12399_s6 + $0xd8] sm:$0xff] }
 0x22c   :  { %v840_v2 = vpop.f32.mrf.mxu2  ;;  %v868_v4 = vpop.f32.mrf.mxu3 }
 0x22d   :  { %v1076_v7 = vpop.f32.mrf.mxu0  ;;  %v1090_v43 = vpop.f32.mrf.mxu1  ;;  %v869_v35 = vadd.f32 %v868_v4, %v854_v46  ;;  %v841_v34 = vadd.f32 %v840_v2, %v826_v61 }
 0x22e   :  { %v1091_v51 = vadd.f32 %v1090_v43, %v1076_v7  ;;  %v8941_v43 = vld [vmem:[%s12399_s6 + $0x28] sm:$0xff] }
 0x22f   :  { %v879_v42 = vadd.f32 %v873_v25, %v869_v35  ;;  %v878_v61 = vadd.f32 %v872_v17, %v841_v34  ;;  %1905 = vmatpush.bf16.msra.mxu1 %v8941_v43  ;;  %v8944_v25 = vld [vmem:[%s12399_s6 + $0x40] sm:$0xff]  ;;  %v8938_v35 = vld [vmem:[%s12399_s6 + $0x10] sm:$0xff] }
 0x231   :  { %v1096_v49 = vadd.f32 %v1091_v51, %v879_v42  ;;  %v8936_v51 = vld [vmem:[%s12399_s6] sm:$0xff] }
 0x234   :  { %v1046_v41 = vpop.f32.mrf.mxu2 }
 0x235   :  { %v1060_v5 = vpop.f32.mrf.mxu3  ;;  %v1267_v9 = vpop.f32.mrf.mxu1 }
 0x236   :  { %v1295_v10 = vpop.f32.mrf.mxu0  ;;  %v1061_v27 = vadd.f32 %v1060_v5, %v1046_v41 }
 0x238   :  { %v1093_v37 = vadd.f32 %v1061_v27, %v876_v30 }
 0x23c   :  { %v1048_v45 = vpop.f32.mrf.mxu2 }
 0x23d   :  { %v1062_v8 = vpop.f32.mrf.mxu3  ;;  %v1269_v13 = vpop.f32.mrf.mxu1 }
 0x23e   :  { %v1297_v14 = vpop.f32.mrf.mxu0  ;;  %v1063_v44 = vadd.f32 %v1062_v8, %v1048_v45  ;;  %v8951_v45 = vld [vmem:[%s12399_s6 + $0x78] sm:$0xff] }
 0x23f   :  { %2025 = vmatpush.bf16.msra.mxu0 %v8951_v45 }
 0x240   :  { %v1095_v2 = vadd.f32 %v1063_v44, %v878_v61 }
 0x244   :  { %v1281_v11 = vpop.f32.mrf.mxu2 }
 0x245   :  { %v1253_v55 = vpop.f32.mrf.mxu3  ;;  %v1472_v16 = vpop.f32.mrf.mxu1  ;;  %v1296_v33 = vadd.f32 %v1295_v10, %v1281_v11 }
 0x246   :  { %v1500_v24 = vpop.f32.mrf.mxu0  ;;  %v1268_v32 = vadd.f32 %v1267_v9, %v1253_v55 }
 0x247   :  { %v1301_v50 = vadd.f32 %v1296_v33, %v1094_v36  ;;  %v8948_v36 = vld [vmem:[%s12399_s6 + $0x60] sm:$0xff] }
 0x248   :  { %v1300_v48 = vadd.f32 %v1268_v32, %v1093_v37  ;;  %v8973_v32 = vld [vmem:[%s12399_s6 + $0x128] sm:$0xff]  ;;  %v8962_v37 = vld [vmem:[%s12399_s6 + $0xd0] sm:$0xff] }
 0x24c   :  { %v1283_v60 = vpop.f32.mrf.mxu2 }
 0x24d   :  { %v1255_v15 = vpop.f32.mrf.mxu3  ;;  %v1474_v21 = vpop.f32.mrf.mxu1  ;;  %v1298_v3 = vadd.f32 %v1297_v14, %v1283_v60 }
 0x24e   :  { %v1502_v22 = vpop.f32.mrf.mxu0  ;;  %v1270_v46 = vadd.f32 %v1269_v13, %v1255_v15 }
 0x24f   :  { %v1303_v9 = vadd.f32 %v1298_v3, %v1096_v49  ;;  %v8975_v3 = vld [vmem:[%s12399_s6 + $0x138] sm:$0xff] }
 0x250   :  { %v1302_v8 = vadd.f32 %v1270_v46, %v1095_v2 }
 0x254   :  { %v1514_v18 = vpop.f32.mrf.mxu2 }
 0x255   :  { %v1486_v6 = vpop.f32.mrf.mxu3  ;;  %v1515_v40 = vadd.f32 %v1514_v18, %v1500_v24  ;;  %v1693_v38 = vpop.f32.mrf.mxu1  ;;  %v8940_v24 = vld [vmem:[%s12399_s6 + $0x20] sm:$0xff]  ;;  %v8950_v18 = vld [vmem:[%s12399_s6 + $0x70] sm:$0xff] }
 0x256   :  { %v1487_v39 = vadd.f32 %v1486_v6, %v1472_v16  ;;  %v1721_v31 = vpop.f32.mrf.mxu0  ;;  %v8945_v6 = vld [vmem:[%s12399_s6 + $0x48] sm:$0xff]  ;;  %1906 = vmatpush.bf16.msra.mxu1 %v8940_v24  ;;  %2026 = vmatpush.bf16.msra.mxu0 %v8950_v18  ;;  %v8958_v24 = vld [vmem:[%s12399_s6 + $0xb0] sm:$0xff] }
 0x257   :  { %v1520_v56 = vadd.f32 %v1515_v40, %v1301_v50  ;;  %1922 = vmatpush.bf16.msra.mxu3 %v8945_v6  ;;  %v8937_v40 = vld [vmem:[%s12399_s6 + $0x8] sm:$0xff]  ;;  %v8968_v6 = vld [vmem:[%s12399_s6 + $0x100] sm:$0xff] }
 0x258   :  { %v1519_v54 = vadd.f32 %v1487_v39, %v1300_v48  ;;  %v8972_v39 = vld [vmem:[%s12399_s6 + $0x120] sm:$0xff] }
 0x25a   :  { %1907 = vmatpush.bf16.msra.mxu1 %v8939_v23  ;;  %2027 = vmatpush.bf16.msra.mxu0 %v8949_v20 }
 0x25b   :  { %1923 = vmatpush.bf16.msra.mxu3 %v8944_v25 }
 0x25c   :  { %v1516_v1 = vpop.f32.mrf.mxu2 }
 0x25d   :  { %v1488_v28 = vpop.f32.mrf.mxu3  ;;  %v1517_v41 = vadd.f32 %v1516_v1, %v1502_v22  ;;  %v1695_v10 = vpop.f32.mrf.mxu1  ;;  %v8954_v1 = vld [vmem:[%s12399_s6 + $0x90] sm:$0xff] }
 0x25e   :  { %v1489_v4 = vadd.f32 %v1488_v28, %v1474_v21  ;;  %v1723_v55 = vpop.f32.mrf.mxu0  ;;  %2043 = vmatpush.bf16.msrb.mxu2 %v8954_v1  ;;  %1908 = vmatpush.bf16.msra.mxu1 %v8938_v35  ;;  %v8966_v35 = vld [vmem:[%s12399_s6 + $0xf0] sm:$0xff] }
 0x25f   :  { %v1522_v15 = vadd.f32 %v1517_v41, %v1303_v9  ;;  %2143 = vmatpush.bf16.msrb.mxu3 %v8963_v29  ;;  %2028 = vmatpush.bf16.msra.mxu0 %v8948_v36  ;;  %v8974_v9 = vld [vmem:[%s12399_s6 + $0x130] sm:$0xff] }
 0x260   :  { %v1521_v14 = vadd.f32 %v1489_v4, %v1302_v8  ;;  %v8964_v4 = vld [vmem:[%s12399_s6 + $0xe0] sm:$0xff] }
 0x262   :  { %2263 = vmatpush.bf16.msra.mxu2 %v8973_v32  ;;  %1909 = vmatpush.bf16.msra.mxu1 %v8937_v40 }
 0x263   :  { %2144 = vmatpush.bf16.msrb.mxu3 %v8962_v37 }
 0x266   :  { %2264 = vmatpush.bf16.msra.mxu2 %v8972_v39  ;;  %1910 = vmatpush.bf16.msra.mxu1 %v8936_v51  ;;  %v8993_v51 = vld [vmem:[%s12399_s6 + $0x1c8] sm:$0xff] }
 0x267   :  { %2145 = vmatpush.bf16.msrb.mxu3 %v8961_v47 }
 0x26a   :  { %2265 = vmatpush.bf16.msra.mxu2 %v8971_v26 }
 0x26e   :  { %2266 = vmatpush.bf16.msra.mxu2 %v8970_v58  ;;  %v8994_v58 = vld [vmem:[%s12399_s6 + $0x1d0] sm:$0xff] }
 0x270   :  { %v1707_v53 = vpop.f32.mrf.mxu2 }
 0x271   :  { %v1679_v52 = vpop.f32.mrf.mxu3  ;;  %v1722_v12 = vadd.f32 %v1721_v31, %v1707_v53  ;;  %v8946_v53 = vld [vmem:[%s12399_s6 + $0x50] sm:$0xff] }
 0x272   :  { %v1694_v57 = vadd.f32 %v1693_v38, %v1679_v52  ;;  %v8947_v38 = vld [vmem:[%s12399_s6 + $0x58] sm:$0xff] }
 0x273   :  { %v1727_v63 = vadd.f32 %v1722_v12, %v1520_v56  ;;  %2029 = vmatpush.bf16.msra.mxu0 %v8947_v38  ;;  %v8960_v12 = vld [vmem:[%s12399_s6 + $0xc0] sm:$0xff] }
 0x274   :  { %v1726_v62 = vadd.f32 %v1694_v57, %v1519_v54  ;;  %v8965_v54 = vld [vmem:[%s12399_s6 + $0xe8] sm:$0xff]  ;;  %2146 = vmatpush.bf16.msrb.mxu3 %v8960_v12  ;;  %v8984_v12 = vld [vmem:[%s12399_s6 + $0x180] sm:$0xff] }
 0x275   :  { %v6884_v7 = vmul.f32 -1.442695, %v1727_v63  ;;  %2162 = vmatpush.bf16.msrb.mxu1 %v8965_v54  ;;  %v8995_v54 = vld [vmem:[%s12399_s6 + $0x1d8] sm:$0xff] }
 0x276   :  { %v6883_v5 = vmul.f32 -1.442695, %v1726_v62 }
 0x277   :  { %2030 = vmatpush.bf16.msra.mxu0 %v8946_v53  ;;  %v8985_v53 = vld [vmem:[%s12399_s6 + $0x188] sm:$0xff] }
 0x278   :  { %9316 = vpow2.f32 %v6883_v5  ;;  %v1709_v13 = vpop.f32.mrf.mxu2  ;;  %v8959_v5 = vld [vmem:[%s12399_s6 + $0xb8] sm:$0xff] }
 0x279   :  { %9318 = vpow2.f32 %v6884_v7  ;;  %v1681_v11 = vpop.f32.mrf.mxu3  ;;  %v1724_v16 = vadd.f32 %v1723_v55, %v1709_v13  ;;  %v8969_v7 = vld [vmem:[%s12399_s6 + $0x108] sm:$0xff]  ;;  %2163 = vmatpush.bf16.msrb.mxu1 %v8964_v4  ;;  %2147 = vmatpush.bf16.msrb.mxu3 %v8959_v5 }
 0x27a   :  { %v1696_v60 = vadd.f32 %v1695_v10, %v1681_v11  ;;  %2267 = vmatpush.bf16.msra.mxu2 %v8969_v7 }
 0x27b   :  { %v1729_v22 = vadd.f32 %v1724_v16, %v1522_v15  ;;  %2282 = vmatpush.bf16.msrb.mxu0 %v8975_v3 }
 0x27c   :  { %v1728_v21 = vadd.f32 %v1696_v60, %v1521_v14 }
 0x27d   :  { %v6886_v30 = vmul.f32 -1.442695, %v1729_v22  ;;  %2148 = vmatpush.bf16.msrb.mxu3 %v8958_v24  ;;  %v9001_v24 = vld [vmem:[%s12399_s6 + $0x208] sm:$0xff] }
 0x27e   :  { %v9317_v17 = vpop.eup %9316  ;;  %v6885_v28 = vmul.f32 -1.442695, %v1728_v21  ;;  %2268 = vmatpush.bf16.msra.mxu2 %v8968_v6  ;;  %v9011_v6 = vld [vmem:[%s12399_s6 + $0x258] sm:$0xff] }
 0x27f   :  { %v9319_v0 = vpop.eup %9318  ;;  %v10595_v27 = vadd.f32 1.0, %v9317_v17  ;;  %2283 = vmatpush.bf16.msrb.mxu0 %v8974_v9  ;;  %v8957_v17 = vld [vmem:[%s12399_s6 + $0xa8] sm:$0xff] }
 0x280   :  { %v10600_v33 = vadd.f32 1.0, %v9319_v0  ;;  %9320 = vpow2.f32 %v6885_v28  ;;  %v8967_v28 = vld [vmem:[%s12399_s6 + $0xf8] sm:$0xff] }
 0x281   :  { %9322 = vrcp.f32 %v10595_v27  ;;  %v1755_v59 = vand.u32 2147483647, %v10595_v27  ;;  %v1757_v61 = vand.u32 2147483648, %v10595_v27  ;;  %vm1751_vm14 = vweird.f32 %v10595_v27  ;;  %2149 = vmatpush.bf16.msrb.mxu3 %v8957_v17 }
 0x282   :  { %9324 = vrcp.f32 %v10600_v33  ;;  %v1772_v63 = vand.u32 2147483648, %v10600_v33  ;;  %v1770_v2 = vand.u32 2147483647, %v10600_v33  ;;  %vm1766_vm1 = vweird.f32 %v10600_v33  ;;  %2269 = vmatpush.bf16.msra.mxu2 %v8967_v28  ;;  %v9010_v28 = vld [vmem:[%s12399_s6 + $0x250] sm:$0xff] }
 0x283   :  { %9326 = vpow2.f32 %v6886_v30  ;;  %v1758_v45 = vor.u32 1.1754944e-38, %v1757_v61  ;;  %vm1756_vm2 = vcmp.eq.f32.partialorder %v1755_v59, 8.507059e+37  ;;  %v8981_v59 = vld [vmem:[%s12399_s6 + $0x168] sm:$0xff]  ;;  %v8991_v61 = vld [vmem:[%s12399_s6 + $0x1b8] sm:$0xff] }
 0x284   :  { %v1773_v55 = vor.u32 1.1754944e-38, %v1772_v63  ;;  %vm1771_vm5 = vcmp.eq.f32.partialorder %v1770_v2, 8.507059e+37  ;;  %v8990_v63 = vld [vmem:[%s12399_s6 + $0x1b0] sm:$0xff] }
 0x286   :  { %v9321_v31 = vpop.eup %9320  ;;  %2270 = vmatpush.bf16.msra.mxu2 %v8966_v35 }
 0x287   :  { %v9323_v34 = vpop.eup %9322  ;;  %v10628_v48 = vadd.f32 1.0, %v9321_v31 }
 0x288   :  { %v9325_v50 = vpop.eup %9324  ;;  %v1747_v42 = vmul.f32 %v9323_v34, %v10595_v27  ;;  %vm1752_vm12 = vweird.f32 %v9323_v34 }
 0x289   :  { %v9327_v44 = vpop.eup %9326  ;;  %v1762_v52 = vmul.f32 %v9325_v50, %v10600_v33  ;;  %9328 = vrcp.f32 %v10628_v48  ;;  %vm1767_vm13 = vweird.f32 %v9325_v50  ;;  %vm1753_vm15 = vmor %vm1751_vm14, %vm1752_vm12  ;;  %v1787_v18 = vand.u32 2147483648, %v10628_v48  ;;  %v8956_v33 = vld [vmem:[%s12399_s6 + $0xa0] sm:$0xff] }
 0x28a   :  { %v1748_v56 = vsub.f32 1.0, %v1747_v42  ;;  %v10642_v57 = vadd.f32 1.0, %v9327_v44  ;;  %vm1768_vm9 = vmor %vm1766_vm1, %vm1767_vm13  ;;  %v1785_v22 = vand.u32 2147483647, %v10628_v48  ;;  %vm1781_vm4 = vweird.f32 %v10628_v48  ;;  %v8983_v42 = vld [vmem:[%s12399_s6 + $0x178] sm:$0xff]  ;;  %2150 = vmatpush.bf16.msrb.mxu3 %v8956_v33  ;;  %v9004_v33 = vld [vmem:[%s12399_s6 + $0x220] sm:$0xff] }
 0x28b   :  { %v1763_v46 = vsub.f32 1.0, %v1762_v52  ;;  %v1788_v1 = vor.u32 1.1754944e-38, %v1787_v18  ;;  %vm12409_vm1 = vcmask 254976  }
 0x28c   :  { %v1749_v62 = vmul.f32 %v9323_v34, %v1748_v56  ;;  %9330 = vrcp.f32 %v10642_v57  ;;  %v1802_v20 = vand.u32 2147483648, %v10642_v57  ;;  %v1800_v0 = vand.u32 2147483647, %v10642_v57  ;;  %v8982_v56 = vld [vmem:[%s12399_s6 + $0x170] sm:$0xff] }
 0x28d   :  { %v1764_v49 = vmul.f32 %v9325_v50, %v1763_v46  ;;  %vm1786_vm14 = vcmp.eq.f32.partialorder %v1785_v22, 8.507059e+37  ;;  %v8986_v22 = vld [vmem:[%s12399_s6 + $0x190] sm:$0xff] }
 0x28e   :  { %v1750_v41 = vadd.f32 %v9323_v34, %v1749_v62  ;;  %v1803_v36 = vor.u32 1.1754944e-38, %v1802_v20  ;;  %v8980_v62 = vld [vmem:[%s12399_s6 + $0x160] sm:$0xff] }
 0x28f   :  { %v9329_v43 = vpop.eup %9328  ;;  %v1765_v8 = vadd.f32 %v9325_v50, %v1764_v49 }
 0x290   :  { %v1754_v10 = vsel %vm1753_vm15, %v9323_v34, %v1750_v41  ;;  %v1777_v11 = vmul.f32 %v9329_v43, %v10628_v48  ;;  %vm1782_vm10 = vweird.f32 %v9329_v43  ;;  %vm1796_vm15 = vweird.f32 %v10642_v57 }
 0x291   :  { %v1759_v13 = vsel %vm1756_vm2, %v1758_v45, %v1754_v10  ;;  %v1769_v14 = vsel %vm1768_vm9, %v9325_v50, %v1765_v8  ;;  %vm1783_vm12 = vmor %vm1781_vm4, %vm1782_vm10  ;;  %vm1801_vm9 = vcmp.eq.f32.partialorder %v1800_v0, 8.507059e+37  ;;  %v8989_v45 = vld [vmem:[%s12399_s6 + $0x1a8] sm:$0xff]  ;;  %v9003_v10 = vld [vmem:[%s12399_s6 + $0x218] sm:$0xff]  ;;  %vm12408_vm10 = vcmask 1041408  }
 0x292   :  { %v9331_v15 = vpop.eup %9330  ;;  %1806 = vst [vmem:[#allocation3] sm:$0xff] %v1759_v13  ;;  %v1774_v60 = vsel %vm1771_vm5, %v1773_v55, %v1769_v14  ;;  %v1778_v16 = vsub.f32 1.0, %v1777_v11  ;;  %v9013_v55 = vld [vmem:[%s12399_s6 + $0x268] sm:$0xff]  ;;  %v8978_v11 = vld [vmem:[%s12399_s6 + $0x150] sm:$0xff]  ;;  %v8988_v13 = vld [vmem:[%s12399_s6 + $0x1a0] sm:$0xff]  ;;  %vm12407_vm5 = vcmask 982016  }
 0x293   :  { %1807 = vst.msk [vmem:[#allocation3 + $0x8] sm:$0xff] %vm74_vm0, %v1774_v60  ;;  %v1792_v19 = vmul.f32 %v9331_v15, %v10642_v57  ;;  %vm1797_vm13 = vweird.f32 %v9331_v15  ;;  %v8992_v57 = vld [vmem:[%s12399_s6 + $0x1c0] sm:$0xff]  ;;  %v9002_v14 = vld [vmem:[%s12399_s6 + $0x210] sm:$0xff]  ;;  %v8977_v60 = vld [vmem:[%s12399_s6 + $0x148] sm:$0xff]  ;;  %vm12406_vm4 = vcmask 687104  }
 0x294   :  { %v1779_v21 = vmul.f32 %v9329_v43, %v1778_v16  ;;  %vm1798_vm2 = vmor %vm1796_vm15, %vm1797_vm13  ;;  %v8987_v16 = vld [vmem:[%s12399_s6 + $0x198] sm:$0xff] }
 0x295   :  { %v1793_v23 = vsub.f32 1.0, %v1792_v19 }
 0x296   :  { %v1780_v25 = vadd.f32 %v9329_v43, %v1779_v21  ;;  %v8976_v21 = vld [vmem:[%s12399_s6 + $0x140] sm:$0xff] }
 0x297   :  { %v1794_v29 = vmul.f32 %v9331_v15, %v1793_v23  ;;  %v9000_v23 = vld [vmem:[%s12399_s6 + $0x200] sm:$0xff] }
 0x298   :  { %v1784_v27 = vsel %vm1783_vm12, %v9329_v43, %v1780_v25  ;;  %v8979_v43 = vld [vmem:[%s12399_s6 + $0x158] sm:$0xff]  ;;  %v9005_v25 = vld [vmem:[%s12399_s6 + $0x228] sm:$0xff] }
 0x299   :  { %v1789_v30 = vsel %vm1786_vm14, %v1788_v1, %v1784_v27  ;;  %v1795_v32 = vadd.f32 %v9331_v15, %v1794_v29  ;;  %v9015_v1 = vld [vmem:[%s12399_s6 + $0x278] sm:$0xff] }
 0x29a   :  { %1808 = vst [vmem:[#allocation3 + $0x10] sm:$0x3] %v1789_v30  ;;  %v1812_v37 = vld [vmem:[#allocation3] ss:$8 sm:$0x3] }
 0x29b   :  { %v1799_v39 = vsel %vm1798_vm2, %v9331_v15, %v1795_v32  ;;  %v1814_v40 = vperm.slane %v1812_v37, 0  ;;  %v1815_v38 = vperm.slane %v1812_v37, 1  ;;  %v1931_v31 = vld [vmem:[#allocation3 + $0x1] ss:$8 sm:$0x3]  ;;  %v8999_v32 = vld [vmem:[%s12399_s6 + $0x1f8] sm:$0xff] }
 0x29c   :  { %v1804_v47 = vsel %vm1801_vm9, %v1803_v36, %v1799_v39  ;;  %v1933_v26 = vperm.slane %v1931_v31, 0  ;;  %v1934_v34 = vperm.slane %v1931_v31, 1  ;;  %v2051_v46 = vld [vmem:[#allocation3 + $0x2] ss:$8 sm:$0x3]  ;;  %v9014_v39 = vld [vmem:[%s12399_s6 + $0x270] sm:$0xff] }
 0x29d   :  { %1810 = vst.msk [vmem:[#allocation3 + $0x18] sm:$0x3] %vm12409_vm1, %v1804_v47  ;;  %v1818_v48 = vpack.c.bf16 %v1814_v40, %v1814_v40  ;;  %v1819_v50 = vpack.c.bf16 %v1815_v38, %v1815_v38  ;;  %v2171_v3 = vld [vmem:[#allocation3 + $0x3] ss:$8 sm:$0x3]  ;;  %v2053_v49 = vperm.slane %v2051_v46, 0 }
 0x29e   :  { %v1937_v44 = vpack.c.bf16 %v1933_v26, %v1933_v26  ;;  %v1938_v52 = vpack.c.bf16 %v1934_v34, %v1934_v34  ;;  %v2054_v2 = vperm.slane %v2051_v46, 1  ;;  %v2173_v4 = vperm.slane %v2171_v3, 0  ;;  %v9012_v15 = vld [vmem:[%s12399_s6 + $0x260] sm:$0xff]  ;;  %v9009_v37 = vld [vmem:[%s12399_s6 + $0x248] sm:$0xff]  ;;  %v9023_v40 = vld [vmem:[%s12399_s6 + $0x2b8] sm:$0xff] }
 0x29f   :  { %1911 = vmatmul.bf16.vlgmr.msra.gmra.mxu1 %v1818_v48  ;;  %6927 = vmatmul.msk.bf16.vlgmr.msra.gmra.mxu3 %vm74_vm0, %v1819_v50  ;;  %v2174_v41 = vperm.slane %v2171_v3, 1  ;;  %v2057_v5 = vpack.c.bf16 %v2053_v49, %v2053_v49  ;;  %v2291_v18 = vld [vmem:[#allocation3 + $0x4] ss:$8 sm:$0x3]  ;;  %v8998_v31 = vld [vmem:[%s12399_s6 + $0x1f0] sm:$0xff]  ;;  %v9007_v50 = vld [vmem:[%s12399_s6 + $0x238] sm:$0xff] }
 0x2a0   :  { %2031 = vmatmul.bf16.vlgmr.msra.gmra.mxu0 %v1937_v44  ;;  %6988 = vmatmul.msk.bf16.vlgmr.msrb.gmra.mxu2 %vm74_vm0, %v1938_v52  ;;  %v2058_v7 = vpack.c.bf16 %v2054_v2, %v2054_v2  ;;  %v2177_v8 = vpack.c.bf16 %v2173_v4, %v2173_v4  ;;  %v2411_v19 = vld [vmem:[#allocation3 + $0x5] ss:$8 sm:$0x3]  ;;  %v2293_v20 = vperm.slane %v2291_v18, 0  ;;  %v2294_v17 = vperm.slane %v2291_v18, 1  ;;  %v9022_v26 = vld [vmem:[%s12399_s6 + $0x2b0] sm:$0xff] }
 0x2a1   :  { %2383 = vmatpush.bf16.msra.mxu1 %v8983_v42  ;;  %2503 = vmatpush.bf16.msra.mxu0 %v8993_v51  ;;  %v2178_v9 = vpack.c.bf16 %v2174_v41, %v2174_v41  ;;  %v2413_v29 = vperm.slane %v2411_v19, 0  ;;  %v2414_v0 = vperm.slane %v2411_v19, 1  ;;  %v9033_v38 = vld [vmem:[%s12399_s6 + $0x308] sm:$0xff]  ;;  %v9008_v47 = vld [vmem:[%s12399_s6 + $0x240] sm:$0xff]  ;;  %v9031_v51 = vld [vmem:[%s12399_s6 + $0x2f8] sm:$0xff] }
 0x2a2   :  { %2402 = vmatpush.bf16.msra.mxu3 %v8985_v53  ;;  %2522 = vmatpush.bf16.msrb.mxu2 %v8995_v54  ;;  %v2297_v27 = vpack.c.bf16 %v2293_v20, %v2293_v20  ;;  %v2298_v30 = vpack.c.bf16 %v2294_v17, %v2294_v17  ;;  %v9032_v34 = vld [vmem:[%s12399_s6 + $0x300] sm:$0xff]  ;;  %v8997_v48 = vld [vmem:[%s12399_s6 + $0x1e8] sm:$0xff]  ;;  %v9006_v54 = vld [vmem:[%s12399_s6 + $0x230] sm:$0xff] }
 0x2a3   :  { %v2417_v35 = vpack.c.bf16 %v2413_v29, %v2413_v29  ;;  %v2418_v36 = vpack.c.bf16 %v2414_v0, %v2414_v0  ;;  %v9021_v42 = vld [vmem:[%s12399_s6 + $0x2a8] sm:$0xff]  ;;  %v8996_v53 = vld [vmem:[%s12399_s6 + $0x1e0] sm:$0xff]  ;;  %v9019_v41 = vld [vmem:[%s12399_s6 + $0x298] sm:$0xff] }
 0x2a4   :  { %v2531_v44 = vld [vmem:[#allocation3 + $0x6] ss:$8 sm:$0x3]  ;;  %v2651_v52 = vld [vmem:[#allocation3 + $0x7] ss:$8 sm:$0x3] }
 0x2a5   :  { %2384 = vmatpush.bf16.msra.mxu1 %v8982_v56  ;;  %2504 = vmatpush.bf16.msra.mxu0 %v8992_v57  ;;  %v2533_v56 = vperm.slane %v2531_v44, 0  ;;  %v2534_v57 = vperm.slane %v2531_v44, 1  ;;  %v2654_v46 = vperm.slane %v2651_v52, 1  ;;  %v9024_v49 = vld [vmem:[%s12399_s6 + $0x2c0] sm:$0xff] }
 0x2a6   :  { %2403 = vmatpush.bf16.msra.mxu3 %v8984_v12  ;;  %2523 = vmatpush.bf16.msrb.mxu2 %v8994_v58  ;;  %v9025_v12 = vld [vmem:[%s12399_s6 + $0x2c8] sm:$0xff]  ;;  %v9020_v58 = vld [vmem:[%s12399_s6 + $0x2a0] sm:$0xff] }
 0x2a7   :  { %v2537_v3 = vpack.c.bf16 %v2533_v56, %v2533_v56  ;;  %v2658_v4 = vpack.c.bf16 %v2654_v46, %v2654_v46  ;;  %v9051_v46 = vld [vmem:[%s12394_s1 + $0x14] sm:$0xf0] }
 0x2a9   :  { %2385 = vmatpush.bf16.msra.mxu1 %v8981_v59  ;;  %2505 = vmatpush.bf16.msra.mxu0 %v8991_v61  ;;  %v9030_v59 = vld [vmem:[%s12399_s6 + $0x2f0] sm:$0xff]  ;;  %v2653_v61 = vperm.slane %v2651_v52, 0 }
 0x2aa   :  { %v9038_v52 = vld [vmem:[%s12401_s8 + $0x10] sm:$0xff] }
 0x2ab   :  { %v2657_v2 = vpack.c.bf16 %v2653_v61, %v2653_v61  ;;  %v7541_v61 = vld [vmem:[%s12394_s1 + $0x10] sm:$0xf] }
 0x2ad   :  { %2386 = vmatpush.bf16.msra.mxu1 %v8980_v62  ;;  %2506 = vmatpush.bf16.msra.mxu0 %v8990_v63  ;;  %v2538_v62 = vpack.c.bf16 %v2534_v57, %v2534_v57  ;;  %v9035_v63 = vld [vmem:[%s12399_s6 + $0x318] sm:$0xff]  ;;  %v9037_v57 = vld [vmem:[%s12401_s8 + $0x8] sm:$0xff] }
 0x2af   :  { %2151 = vmatmul.bf16.vlgmr.msrb.gmra.mxu3 %v2057_v5  ;;  %7049 = vmatmul.msk.bf16.vlgmr.msrb.gmra.mxu1 %vm74_vm0, %v2058_v7  ;;  %v9029_v5 = vld [vmem:[%s12399_s6 + $0x2e8] sm:$0xff]  ;;  %v9034_v7 = vld [vmem:[%s12399_s6 + $0x310] sm:$0xff] }
 0x2b0   :  { %2271 = vmatmul.bf16.vlgmr.msra.gmra.mxu2 %v2177_v8  ;;  %7110 = vmatmul.msk.bf16.vlgmr.msrb.gmra.mxu0 %vm74_vm0, %v2178_v9  ;;  %v9017_v8 = vld [vmem:[%s12399_s6 + $0x288] sm:$0xff]  ;;  %v9027_v9 = vld [vmem:[%s12399_s6 + $0x2d8] sm:$0xff] }
 0x2b1   :  { %2387 = vmatpush.bf16.msra.mxu1 %v8979_v43  ;;  %2507 = vmatpush.bf16.msra.mxu0 %v8989_v45  ;;  %v9018_v43 = vld [vmem:[%s12399_s6 + $0x290] sm:$0xff]  ;;  %v9028_v45 = vld [vmem:[%s12399_s6 + $0x2e0] sm:$0xff] }
 0x2b2   :  { %2623 = vmatpush.bf16.msrb.mxu3 %v9003_v10  ;;  %2743 = vmatpush.bf16.msra.mxu2 %v9013_v55  ;;  %v2771_v10 = vld [vmem:[#allocation3 + $0x10] ss:$8 sm:$0x3]  ;;  %v2891_v55 = vld [vmem:[#allocation3 + $0x11] ss:$8 sm:$0x3] }
 0x2b5   :  { %2388 = vmatpush.bf16.msra.mxu1 %v8978_v11  ;;  %2508 = vmatpush.bf16.msra.mxu0 %v8988_v13  ;;  %v2774_v11 = vperm.slane %v2771_v10, 1  ;;  %v9016_v13 = vld [vmem:[%s12399_s6 + $0x280] sm:$0xff] }
 0x2b6   :  { %2624 = vmatpush.bf16.msrb.mxu3 %v9002_v14  ;;  %2744 = vmatpush.bf16.msra.mxu2 %v9012_v15  ;;  %v9026_v14 = vld [vmem:[%s12399_s6 + $0x2d0] sm:$0xff]  ;;  %v2894_v15 = vperm.slane %v2891_v55, 1 }
 0x2b9   :  { %2389 = vmatpush.bf16.msra.mxu1 %v8977_v60  ;;  %2509 = vmatpush.bf16.msra.mxu0 %v8987_v16  ;;  %v2773_v60 = vperm.slane %v2771_v10, 0  ;;  %v2893_v16 = vperm.slane %v2891_v55, 0 }
 0x2ba   :  { %2625 = vmatpush.bf16.msrb.mxu3 %v9001_v24  ;;  %2745 = vmatpush.bf16.msra.mxu2 %v9011_v6  ;;  %v2778_v24 = vpack.c.bf16 %v2774_v11, %v2774_v11  ;;  %v2898_v6 = vpack.c.bf16 %v2894_v15, %v2894_v15  ;;  %v9053_v15 = vld [vmem:[%s12394_s1 + $0x24] sm:$0xf0] }
 0x2bb   :  { %v2777_v18 = vpack.c.bf16 %v2773_v60, %v2773_v60  ;;  %v2897_v19 = vpack.c.bf16 %v2893_v16, %v2893_v16  ;;  %v7589_v60 = vld [vmem:[%s12394_s1 + $0x40] sm:$0xf]  ;;  %v9057_v16 = vld [vmem:[%s12394_s1 + $0x44] sm:$0xf0] }
 0x2bd   :  { %2390 = vmatpush.bf16.msra.mxu1 %v8976_v21  ;;  %2510 = vmatpush.bf16.msra.mxu0 %v8986_v22 }
 0x2be   :  { %2626 = vmatpush.bf16.msrb.mxu3 %v9000_v23  ;;  %2746 = vmatpush.bf16.msra.mxu2 %v9010_v28 }
 0x2bf   :  { %7171 = vmatmul.msk.bf16.vlgmr.msra.gmra.mxu3 %vm74_vm0, %v2298_v30 }
 0x2c0   :  { %2391 = vmatmul.bf16.vlgmr.msra.gmra.mxu1 %v2297_v27  ;;  %2511 = vmatmul.bf16.vlgmr.msra.gmra.mxu0 %v2417_v35  ;;  %v3025_v27 = vld [vmem:[%s12401_s8 + $0x38] sm:$0xf] }
 0x2c1   :  { %2642 = vmatpush.bf16.msrb.mxu1 %v9005_v25  ;;  %2762 = vmatpush.bf16.msrb.mxu0 %v9015_v1  ;;  %v3056_v30 = vunpack.c.l.b16 %v3025_v27 }
 0x2c2   :  { %7232 = vmatmul.msk.bf16.vlgmr.msrb.gmra.mxu2 %vm74_vm0, %v2418_v36  ;;  %2627 = vmatpush.bf16.msrb.mxu3 %v8999_v32 }
 0x2c3   :  { %2747 = vmatpush.bf16.msra.mxu2 %v9009_v37 }
 0x2c5   :  { %2643 = vmatpush.bf16.msrb.mxu1 %v9004_v33  ;;  %2763 = vmatpush.bf16.msrb.mxu0 %v9014_v39  ;;  %v3064_v33 = vpack.c.b16 %v3056_v30, %v3056_v30 }
 0x2c6   :  { %2628 = vmatpush.bf16.msrb.mxu3 %v8998_v31 }
 0x2c7   :  { %2748 = vmatpush.bf16.msra.mxu2 %v9008_v47  ;;  %v3077_v37 = vsel %vm808_vm7, %v3064_v33, 0 }
 0x2c9   :  { %2863 = vmatpush.bf16.msra.mxu1 %v9023_v40  ;;  %2983 = vmatpush.bf16.msra.mxu0 %v9033_v38  ;;  %v9042_v40 = vld [vmem:[%s12401_s8 + $0x30] sm:$0xff]  ;;  %v9041_v38 = vld [vmem:[%s12401_s8 + $0x28] sm:$0xff] }
 0x2ca   :  { %2629 = vmatpush.bf16.msrb.mxu3 %v8997_v48 }
 0x2cb   :  { %2749 = vmatpush.bf16.msra.mxu2 %v9007_v50  ;;  %v9039_v50 = vld [vmem:[%s12401_s8 + $0x18] sm:$0xff] }
 0x2cd   :  { %2864 = vmatpush.bf16.msra.mxu1 %v9022_v26  ;;  %2984 = vmatpush.bf16.msra.mxu0 %v9032_v34  ;;  %v9040_v34 = vld [vmem:[%s12401_s8 + $0x20] sm:$0xff] }
 0x2ce   :  { %2630 = vmatpush.bf16.msrb.mxu3 %v8996_v53 }
 0x2cf   :  { %2750 = vmatpush.bf16.msra.mxu2 %v9006_v54 }
 0x2d0   :  { %7293 = vmatmul.msk.bf16.vlgmr.msrb.gmra.mxu1 %vm74_vm0, %v2538_v62  ;;  %7354 = vmatmul.msk.bf16.vlgmr.msrb.gmra.mxu0 %vm74_vm0, %v2658_v4  ;;  %v7542_v62 = vor.u32 %v9051_v46, %v7541_v61 }
 0x2d1   :  { %2865 = vmatpush.bf16.msra.mxu1 %v9021_v42  ;;  %2985 = vmatpush.bf16.msra.mxu0 %v9031_v51 }
 0x2d2   :  { %2882 = vmatpush.bf16.msra.mxu3 %v9025_v12  ;;  %2751 = vmatmul.bf16.vlgmr.msra.gmra.mxu2 %v2657_v2  ;;  %v1811_v12 = vld [vmem:[%s12400_s7] sm:$0x1] }
 0x2d3   :  { %2631 = vmatmul.bf16.vlgmr.msrb.gmra.mxu3 %v2537_v3  ;;  %3002 = vmatpush.bf16.msrb.mxu2 %v9035_v63  ;;  %v7533_v63 = vld [vmem:[%s12394_s1] sm:$0xf] }
 0x2d5   :  { %2866 = vmatpush.bf16.msra.mxu1 %v9020_v58  ;;  %2986 = vmatpush.bf16.msra.mxu0 %v9030_v59  ;;  %v9036_v59 = vld [vmem:[%s12401_s8] sm:$0xff] }
 0x2d6   :  { %2883 = vmatpush.bf16.msra.mxu3 %v9024_v49  ;;  %v9049_v49 = vld [vmem:[%s12394_s1 + $0x4] sm:$0xf0] }
 0x2d7   :  { %3003 = vmatpush.bf16.msrb.mxu2 %v9034_v7  ;;  %v7569_v7 = vld [vmem:[%s12394_s1 + $0x30] sm:$0xf] }
 0x2d9   :  { %2867 = vmatpush.bf16.msra.mxu1 %v9019_v41  ;;  %2987 = vmatpush.bf16.msra.mxu0 %v9029_v5  ;;  %v7527_v41 = vld [vmem:[%s12393_s0 + $0x20] sm:$0xff]  ;;  %v7528_v5 = vld [vmem:[%s12393_s0 + $0x28] sm:$0xff] }
 0x2da   :  { %3079 = vmatpush.bf16.msrb.mxu3 %v3077_v37 }
 0x2db   :  { %3205 = vmatpush.bf16.msra.mxu2 %v7542_v62  ;;  %v9061_v62 = vld [vmem:[%s12394_s1 + $0x64] sm:$0xf0] }
 0x2dd   :  { %2868 = vmatpush.bf16.msra.mxu1 %v9018_v43  ;;  %2988 = vmatpush.bf16.msra.mxu0 %v9028_v45  ;;  %v7534_v43 = vor.u32 %v9049_v49, %v7533_v63  ;;  %v9055_v45 = vld [vmem:[%s12394_s1 + $0x34] sm:$0xf0]  ;;  %v7645_v63 = vld [vmem:[%s12394_s1 + $0x80] sm:$0xf] }
 0x2de   :  { %3080 = vmatpush.bf16.msrb.mxu3 %v9042_v40  ;;  %v7570_v11 = vor.u32 %v9055_v45, %v7569_v7  ;;  %v7579_v49 = vld [vmem:[%s12393_s0 + $0x22] sm:$0xff] }
 0x2df   :  { %3206 = vmatpush.bf16.msra.mxu2 %v7534_v43  ;;  %v7551_v43 = vld [vmem:[%s12393_s0 + $0x21] sm:$0xff]  ;;  %v7552_v45 = vld [vmem:[%s12393_s0 + $0x29] sm:$0xff] }
 0x2e1   :  { %2869 = vmatpush.bf16.msra.mxu1 %v9017_v8  ;;  %2989 = vmatpush.bf16.msra.mxu0 %v9027_v9  ;;  %v7597_v8 = vld [vmem:[%s12394_s1 + $0x50] sm:$0xf]  ;;  %v9059_v9 = vld [vmem:[%s12394_s1 + $0x54] sm:$0xf0] }
 0x2e2   :  { %7476 = vmatmul.msk.bf16.vlgmr.msrb.gmra.mxu2 %vm74_vm0, %v2898_v6  ;;  %3081 = vmatpush.bf16.msrb.mxu3 %v9041_v38  ;;  %v10966_v6 = vpack.c.bf16 %v7528_v5, %v7527_v41 }
 0x2e3   :  { %7415 = vmatmul.msk.bf16.vlgmr.msra.gmra.mxu3 %vm74_vm0, %v2778_v24 }
 0x2e5   :  { %2870 = vmatpush.bf16.msra.mxu1 %v9016_v13  ;;  %2990 = vmatpush.bf16.msra.mxu0 %v9026_v14  ;;  %v7598_v13 = vor.u32 %v9059_v9, %v7597_v8  ;;  %v7561_v14 = vld [vmem:[%s12394_s1 + $0x20] sm:$0xf]  ;;  %v11023_v8 = vpack.c.bf16 %v7552_v45, %v7551_v43  ;;  %v7581_v9 = vld [vmem:[%s12393_s0 + $0x32] sm:$0xff]  ;;  %v9060_v43 = vld [vmem:[%s12394_s1 + $0x64] sm:$0xf] }
 0x2e6   :  { %3082 = vmatpush.bf16.msrb.mxu3 %v9040_v34  ;;  %v7619_v45 = vld [vmem:[%s12394_s1 + $0x68] sm:$0xf0] }
 0x2e7   :  { %3374 = vmatpush.bf16.msrb.mxu2 %v7598_v13  ;;  %v7554_v13 = vld [vmem:[%s12393_s0 + $0x39] sm:$0xf] }
 0x2e8   :  { %2871 = vmatmul.bf16.vlgmr.msra.gmra.mxu1 %v2777_v18  ;;  %2991 = vmatmul.bf16.vlgmr.msra.gmra.mxu0 %v2897_v19  ;;  %v7562_v18 = vor.u32 %v9053_v15, %v7561_v14  ;;  %v9050_v15 = vld [vmem:[%s12394_s1 + $0x14] sm:$0xf] }
 0x2ea   :  { %3083 = vmatpush.bf16.msrb.mxu3 %v9039_v50 }
 0x2ee   :  { %3084 = vmatpush.bf16.msrb.mxu3 %v9038_v52 }
 0x2f2   :  { %3085 = vmatpush.bf16.msrb.mxu3 %v9037_v57  ;;  %7547 = vmatmul.msk.bf16.vlgmr.msra.gmra.mxu2 %vm74_vm0, %v10966_v6  ;;  %v7625_v57 = vld [vmem:[%s12394_s1 + $0x70] sm:$0xf] }
 0x2f6   :  { %3086 = vmatpush.bf16.msrb.mxu3 %v9036_v59  ;;  %v9067_v59 = vld [vmem:[%s12394_s1 + $0x94] sm:$0xf0] }
 0x2fa   :  { %3292 = vmatpush.bf16.msra.mxu3 %v7570_v11  ;;  %v7553_v11 = vld [vmem:[%s12393_s0 + $0x31] sm:$0xff] }
 0x2fb   :  { %v11043_v14 = vpack.c.bf16 %v7554_v13, %v7553_v11 }
 0x2fe   :  { %3293 = vmatpush.bf16.msra.mxu3 %v7562_v18 }
 0x31c   :  { %v1912_v21 = vpop.f32.mrf.mxu1 }
 0x31d   :  { %v2032_v22 = vpop.f32.mrf.mxu0 }
 0x322   :  { %v1925_v23 = vpop.f32.mrf.mxu3 }
 0x323   :  { %v2045_v25 = vpop.f32.mrf.mxu2  ;;  %v1926_v54 = vadd.f32 %v1925_v23, %v1912_v21  ;;  %v7590_v23 = vor.u32 %v9057_v16, %v7589_v60  ;;  %v7543_v60 = vld [vmem:[%s12394_s1 + $0x18] sm:$0xf0]  ;;  %v9048_v16 = vld [vmem:[%s12394_s1 + $0x4] sm:$0xf] }
 0x324   :  { %v1914_v20 = vpop.f32.mrf.mxu1  ;;  %v2046_v10 = vadd.f32 %v2045_v25, %v2032_v22  ;;  %v7546_v18 = vor.u32 %v9050_v15, %v7543_v60 }
 0x325   :  { %v2034_v17 = vpop.f32.mrf.mxu0  ;;  %v1929_v2 = vadd.f32 %v1926_v54, %v1811_v12  ;;  %3375 = vmatpush.bf16.msrb.mxu2 %v7590_v23  ;;  %v9063_v12 = vld [vmem:[%s12394_s1 + $0x74] sm:$0xf0] }
 0x326   :  { %v7626_v61 = vor.u32 %v9063_v12, %v7625_v57  ;;  %3224 = vmatpush.bf16.msrb.mxu0 %v7546_v18 }
 0x327   :  { %v2049_v24 = vadd.f32 %v2046_v10, %v1929_v2  ;;  %v7580_v2 = vld [vmem:[%s12393_s0 + $0x2a] sm:$0xff]  ;;  %v7582_v10 = vld [vmem:[%s12393_s0 + $0x3a] sm:$0xf] }
 0x328   :  { %v11013_v7 = vpack.c.bf16 %v7580_v2, %v7579_v49  ;;  %v9064_v49 = vld [vmem:[%s12394_s1 + $0x84] sm:$0xf] }
 0x32a   :  { %v1927_v28 = vpop.f32.mrf.mxu3 }
 0x32b   :  { %v2047_v1 = vpop.f32.mrf.mxu2 }
 0x32c   :  { %v2165_v29 = vpop.f32.mrf.mxu1 }
 0x32d   :  { %v10892_v0 = vpop.f32.mrf.mxu0 }
 0x332   :  { %v2152_v32 = vpop.f32.mrf.mxu3 }
 0x333   :  { %v10897_v35 = vpop.f32.mrf.mxu2  ;;  %v2166_v55 = vadd.f32 %v2165_v29, %v2152_v32 }
 0x334   :  { %v2167_v36 = vpop.f32.mrf.mxu1  ;;  %v2286_v20 = vadd.f32 %v10892_v0, %v10897_v35  ;;  %v7529_v0 = vld [vmem:[%s12393_s0 + $0x30] sm:$0xff]  ;;  %v7530_v35 = vld [vmem:[%s12393_s0 + $0x38] sm:$0xf] }
 0x335   :  { %v2287_v39 = vpop.f32.mrf.mxu0  ;;  %v2169_v21 = vadd.f32 %v2166_v55, %v2049_v24  ;;  %v11033_v55 = vpack.c.bf16 %v7582_v10, %v7581_v9  ;;  %v7535_v24 = vld [vmem:[%s12394_s1 + $0x8] sm:$0xf0] }
 0x337   :  { %v2289_v1 = vadd.f32 %v2286_v20, %v2169_v21  ;;  %v7635_v21 = vld [vmem:[%s12393_s0 + $0x24] sm:$0xff] }
 0x33a   :  { %v2154_v31 = vpop.f32.mrf.mxu3 }
 0x33b   :  { %v2274_v47 = vpop.f32.mrf.mxu2  ;;  %v10978_v31 = vpack.c.bf16 %v7530_v35, %v7529_v0  ;;  %v7609_v0 = vld [vmem:[%s12393_s0 + $0x33] sm:$0xff]  ;;  %v7610_v35 = vld [vmem:[%s12393_s0 + $0x3b] sm:$0xf] }
 0x33d   :  { %v2392_v26 = vpop.f32.mrf.mxu1  ;;  %v2512_v48 = vpop.f32.mrf.mxu0  ;;  %7548 = vmatmul.msk.bf16.gmra.mxu2 %vm74_vm0, %v10978_v31 }
 0x342   :  { %v2405_v42 = vpop.f32.mrf.mxu3 }
 0x343   :  { %v2406_v17 = vadd.f32 %v2405_v42, %v2392_v26 }
 0x345   :  { %v2525_v51 = vpop.f32.mrf.mxu2  ;;  %v2394_v44 = vpop.f32.mrf.mxu1  ;;  %v2409_v29 = vadd.f32 %v2406_v17, %v2289_v1  ;;  %v9047_v1 = vld [vmem:[%s12403_s10 + $0x20] sm:$0xff] }
 0x346   :  { %v2514_v53 = vpop.f32.mrf.mxu0  ;;  %v2526_v30 = vadd.f32 %v2525_v51, %v2512_v48 }
 0x348   :  { %v2529_v36 = vadd.f32 %v2526_v30, %v2409_v29  ;;  %v7607_v29 = vld [vmem:[%s12393_s0 + $0x23] sm:$0xff] }
 0x34a   :  { %v2407_v56 = vpop.f32.mrf.mxu3 }
 0x34d   :  { %v2527_v58 = vpop.f32.mrf.mxu2  ;;  %v2645_v3 = vpop.f32.mrf.mxu1  ;;  %7603 = vmatmul.msk.bf16.vlgmr.msrb.gmra.mxu2 %vm74_vm0, %v11013_v7 }
 0x34e   :  { %v2765_v4 = vpop.f32.mrf.mxu0  ;;  %v7653_v58 = vld [vmem:[%s12394_s1 + $0x90] sm:$0xf] }
 0x34f   :  { %v7654_v46 = vor.u32 %v9067_v59, %v7653_v58  ;;  %v3026_v58 = vld [vmem:[%s12402_s9] sm:$0x1] }
 0x351   :  { %3538 = vmatpush.bf16.msra.mxu2 %v7654_v46 }
 0x355   :  { %v2752_v22 = vpop.f32.mrf.mxu2  ;;  %v2647_v25 = vpop.f32.mrf.mxu1 }
 0x356   :  { %v2632_v19 = vpop.f32.mrf.mxu3  ;;  %v2767_v28 = vpop.f32.mrf.mxu0  ;;  %v2766_v38 = vadd.f32 %v2765_v4, %v2752_v22  ;;  %v9065_v4 = vld [vmem:[%s12394_s1 + $0x84] sm:$0xf0]  ;;  %v7636_v22 = vld [vmem:[%s12393_s0 + $0x2c] sm:$0xff]  ;;  %v7538_v25 = vor.u32 %v9048_v16, %v7535_v24 }
 0x357   :  { %v2646_v32 = vadd.f32 %v2645_v3, %v2632_v19  ;;  %v7617_v3 = vld [vmem:[%s12394_s1 + $0x60] sm:$0xf]  ;;  %v7646_v5 = vor.u32 %v9065_v4, %v7645_v63  ;;  %v3103_v19 = vld [vmem:[%s12403_s10 + $0x28] sm:$0x3]  ;;  %v11068_v17 = vpack.c.bf16 %v7636_v22, %v7635_v21  ;;  %v7655_v63 = vld [vmem:[%s12394_s1 + $0x98] sm:$0xf0] }
 0x358   :  { %v7618_v41 = vor.u32 %v9061_v62, %v7617_v3  ;;  %v3126_v23 = vunpack.c.l.b16 %v3103_v19  ;;  %3225 = vmatpush.bf16.msrb.mxu0 %v7538_v25  ;;  %v9066_v62 = vld [vmem:[%s12394_s1 + $0x94] sm:$0xf]  ;;  %v7647_v4 = vld [vmem:[%s12394_s1 + $0x88] sm:$0xf0]  ;;  %v11189_v22 = vld [vmem:[%s12395_s2] sm:$0x3] }
 0x359   :  { %v2649_v40 = vadd.f32 %v2646_v32, %v2529_v36  ;;  %3539 = vmatpush.bf16.msra.mxu2 %v7646_v5  ;;  %v9046_v32 = vld [vmem:[%s12403_s10 + $0x18] sm:$0xff]  ;;  %v7658_v2 = vor.u32 %v9066_v62, %v7655_v63  ;;  %v7650_v10 = vor.u32 %v9064_v49, %v7647_v4 }
 0x35a   :  { %v3132_v20 = vpack.c.b16 %v3126_v23, %v3126_v23  ;;  %v7637_v36 = vld [vmem:[%s12393_s0 + $0x34] sm:$0xff]  ;;  %v7627_v5 = vld [vmem:[%s12394_s1 + $0x78] sm:$0xf0] }
 0x35b   :  { %v2769_v26 = vadd.f32 %v2766_v38, %v2649_v40  ;;  %7549 = vmatmul.msk.bf16.vlgmr.msrb.gmra.mxu0 %vm74_vm0, %v10966_v6  ;;  %v7638_v6 = vld [vmem:[%s12393_s0 + $0x3c] sm:$0xf]  ;;  %v11115_v40 = vpack.c.bf16 %v7610_v35, %v7609_v0  ;;  %v9043_v38 = vld [vmem:[%s12403_s10] sm:$0xff] }
 0x35c   :  { %v3144_v28 = vsel %vm12408_vm10, %v3132_v20, 0 }
 0x35d   :  { %v2754_v33 = vpop.f32.mrf.mxu2  ;;  %7604 = vmatmul.msk.bf16.gmra.mxu2 %vm74_vm0, %v11033_v55  ;;  %3148 = vmatpush.bf16.msrb.mxu1 %v3144_v28 }
 0x35e   :  { %v2634_v27 = vpop.f32.mrf.mxu3  ;;  %v9045_v33 = vld [vmem:[%s12403_s10 + $0x10] sm:$0xff] }
 0x35f   :  { %v7608_v27 = vld [vmem:[%s12393_s0 + $0x2b] sm:$0xff] }
 0x360   :  { %v11084_v30 = vpack.c.bf16 %v7608_v27, %v7607_v29 }
 0x361   :  { %3149 = vmatpush.bf16.msrb.mxu1 %v9047_v1 }
 0x365   :  { %v2872_v37 = vpop.f32.mrf.mxu1  ;;  %v2992_v39 = vpop.f32.mrf.mxu0  ;;  %3150 = vmatpush.bf16.msrb.mxu1 %v9046_v32 }
 0x366   :  { %v2885_v47 = vpop.f32.mrf.mxu3  ;;  %v3005_v48 = vpop.f32.mrf.mxu2 }
 0x367   :  { %v2886_v34 = vadd.f32 %v2885_v47, %v2872_v37  ;;  %v3006_v42 = vadd.f32 %v3005_v48, %v2992_v39  ;;  %v9044_v37 = vld [vmem:[%s12403_s10 + $0x8] sm:$0xff]  ;;  %v11103_v39 = vpack.c.bf16 %v7638_v6, %v7637_v36  ;;  %v9058_v47 = vld [vmem:[%s12394_s1 + $0x54] sm:$0xf] }
 0x368   :  { %v7591_v48 = vld [vmem:[%s12394_s1 + $0x48] sm:$0xf0] }
 0x369   :  { %v2889_v50 = vadd.f32 %v2886_v34, %v2769_v26  ;;  %3151 = vmatpush.bf16.msrb.mxu1 %v9045_v33  ;;  %v7599_v26 = vld [vmem:[%s12394_s1 + $0x58] sm:$0xf0] }
 0x36a   :  { %v7602_v34 = vor.u32 %v9058_v47, %v7599_v26 }
 0x36b   :  { %v3009_v52 = vadd.f32 %v3006_v42, %v2889_v50  ;;  %7550 = vmatmul.msk.bf16.gmra.mxu0 %vm74_vm0, %v10978_v31  ;;  %v9056_v31 = vld [vmem:[%s12394_s1 + $0x44] sm:$0xf]  ;;  %v9054_v42 = vld [vmem:[%s12394_s1 + $0x34] sm:$0xf] }
 0x36c   :  { %3393 = vmatpush.bf16.msra.mxu0 %v7602_v34 }
 0x36d   :  { %v2874_v51 = vpop.f32.mrf.mxu1  ;;  %v2994_v44 = vpop.f32.mrf.mxu0  ;;  %v3010_v53 = vpack.c.bf16 %v3009_v52, %v3009_v52  ;;  %7659 = vmatmul.msk.bf16.vlgmr.msra.gmra.mxu2 %vm74_vm0, %v11068_v17  ;;  %3152 = vmatpush.bf16.msrb.mxu1 %v9044_v37  ;;  %v7594_v52 = vor.u32 %v9056_v31, %v7591_v48 }
 0x36e   :  { %v2887_v54 = vpop.f32.mrf.mxu3  ;;  %v3007_v56 = vpop.f32.mrf.mxu2  ;;  %v7571_v51 = vld [vmem:[%s12394_s1 + $0x38] sm:$0xf0]  ;;  %v9052_v44 = vld [vmem:[%s12394_s1 + $0x24] sm:$0xf] }
 0x36f   :  { %7505 = vmatmul.msk.bf16.vlgmr.msrb.gmra.mxu3 %vm12407_vm5, %v3010_v53  ;;  %v7574_v53 = vor.u32 %v9054_v42, %v7571_v51  ;;  %v7563_v54 = vld [vmem:[%s12394_s1 + $0x28] sm:$0xf0] }
 0x370   :  { %3456 = vmatpush.bf16.msrb.mxu3 %v7626_v61  ;;  %v7566_v56 = vor.u32 %v9052_v44, %v7563_v54  ;;  %3394 = vmatpush.bf16.msra.mxu0 %v7594_v52 }
 0x371   :  { %3153 = vmatpush.bf16.msrb.mxu1 %v9043_v38 }
 0x374   :  { %3457 = vmatpush.bf16.msrb.mxu3 %v7618_v41  ;;  %v9062_v41 = vld [vmem:[%s12394_s1 + $0x74] sm:$0xf]  ;;  %3557 = vmatpush.bf16.msrb.mxu0 %v7658_v2 }
 0x375   :  { %3311 = vmatpush.bf16.msra.mxu1 %v7574_v53 }
 0x376   :  { %v3208_v50 = vpop.f32.mrf.mxu2 }
 0x378   :  { %3558 = vmatpush.bf16.msrb.mxu0 %v7650_v10 }
 0x379   :  { %3312 = vmatpush.bf16.msra.mxu1 %v7566_v56 }
 0x37b   :  { %7605 = vmatmul.msk.bf16.vlgmr.msra.gmra.mxu0 %vm74_vm0, %v11013_v7  ;;  %v7630_v7 = vor.u32 %v9062_v41, %v7627_v5 }
 0x37d   :  { %7660 = vmatmul.msk.bf16.gmra.mxu2 %vm74_vm0, %v11103_v39 }
 0x37e   :  { %v3210_v57 = vpop.f32.mrf.mxu2 }
 0x37f   :  { %7575 = vmatmul.msk.bf16.vlgmr.msra.gmra.mxu3 %vm74_vm0, %v11023_v8 }
 0x38b   :  { %7606 = vmatmul.msk.bf16.gmra.mxu0 %vm74_vm0, %v11033_v55  ;;  %v7622_v55 = vor.u32 %v9060_v43, %v7619_v45 }
 0x38f   :  { %7576 = vmatmul.msk.bf16.gmra.mxu3 %vm74_vm0, %v11043_v14 }
 0x39b   :  { %7661 = vmatmul.msk.bf16.vlgmr.msrb.gmra.mxu0 %vm74_vm0, %v11068_v17 }
 0x39f   :  { %7631 = vmatmul.msk.bf16.vlgmr.msrb.gmra.mxu3 %vm74_vm0, %v11084_v30 }
 0x3ab   :  { %7662 = vmatmul.msk.bf16.gmra.mxu0 %vm74_vm0, %v11103_v39 }
 0x3af   :  { %7632 = vmatmul.msk.bf16.gmra.mxu3 %vm74_vm0, %v11115_v40 }
 0x3c0   :  { %v3213_v12 = vpop.f32.mrf.mxu2 }
 0x3c8   :  { %v3215_v46 = vpop.f32.mrf.mxu2 }
 0x3d0   :  { %v3377_v11 = vpop.f32.mrf.mxu2 }
 0x3d8   :  { %v3379_v15 = vpop.f32.mrf.mxu2  ;;  %v11196_v49 = vpop.f32.mrf.mxu0 }
 0x3e0   :  { %v3382_v16 = vpop.f32.mrf.mxu2 }
 0x3e8   :  { %v3384_v18 = vpop.f32.mrf.mxu2 }
 0x3f0   :  { %v3541_v21 = vpop.f32.mrf.mxu2 }
 0x3f2   :  { %v3088_v59 = vpop.f32.mrf.mxu3 }
 0x3f3   :  { %v3089_v61 = vadd.f32 %v3088_v59, %v3026_v58 }
 0x3f5   :  { %v3092_v3 = vpack.c.bf16 %v3089_v61, %v3089_v61 }
 0x3f7   :  { %7526 = vmatmul.msk.bf16.vlgmr.msrb.gmra.mxu1 %vm12406_vm4, %v3092_v3 }
 0x3f8   :  { %3475 = vmatpush.bf16.msrb.mxu1 %v7630_v7  ;;  %v3543_v25 = vpop.f32.mrf.mxu2 }
 0x3fa   :  { %v3090_v9 = vpop.f32.mrf.mxu3 }
 0x3fc   :  { %3476 = vmatpush.bf16.msrb.mxu1 %v7622_v55 }
 0x400   :  { %v3546_v36 = vpop.f32.mrf.mxu2 }
 0x402   :  { %v3295_v13 = vpop.f32.mrf.mxu3 }
 0x407   :  { %7577 = vmatmul.msk.bf16.vlgmr.msra.gmra.mxu1 %vm74_vm0, %v11023_v8  ;;  %v3238_v8 = vperm.slane %v11189_v22, 0 }
 0x409   :  { %v3246_v20 = vadd.f32 %v3238_v8, %v3213_v12  ;;  %v3242_v17 = vadd.f32 %v3238_v8, %v3208_v50  ;;  %v3244_v29 = vadd.f32 %v3238_v8, %v3210_v57  ;;  %v3248_v27 = vadd.f32 %v3238_v8, %v3215_v46  ;;  %v3548_v50 = vpop.f32.mrf.mxu2 }
 0x40a   :  { %v3297_v60 = vpop.f32.mrf.mxu3 }
 0x40b   :  { %v3326_v33 = vadd.f32 %v3297_v60, %v3244_v29 }
 0x40d   :  { %v3408_v35 = vadd.f32 %v3379_v15, %v3326_v33 }
 0x412   :  { %v3300_v24 = vpop.f32.mrf.mxu3 }
 0x413   :  { %v3328_v1 = vadd.f32 %v3300_v24, %v3246_v20 }
 0x415   :  { %v3410_v32 = vadd.f32 %v3382_v16, %v3328_v1  ;;  %v11202_v16 = vpop.f32.mrf.mxu0 }
 0x417   :  { %7578 = vmatmul.msk.bf16.gmra.mxu1 %vm74_vm0, %v11043_v14  ;;  %v3324_v14 = vadd.f32 %v3295_v13, %v3242_v17 }
 0x419   :  { %v3406_v6 = vadd.f32 %v3377_v11, %v3324_v14 }
 0x41a   :  { %v3302_v19 = vpop.f32.mrf.mxu3 }
 0x41b   :  { %v3330_v39 = vadd.f32 %v3302_v19, %v3248_v27 }
 0x41d   :  { %v3412_v26 = vadd.f32 %v3384_v18, %v3330_v39 }
 0x422   :  { %v3459_v23 = vpop.f32.mrf.mxu3 }
 0x423   :  { %v3488_v47 = vadd.f32 %v3459_v23, %v3406_v6 }
 0x425   :  { %v3570_v31 = vadd.f32 %v3541_v21, %v3488_v47 }
 0x427   :  { %7633 = vmatmul.msk.bf16.vlgmr.msrb.gmra.mxu1 %vm74_vm0, %v11084_v30  ;;  %v7663_v52 = vmul.f32 -1.442695, %v3570_v31 }
 0x42a   :  { %v3461_v28 = vpop.f32.mrf.mxu3 }
 0x42b   :  { %v3490_v34 = vadd.f32 %v3461_v28, %v3408_v35 }
 0x42d   :  { %v3572_v51 = vadd.f32 %v3543_v25, %v3490_v34 }
 0x42f   :  { %v7665_v56 = vmul.f32 -1.442695, %v3572_v51 }
 0x432   :  { %v3464_v37 = vpop.f32.mrf.mxu3 }
 0x433   :  { %v3492_v0 = vadd.f32 %v3464_v37, %v3410_v32 }
 0x435   :  { %v3574_v38 = vadd.f32 %v3546_v36, %v3492_v0 }
 0x437   :  { %7634 = vmatmul.msk.bf16.gmra.mxu1 %vm74_vm0, %v11115_v40  ;;  %v7667_v30 = vmul.f32 -1.442695, %v3574_v38 }
 0x439   :  { %9332 = vpow2.f32 %v7667_v30  ;;  %v3232_v30 = vpop.f32.mrf.mxu0 }
 0x43a   :  { %v3466_v48 = vpop.f32.mrf.mxu3 }
 0x43b   :  { %v3494_v42 = vadd.f32 %v3466_v48, %v3412_v26 }
 0x43d   :  { %v3576_v44 = vadd.f32 %v3548_v50, %v3494_v42  ;;  %v3104_v42 = vld [vmem:[%s12404_s11] sm:$0x1] }
 0x43f   :  { %v9333_v53 = vpop.eup %9332  ;;  %v7669_v54 = vmul.f32 -1.442695, %v3576_v44 }
 0x440   :  { %v3606_v57 = vadd.f32 1.0, %v9333_v53 }
 0x441   :  { %9334 = vpow2.f32 %v7669_v54  ;;  %v3234_v50 = vpop.f32.mrf.mxu0 }
 0x442   :  { %9336 = vpow2.f32 %v7663_v52  ;;  %vm3675_vm12 = vweird.f32 %v3606_v57  ;;  %v3679_v45 = vand.u32 2147483647, %v3606_v57  ;;  %v3681_v55 = vand.u32 2147483648, %v3606_v57 }
 0x443   :  { %9338 = vpow2.f32 %v7665_v56 }
 0x444   :  { %9340 = vrcp.f32 %v3606_v57  ;;  %vm3680_vm2 = vcmp.eq.f32.partialorder %v3679_v45, 8.507059e+37  ;;  %v3682_v24 = vor.u32 1.1754944e-38, %v3681_v55 }
 0x447   :  { %v9335_v12 = vpop.eup %9334 }
 0x448   :  { %v9337_v40 = vpop.eup %9336  ;;  %v3608_v58 = vadd.f32 1.0, %v9335_v12 }
 0x449   :  { %v9339_v59 = vpop.eup %9338  ;;  %v3602_v61 = vadd.f32 1.0, %v9337_v40  ;;  %v3396_v52 = vpop.f32.mrf.mxu0 }
 0x44a   :  { %9342 = vrcp.f32 %v3608_v58  ;;  %v9341_v46 = vpop.eup %9340  ;;  %v3604_v3 = vadd.f32 1.0, %v9339_v59  ;;  %vm3705_vm15 = vweird.f32 %v3608_v58  ;;  %v3709_v15 = vand.u32 2147483647, %v3608_v58 }
 0x44b   :  { %9344 = vrcp.f32 %v3602_v61  ;;  %v3671_v62 = vmul.f32 %v9341_v46, %v3606_v57  ;;  %vm3676_vm13 = vweird.f32 %v9341_v46  ;;  %v3711_v19 = vand.u32 2147483648, %v3608_v58 }
 0x44c   :  { %9346 = vrcp.f32 %v3604_v3  ;;  %vm11198_vm14 = vmor %vm3675_vm12, %vm3676_vm13  ;;  %vm3710_vm12 = vcmp.eq.f32.partialorder %v3709_v15, 8.507059e+37  ;;  %vm3615_vm13 = vweird.f32 %v3602_v61  ;;  %v3619_v17 = vand.u32 2147483647, %v3602_v61 }
 0x44d   :  { %v3672_v4 = vsub.f32 1.0, %v3671_v62  ;;  %v3712_v25 = vor.u32 1.1754944e-38, %v3711_v19  ;;  %v3621_v28 = vand.u32 2147483648, %v3602_v61  ;;  %vm3645_vm10 = vweird.f32 %v3604_v3 }
 0x44e   :  { %v3649_v37 = vand.u32 2147483647, %v3604_v3  ;;  %v3651_v39 = vand.u32 2147483648, %v3604_v3  ;;  %v3239_v59 = vperm.slane %v11189_v22, 1 }
 0x44f   :  { %v3673_v43 = vmul.f32 %v9341_v46, %v3672_v4  ;;  %v3622_v33 = vor.u32 1.1754944e-38, %v3621_v28 }
 0x450   :  { %v9343_v63 = vpop.eup %9342  ;;  %v3652_v47 = vor.u32 1.1754944e-38, %v3651_v39  ;;  %v3245_v22 = vadd.f32 %v3239_v59, %v11202_v16 }
 0x451   :  { %v3701_v2 = vmul.f32 %v9343_v63, %v3608_v58  ;;  %v9345_v5 = vpop.eup %9344  ;;  %v3674_v13 = vadd.f32 %v9341_v46, %v3673_v43  ;;  %vm3706_vm9 = vweird.f32 %v9343_v63  ;;  %v3398_v54 = vpop.f32.mrf.mxu0 }
 0x452   :  { %v9347_v7 = vpop.eup %9346  ;;  %v3611_v9 = vmul.f32 %v9345_v5, %v3602_v61  ;;  %vm3707_vm4 = vmor %vm3705_vm15, %vm3706_vm9  ;;  %vm3616_vm5 = vweird.f32 %v9345_v5  ;;  %vm3620_vm15 = vcmp.eq.f32.partialorder %v3619_v17, 8.507059e+37 }
 0x453   :  { %v3702_v41 = vsub.f32 1.0, %v3701_v2  ;;  %v3641_v60 = vmul.f32 %v9347_v7, %v3604_v3  ;;  %v3678_v21 = vsel %vm11198_vm14, %v9341_v46, %v3674_v13  ;;  %vm11206_vm1 = vmor %vm3615_vm13, %vm3616_vm5  ;;  %vm3646_vm14 = vweird.f32 %v9347_v7  ;;  %v7673_v46 = vld [vmem:[%s12396_s3] sm:$0xf]  ;;  %v9068_v3 = vld [vmem:[%s12396_s3] sm:$0x70] }
 0x454   :  { %v3683_v23 = vsel %vm3680_vm2, %v3682_v24, %v3678_v21  ;;  %v3612_v20 = vsub.f32 1.0, %v3611_v9  ;;  %vm3650_vm2 = vcmp.eq.f32.partialorder %v3649_v37, 8.507059e+37  ;;  %vm12410_vm5 = vcmask 73728  }
 0x455   :  { %v3703_v11 = vmul.f32 %v9343_v63, %v3702_v41  ;;  %v3642_v14 = vsub.f32 1.0, %v3641_v60  ;;  %v11224_v62 = vor.u32 %v9068_v3, %v7673_v46 }
 0x456   :  { %v3613_v29 = vmul.f32 %v9345_v5, %v3612_v20 }
 0x457   :  { %v3704_v18 = vadd.f32 %v9343_v63, %v3703_v11  ;;  %v3643_v6 = vmul.f32 %v9347_v7, %v3642_v14  ;;  %v3247_v11 = vadd.f32 %v3239_v59, %v3232_v30 }
 0x458   :  { %v3614_v36 = vadd.f32 %v9345_v5, %v3613_v29 }
 0x459   :  { %v3708_v8 = vsel %vm3707_vm4, %v9343_v63, %v3704_v18  ;;  %vm3647_vm4 = vmor %vm3645_vm10, %vm3646_vm14  ;;  %v3644_v38 = vadd.f32 %v9347_v7, %v3643_v6  ;;  %v3401_v12 = vpop.f32.mrf.mxu0  ;;  %v3243_v63 = vadd.f32 %v3239_v59, %v11196_v49 }
 0x45a   :  { %v3713_v1 = vsel %vm3710_vm12, %v3712_v25, %v3708_v8  ;;  %v3618_v35 = vsel %vm11206_vm1, %v9345_v5, %v3614_v36 }
 0x45b   :  { %v3734_v27 = vpack.c.bf16 %v3713_v1, %v3683_v23  ;;  %v3623_v26 = vsel %vm3620_vm15, %v3622_v33, %v3618_v35  ;;  %v3648_v34 = vsel %vm3647_vm4, %v9347_v7, %v3644_v38  ;;  %v3249_v23 = vadd.f32 %v3239_v59, %v3234_v50  ;;  %v7735_v35 = vld [vmem:[%s12397_s4 + $0x70] sm:$0xf]  ;;  %v9084_v38 = vld [vmem:[%s12397_s4 + $0x74] sm:$0xf0] }
 0x45c   :  { %v3653_v31 = vsel %vm3650_vm2, %v3652_v47, %v3648_v34  ;;  %v7727_v47 = vld [vmem:[%s12397_s4 + $0x60] sm:$0xf]  ;;  %v7736_v30 = vor.u32 %v9084_v38, %v7735_v35  ;;  %v9082_v34 = vld [vmem:[%s12397_s4 + $0x64] sm:$0xf0] }
 0x45d   :  { %v3745_v0 = vsel %vm631_vm8, %v3734_v27, 0  ;;  %v3732_v48 = vpack.c.bf16 %v3653_v31, %v3623_v26 }
 0x45e   :  { %3756 = vmatpush.bf16.msra.mxu3 %v3745_v0  ;;  %3924 = vmatpush.bf16.msrb.mxu2 %v7736_v30 }
 0x461   :  { %v3403_v58 = vpop.f32.mrf.mxu0 }
 0x462   :  { %3757 = vmatpush.bf16.msra.mxu3 %v3732_v48 }
 0x465   :  { %7675 = vmatmul.msk.bf16.vlgmr.msra.gmra.mxu3 %vm627_vm3, %v11224_v62 }
 0x469   :  { %v3560_v2 = vpop.f32.mrf.mxu0 }
 0x471   :  { %v3562_v45 = vpop.f32.mrf.mxu0 }
 0x474   :  { %v3155_v51 = vpop.f32.mrf.mxu1 }
 0x475   :  { %v3156_v44 = vadd.f32 %v3155_v51, %v3104_v42  ;;  %v7728_v42 = vor.u32 %v9082_v34, %v7727_v47  ;;  %v9070_v34 = vld [vmem:[%s12397_s4 + $0x4] sm:$0xf0] }
 0x477   :  { %3160 = vst.msk [vmem:[#allocation4] sm:$0x1] %vm12410_vm5, %v3156_v44  ;;  %v7719_v44 = vld [vmem:[%s12397_s4 + $0x50] sm:$0xf]  ;;  %3925 = vmatpush.bf16.msrb.mxu2 %v7728_v42 }
 0x479   :  { %v3565_v49 = vpop.f32.mrf.mxu0 }
 0x47c   :  { %v3157_v53 = vpop.f32.mrf.mxu1 }
 0x481   :  { %v3567_v33 = vpop.f32.mrf.mxu0 }
 0x484   :  { %v3314_v56 = vpop.f32.mrf.mxu1 }
 0x485   :  { %v3325_v4 = vadd.f32 %v3314_v56, %v3243_v63 }
 0x487   :  { %v3407_v5 = vadd.f32 %v3396_v52, %v3325_v4  ;;  %v9080_v52 = vld [vmem:[%s12397_s4 + $0x54] sm:$0xf0] }
 0x488   :  { %v9076_v4 = vld [vmem:[%s12397_s4 + $0x34] sm:$0xf0] }
 0x48c   :  { %v3316_v57 = vpop.f32.mrf.mxu1 }
 0x48d   :  { %v3327_v7 = vadd.f32 %v3316_v57, %v3245_v22  ;;  %v7720_v57 = vor.u32 %v9080_v52, %v7719_v44  ;;  %v7830_v44 = vld [vmem:[%s12397_s4 + $0x108] sm:$0xf]  ;;  %v9102_v52 = vld [vmem:[%s12397_s4 + $0x10c] sm:$0xf0] }
 0x48f   :  { %v3409_v9 = vadd.f32 %v3398_v54, %v3327_v7  ;;  %3926 = vmatpush.bf16.msrb.mxu2 %v7720_v57 }
 0x494   :  { %v3319_v40 = vpop.f32.mrf.mxu1 }
 0x495   :  { %v3329_v15 = vadd.f32 %v3319_v40, %v3247_v11  ;;  %v9078_v40 = vld [vmem:[%s12397_s4 + $0x44] sm:$0xf0] }
 0x497   :  { %v3411_v19 = vadd.f32 %v3401_v12, %v3329_v15  ;;  %v7711_v12 = vld [vmem:[%s12397_s4 + $0x40] sm:$0xf] }
 0x498   :  { %v7712_v3 = vor.u32 %v9078_v40, %v7711_v12  ;;  %v7695_v15 = vld [vmem:[%s12397_s4 + $0x20] sm:$0xf]  ;;  %v7814_v12 = vld [vmem:[%s12397_s4 + $0xe8] sm:$0xf]  ;;  %v7806_v40 = vld [vmem:[%s12397_s4 + $0xd8] sm:$0xf] }
 0x49a   :  { %3927 = vmatpush.bf16.msrb.mxu2 %v7712_v3  ;;  %v9094_v3 = vld [vmem:[%s12397_s4 + $0xcc] sm:$0xf0] }
 0x49c   :  { %v3321_v61 = vpop.f32.mrf.mxu1 }
 0x49d   :  { %v3331_v8 = vadd.f32 %v3321_v61, %v3249_v23 }
 0x49f   :  { %v3413_v1 = vadd.f32 %v3403_v58, %v3331_v8 }
 0x4a4   :  { %v3478_v41 = vpop.f32.mrf.mxu1 }
 0x4a5   :  { %v3489_v43 = vadd.f32 %v3478_v41, %v3407_v5 }
 0x4a7   :  { %v3571_v10 = vadd.f32 %v3560_v2, %v3489_v43  ;;  %v7703_v2 = vld [vmem:[%s12397_s4 + $0x30] sm:$0xf] }
 0x4a9   :  { %v7664_v24 = vmul.f32 -1.442695, %v3571_v10 }
 0x4ab   :  { %9348 = vpow2.f32 %v7664_v24 }
 0x4ac   :  { %v3480_v55 = vpop.f32.mrf.mxu1 }
 0x4ad   :  { %v3491_v13 = vadd.f32 %v3480_v55, %v3409_v9  ;;  %v7704_v55 = vor.u32 %v9076_v4, %v7703_v2  ;;  %v9092_v4 = vld [vmem:[%s12397_s4 + $0xbc] sm:$0xf0] }
 0x4af   :  { %v3573_v60 = vadd.f32 %v3562_v45, %v3491_v13  ;;  %3928 = vmatpush.bf16.msrb.mxu2 %v7704_v55  ;;  %v7729_v55 = vld [vmem:[%s12397_s4 + $0x68] sm:$0xf0] }
 0x4b1   :  { %v7666_v18 = vmul.f32 -1.442695, %v3573_v60  ;;  %v9349_v17 = vpop.eup %9348  ;;  %v9074_v60 = vld [vmem:[%s12397_s4 + $0x24] sm:$0xf0] }
 0x4b2   :  { %v11230_v14 = vadd.f32 1.0, %v9349_v17 }
 0x4b3   :  { %9350 = vpow2.f32 %v7666_v18 }
 0x4b4   :  { %v3483_v21 = vpop.f32.mrf.mxu1  ;;  %v3636_v41 = vand.u32 2147483648, %v11230_v14  ;;  %vm3630_vm5 = vweird.f32 %v11230_v14 }
 0x4b5   :  { %v3493_v16 = vadd.f32 %v3483_v21, %v3411_v19 }
 0x4b6   :  { %v3637_v47 = vor.u32 1.1754944e-38, %v3636_v41 }
 0x4b7   :  { %v3575_v25 = vadd.f32 %v3565_v49, %v3493_v16 }
 0x4b9   :  { %v7668_v20 = vmul.f32 -1.442695, %v3575_v25  ;;  %v9351_v28 = vpop.eup %9350 }
 0x4ba   :  { %v11232_v32 = vadd.f32 1.0, %v9351_v28  ;;  %v9075_v28 = vld [vmem:[%s12397_s4 + $0x34] sm:$0xf] }
 0x4bb   :  { %9352 = vpow2.f32 %v7668_v20  ;;  %v7696_v20 = vor.u32 %v9074_v60, %v7695_v15  ;;  %v9079_v15 = vld [vmem:[%s12397_s4 + $0x54] sm:$0xf]  ;;  %v7721_v60 = vld [vmem:[%s12397_s4 + $0x58] sm:$0xf0] }
 0x4bc   :  { %v3485_v29 = vpop.f32.mrf.mxu1  ;;  %9354 = vrcp.f32 %v11230_v14  ;;  %vm3660_vm15 = vweird.f32 %v11232_v32  ;;  %v3664_v19 = vand.u32 2147483647, %v11232_v32  ;;  %v3666_v23 = vand.u32 2147483648, %v11232_v32 }
 0x4bd   :  { %v3495_v27 = vadd.f32 %v3485_v29, %v3413_v1  ;;  %9356 = vrcp.f32 %v11232_v32  ;;  %v7687_v1 = vld [vmem:[%s12397_s4 + $0x10] sm:$0xf]  ;;  %v9072_v29 = vld [vmem:[%s12397_s4 + $0x14] sm:$0xf0]  ;;  %3929 = vmatpush.bf16.msrb.mxu2 %v7696_v20  ;;  %v7724_v24 = vor.u32 %v9079_v15, %v7721_v60  ;;  %v7753_v20 = vld [vmem:[%s12397_s4 + $0x98] sm:$0xf0] }
 0x4be   :  { %v7688_v38 = vor.u32 %v9072_v29, %v7687_v1  ;;  %v7705_v29 = vld [vmem:[%s12397_s4 + $0x38] sm:$0xf0]  ;;  %v9088_v15 = vld [vmem:[%s12397_s4 + $0x94] sm:$0xf0] }
 0x4bf   :  { %v3577_v36 = vadd.f32 %v3567_v33, %v3495_v27 }
 0x4c1   :  { %v9353_v6 = vpop.eup %9352  ;;  %v7670_v37 = vmul.f32 -1.442695, %v3577_v36  ;;  %v3634_v36 = vand.u32 2147483647, %v11230_v14  ;;  %3930 = vmatpush.bf16.msrb.mxu2 %v7688_v38  ;;  %v7840_v38 = vld [vmem:[%s12397_s4 + $0x120] sm:$0xf0] }
 0x4c2   :  { %v11236_v39 = vadd.f32 1.0, %v9353_v6  ;;  %v11239_v0 = vpop.eup %9354 }
 0x4c3   :  { %9358 = vpow2.f32 %v7670_v37  ;;  %v11250_v26 = vpop.eup %9356  ;;  %v3626_v56 = vmul.f32 %v11239_v0, %v11230_v14  ;;  %vm3631_vm1 = vweird.f32 %v11239_v0  ;;  %v9073_v37 = vld [vmem:[%s12397_s4 + $0x24] sm:$0xf] }
 0x4c4   :  { %9360 = vrcp.f32 %v11236_v39  ;;  %v3656_v53 = vmul.f32 %v11250_v26, %v11232_v32  ;;  %v3694_v45 = vand.u32 2147483647, %v11236_v39  ;;  %v3696_v9 = vand.u32 2147483648, %v11236_v39 }
 0x4c5   :  { %v3627_v61 = vsub.f32 1.0, %v3626_v56  ;;  %vm3690_vm9 = vweird.f32 %v11236_v39  ;;  %vm3661_vm14 = vweird.f32 %v11250_v26  ;;  %v9100_v56 = vld [vmem:[%s12397_s4 + $0xfc] sm:$0xf0] }
 0x4c6   :  { %v3657_v58 = vsub.f32 1.0, %v3656_v53  ;;  %v3697_v16 = vor.u32 1.1754944e-38, %v3696_v9  ;;  %v7831_v53 = vor.u32 %v9102_v52, %v7830_v44  ;;  %v9119_v52 = vld [vmem:[%s12397_s4 + $0x1a4] sm:$0xf] }
 0x4c7   :  { %v3628_v43 = vmul.f32 %v11239_v0, %v3627_v61 }
 0x4c8   :  { %v3658_v22 = vmul.f32 %v11250_v26, %v3657_v58 }
 0x4c9   :  { %v9359_v31 = vpop.eup %9358  ;;  %v3629_v25 = vadd.f32 %v11239_v0, %v3628_v43  ;;  %v9083_v43 = vld [vmem:[%s12397_s4 + $0x74] sm:$0xf] }
 0x4ca   :  { %v11255_v48 = vpop.eup %9360  ;;  %v3609_v50 = vadd.f32 1.0, %v9359_v31  ;;  %v3659_v18 = vadd.f32 %v11250_v26, %v3658_v22  ;;  %v9104_v31 = vld [vmem:[%s12397_s4 + $0x11c] sm:$0xf0]  ;;  %v7782_v22 = vld [vmem:[%s12397_s4 + $0xa8] sm:$0xf] }
 0x4cb   :  { %v3686_v51 = vmul.f32 %v11255_v48, %v11236_v39  ;;  %vm3691_vm10 = vweird.f32 %v11255_v48  ;;  %v3667_v39 = vor.u32 1.1754944e-38, %v3666_v23 }
 0x4cc   :  { %9362 = vrcp.f32 %v3609_v50  ;;  %v3726_v10 = vand.u32 2147483648, %v3609_v50  ;;  %v3724_v13 = vand.u32 2147483647, %v3609_v50  ;;  %vm11297_vm13 = vmor %vm3690_vm9, %vm3691_vm10  ;;  %vm3720_vm4 = vweird.f32 %v3609_v50 }
 0x4cd   :  { %v3687_v54 = vsub.f32 1.0, %v3686_v51  ;;  %vm3695_vm10 = vcmp.eq.f32.partialorder %v3694_v45, 8.507059e+37  ;;  %v7737_v45 = vld [vmem:[%s12397_s4 + $0x78] sm:$0xf0] }
 0x4ce   :  { %v3727_v8 = vor.u32 1.1754944e-38, %v3726_v10  ;;  %vm3725_vm9 = vcmp.eq.f32.partialorder %v3724_v13, 8.507059e+37  ;;  %v7740_v9 = vor.u32 %v9083_v43, %v7737_v45  ;;  %v9081_v10 = vld [vmem:[%s12397_s4 + $0x64] sm:$0xf]  ;;  %v9071_v43 = vld [vmem:[%s12397_s4 + $0x14] sm:$0xf] }
 0x4cf   :  { %v3688_v59 = vmul.f32 %v11255_v48, %v3687_v54  ;;  %v7822_v54 = vld [vmem:[%s12397_s4 + $0xf8] sm:$0xf]  ;;  %v7689_v45 = vld [vmem:[%s12397_s4 + $0x18] sm:$0xf0] }
 0x4d0   :  { %v7823_v57 = vor.u32 %v9100_v56, %v7822_v54  ;;  %3952 = vmatpush.bf16.msra.mxu0 %v7740_v9  ;;  %v9101_v9 = vld [vmem:[%s12397_s4 + $0x10c] sm:$0xf] }
 0x4d1   :  { %v3689_v5 = vadd.f32 %v11255_v48, %v3688_v59  ;;  %v9096_v59 = vld [vmem:[%s12397_s4 + $0xdc] sm:$0xf0] }
 0x4d2   :  { %v9363_v46 = vpop.eup %9362  ;;  %v7807_v61 = vor.u32 %v9096_v59, %v7806_v40  ;;  %v9115_v59 = vld [vmem:[%s12397_s4 + $0x184] sm:$0xf] }
 0x4d3   :  { %v3716_v63 = vmul.f32 %v9363_v46, %v3609_v50  ;;  %vm3721_vm12 = vweird.f32 %v9363_v46  ;;  %v3693_v49 = vsel %vm11297_vm13, %v11255_v48, %v3689_v5  ;;  %vm11315_vm13 = vmor %vm3660_vm15, %vm3661_vm14  ;;  %vm3665_vm15 = vcmp.eq.f32.partialorder %v3664_v19, 8.507059e+37  ;;  %v9090_v5 = vld [vmem:[%s12397_s4 + $0xac] sm:$0xf0]  ;;  %v9077_v19 = vld [vmem:[%s12397_s4 + $0x44] sm:$0xf] }
 0x4d4   :  { %vm3722_vm2 = vmor %vm3720_vm4, %vm3721_vm12  ;;  %v3698_v27 = vsel %vm3695_vm10, %v3697_v16, %v3693_v49  ;;  %v3663_v32 = vsel %vm11315_vm13, %v11250_v26, %v3659_v18  ;;  %v7679_v26 = vld [vmem:[%s12397_s4] sm:$0xf]  ;;  %v7713_v49 = vld [vmem:[%s12397_s4 + $0x48] sm:$0xf0] }
 0x4d5   :  { %v3717_v7 = vsub.f32 1.0, %v3716_v63  ;;  %vm11331_vm12 = vmor %vm3630_vm5, %vm3631_vm1  ;;  %v3668_v30 = vsel %vm3665_vm15, %v3667_v39, %v3663_v32  ;;  %vm3635_vm5 = vcmp.eq.f32.partialorder %v3634_v36, 8.507059e+37  ;;  %v7680_v42 = vor.u32 %v9070_v34, %v7679_v26  ;;  %v7790_v63 = vld [vmem:[%s12397_s4 + $0xb8] sm:$0xf]  ;;  %v11416_v18 = vld [vmem:[%s12397_s4 + $0xa0] sm:$0xff] }
 0x4d6   :  { %v3633_v35 = vsel %vm11331_vm12, %v11239_v0, %v3629_v25  ;;  %v7838_v0 = vld [vmem:[%s12397_s4 + $0x118] sm:$0xf]  ;;  %v7791_v41 = vor.u32 %v9092_v4, %v7790_v63  ;;  %v7716_v23 = vor.u32 %v9077_v19, %v7713_v49  ;;  %v9087_v25 = vld [vmem:[%s12397_s4 + $0x94] sm:$0xf]  ;;  %v7708_v36 = vor.u32 %v9075_v28, %v7705_v29  ;;  %v9085_v32 = vld [vmem:[%s12397_s4 + $0x84] sm:$0xf] }
 0x4d7   :  { %v3718_v11 = vmul.f32 %v9363_v46, %v3717_v7  ;;  %v3638_v48 = vsel %vm3635_vm5, %v3637_v47, %v3633_v35  ;;  %v7839_v51 = vor.u32 %v9104_v31, %v7838_v0  ;;  %3931 = vmatpush.bf16.msrb.mxu2 %v7680_v42  ;;  %v7783_v7 = vor.u32 %v9090_v5, %v7782_v22  ;;  %v7697_v39 = vld [vmem:[%s12397_s4 + $0x28] sm:$0xf0]  ;;  %v9103_v35 = vld [vmem:[%s12397_s4 + $0x11c] sm:$0xf]  ;;  %v9113_v63 = vld [vmem:[%s12397_s4 + $0x174] sm:$0xf] }
 0x4d8   :  { %v3733_v50 = vpack.c.bf16 %v3668_v30, %v3638_v48  ;;  %v7756_v1 = vor.u32 %v9087_v25, %v7753_v20  ;;  %v7700_v47 = vor.u32 %v9073_v37, %v7697_v39  ;;  %v7843_v30 = vor.u32 %v9103_v35, %v7840_v38  ;;  %v7935_v42 = vld [vmem:[%s12397_s4 + $0x1b8] sm:$0xf0]  ;;  %v9111_v4 = vld [vmem:[%s12397_s4 + $0x164] sm:$0xf]  ;;  %v7681_v49 = vld [vmem:[%s12397_s4 + $0x8] sm:$0xf0] }
 0x4d9   :  { %v3719_v21 = vadd.f32 %v9363_v46, %v3718_v11  ;;  %v7732_v11 = vor.u32 %v9081_v10, %v7729_v55  ;;  %v3871_v22 = vunpack.c.l.b16 %v11416_v18  ;;  %v11508_v5 = vld [vmem:[%s12397_s4 + $0x298] sm:$0xff]  ;;  %v7692_v55 = vor.u32 %v9071_v43, %v7689_v45  ;;  %v7824_v25 = vld [vmem:[%s12397_s4 + $0x100] sm:$0xf0]  ;;  %v9109_v20 = vld [vmem:[%s12397_s4 + $0x154] sm:$0xf] }
 0x4da   :  { %v4517_v60 = vunpack.c.h.b16 %v11508_v5  ;;  %v7779_v29 = vld [vmem:[%s12397_s4 + $0x148] sm:$0xff]  ;;  %v9106_v45 = vld [vmem:[%s12397_s4 + $0x12c] sm:$0xf0] }
 0x4db   :  { %v3723_v17 = vsel %vm3722_vm2, %v9363_v46, %v3719_v21  ;;  %4145 = vmatpush.bf16.msra.mxu2 %v7839_v51  ;;  %v7798_v46 = vld [vmem:[%s12397_s4 + $0xc8] sm:$0xf]  ;;  %3953 = vmatpush.bf16.msra.mxu0 %v7732_v11  ;;  %v3872_v21 = vunpack.c.h.b16 %v11416_v18  ;;  %v3893_v10 = vpack.c.b16 %v3871_v22, %v3871_v22  ;;  %v7832_v11 = vld [vmem:[%s12397_s4 + $0x110] sm:$0xf0]  ;;  %v9069_v18 = vld [vmem:[%s12397_s4 + $0x4] sm:$0xf]  ;;  %v4092_v35 = vunpack.c.l.b16 %v7779_v29 }
 0x4dc   :  { %v3728_v33 = vsel %vm3725_vm9, %v3727_v8, %v3723_v17  ;;  %v7799_v2 = vor.u32 %v9094_v3, %v7798_v46  ;;  %v9147_v38 = vld [vmem:[%s12397_s4 + $0x28c] sm:$0xf]  ;;  %v8149_v22 = vld [vmem:[%s12397_s4 + $0x318] sm:$0xf0]  ;;  %v7846_v43 = vld [vmem:[%s12397_s4 + $0x128] sm:$0xf] }
 0x4dd   :  { %v3735_v6 = vpack.c.bf16 %v3728_v33, %v3698_v27  ;;  %v3894_v16 = vpack.c.b16 %v3872_v21, %v3872_v21  ;;  %v9123_v27 = vld [vmem:[%s12397_s4 + $0x1c4] sm:$0xf]  ;;  %v7943_v33 = vld [vmem:[%s12397_s4 + $0x1c8] sm:$0xf0]  ;;  %v3919_v19 = vsel %vm808_vm7, %v3893_v10, 0  ;;  %vm12439_vm9 = vcmask 254976  }
 0x4de   :  { %v7946_v34 = vor.u32 %v9123_v27, %v7943_v33  ;;  %v9099_v21 = vld [vmem:[%s12397_s4 + $0xfc] sm:$0xf]  ;;  %3943 = vmatpush.bf16.msrb.mxu3 %v3919_v19  ;;  %v7743_v27 = vld [vmem:[%s12397_s4 + $0x80] sm:$0xf]  ;;  %v9086_v33 = vld [vmem:[%s12397_s4 + $0x84] sm:$0xf0] }
 0x4df   :  { %v3748_v14 = vsel %vm631_vm8, %v3735_v6, 0  ;;  %4146 = vmatpush.bf16.msra.mxu2 %v7831_v53  ;;  %3954 = vmatpush.bf16.msra.mxu0 %v7724_v24  ;;  %v3922_v17 = vsel %vm808_vm7, %v3894_v16, 0  ;;  %v7745_v6 = vld [vmem:[%s12397_s4 + $0x88] sm:$0xf0]  ;;  %v7835_v24 = vor.u32 %v9101_v9, %v7832_v11  ;;  %v7827_v28 = vor.u32 %v9099_v21, %v7824_v25  ;;  %v7800_v10 = vld [vmem:[%s12397_s4 + $0xd0] sm:$0xf0] }
 0x4e0   :  { %3770 = vmatpush.bf16.msra.mxu1 %v3748_v14  ;;  %v7748_v14 = vor.u32 %v9085_v32, %v7745_v6  ;;  %v7927_v53 = vld [vmem:[%s12397_s4 + $0x1a8] sm:$0xf0]  ;;  %v4093_v32 = vunpack.c.h.b16 %v7779_v29  ;;  %v7744_v6 = vor.u32 %v9086_v33, %v7743_v27  ;;  %v9128_v21 = vld [vmem:[%s12397_s4 + $0x1e4] sm:$0xf0]  ;;  %v9159_v25 = vld [vmem:[%s12397_s4 + $0x2f4] sm:$0xf] }
 0x4e1   :  { %v7930_v56 = vor.u32 %v9119_v52, %v7927_v53  ;;  %v7854_v52 = vld [vmem:[%s12397_s4 + $0x138] sm:$0xf]  ;;  %v9093_v9 = vld [vmem:[%s12397_s4 + $0xcc] sm:$0xf]  ;;  %v7784_v33 = vld [vmem:[%s12397_s4 + $0xb0] sm:$0xf0] }
 0x4e2   :  { %v7803_v19 = vor.u32 %v9093_v9, %v7800_v10  ;;  %v9126_v29 = vld [vmem:[%s12397_s4 + $0x1d4] sm:$0xf0]  ;;  %v9089_v27 = vld [vmem:[%s12397_s4 + $0xac] sm:$0xf]  ;;  %v8044_v10 = vld [vmem:[%s12397_s4 + $0x268] sm:$0xf] }
 0x4e3   :  { %4147 = vmatpush.bf16.msra.mxu2 %v7823_v57  ;;  %3955 = vmatpush.bf16.msra.mxu0 %v7716_v23  ;;  %v9117_v57 = vld [vmem:[%s12397_s4 + $0x194] sm:$0xf] }
 0x4e4   :  { %3771 = vmatpush.bf16.msra.mxu1 %v3733_v50  ;;  %v9121_v50 = vld [vmem:[%s12397_s4 + $0x1b4] sm:$0xf] }
 0x4e5   :  { %v7938_v44 = vor.u32 %v9121_v50, %v7935_v42  ;;  %v9107_v42 = vld [vmem:[%s12397_s4 + $0x13c] sm:$0xf] }
 0x4e7   :  { %7676 = vmatmul.msk.bf16.vlgmr.msra.gmra.mxu1 %vm627_vm3, %v11224_v62  ;;  %v9098_v62 = vld [vmem:[%s12397_s4 + $0xec] sm:$0xf0]  ;;  %3956 = vmatpush.bf16.msra.mxu0 %v7708_v36 }
 0x4e8   :  { %v7815_v58 = vor.u32 %v9098_v62, %v7814_v12  ;;  %v3759_v13 = vpop.f32.mrf.mxu3  ;;  %3971 = vmatpush.bf16.msrb.mxu1 %v3922_v17  ;;  %v7919_v12 = vld [vmem:[%s12397_s4 + $0x198] sm:$0xf0] }
 0x4e9   :  { %3778 = vst [vmem:[#allocation2] sm:$0xff] %v3759_v13  ;;  %v7887_v17 = vld [vmem:[%s12397_s4 + $0x158] sm:$0xf0] }
 0x4ea   :  { %4148 = vmatpush.bf16.msra.mxu2 %v7815_v58  ;;  %v7922_v58 = vor.u32 %v9117_v57, %v7919_v12  ;;  %v7890_v36 = vor.u32 %v9109_v20, %v7887_v17  ;;  %v9095_v57 = vld [vmem:[%s12397_s4 + $0xdc] sm:$0xf] }
 0x4eb   :  { %3957 = vmatpush.bf16.msra.mxu0 %v7700_v47  ;;  %v9097_v47 = vld [vmem:[%s12397_s4 + $0xec] sm:$0xf]  ;;  %v8133_v17 = vld [vmem:[%s12397_s4 + $0x2f8] sm:$0xf0] }
 0x4ec   :  { %3972 = vmatpush.bf16.msrb.mxu1 %v7756_v1  ;;  %v4539_v1 = vpack.c.b16 %v4517_v60, %v4517_v60  ;;  %v8141_v60 = vld [vmem:[%s12397_s4 + $0x308] sm:$0xf0] }
 0x4ee   :  { %4149 = vmatpush.bf16.msra.mxu2 %v7807_v61  ;;  %v7911_v61 = vld [vmem:[%s12397_s4 + $0x188] sm:$0xf0] }
 0x4ef   :  { %v7914_v3 = vor.u32 %v9115_v59, %v7911_v61  ;;  %3958 = vmatpush.bf16.msra.mxu0 %v7692_v55  ;;  %v7808_v59 = vld [vmem:[%s12397_s4 + $0xe0] sm:$0xf0] }
 0x4f0   :  { %v3761_v8 = vpop.f32.mrf.mxu3  ;;  %v3989_v0 = vld [vmem:[#allocation2] sm:$0xfe]  ;;  %3973 = vmatpush.bf16.msrb.mxu1 %v7748_v14 }
 0x4f1   :  { %3780 = vst [vmem:[#allocation2 + $0x10] sm:$0x3f] %v3761_v8  ;;  %v7684_v8 = vor.u32 %v9069_v18, %v7681_v49  ;;  %v4205_v37 = vld [vmem:[#allocation2] sm:$0xfc]  ;;  %v7847_v18 = vor.u32 %v9106_v45, %v7846_v43  ;;  %v7959_v45 = vld [vmem:[%s12397_s4 + $0x1e8] sm:$0xf0] }
 0x4f2   :  { %4150 = vmatpush.bf16.msra.mxu2 %v7799_v2  ;;  %v7903_v2 = vld [vmem:[%s12397_s4 + $0x178] sm:$0xf0]  ;;  %v8054_v61 = vld [vmem:[%s12397_s4 + $0x280] sm:$0xf0]  ;;  %v7957_v49 = vld [vmem:[%s12397_s4 + $0x1e0] sm:$0xf] }
 0x4f3   :  { %3959 = vmatpush.bf16.msra.mxu0 %v7684_v8  ;;  %v7958_v20 = vor.u32 %v9128_v21, %v7957_v49  ;;  %v9127_v43 = vld [vmem:[%s12397_s4 + $0x1e4] sm:$0xf]  ;;  %v9125_v49 = vld [vmem:[%s12397_s4 + $0x1d4] sm:$0xf] }
 0x4f4   :  { %4173 = vmatpush.bf16.msra.mxu1 %v7843_v30  ;;  %v7816_v30 = vld [vmem:[%s12397_s4 + $0xf0] sm:$0xf0] }
 0x4f5   :  { %v7819_v50 = vor.u32 %v9097_v47, %v7816_v30  ;;  %v8117_v47 = vld [vmem:[%s12397_s4 + $0x2d8] sm:$0xf0] }
 0x4f6   :  { %4151 = vmatpush.bf16.msra.mxu2 %v7791_v41  ;;  %v7895_v41 = vld [vmem:[%s12397_s4 + $0x168] sm:$0xf0] }
 0x4f7   :  { %v7898_v23 = vor.u32 %v9111_v4, %v7895_v41  ;;  %v7848_v4 = vld [vmem:[%s12397_s4 + $0x130] sm:$0xf0] }
 0x4f8   :  { %v3785_v26 = vld [vmem:[#allocation2 + $0x10] sm:$0x3]  ;;  %4174 = vmatpush.bf16.msra.mxu1 %v7835_v24  ;;  %v9163_v41 = vld [vmem:[%s12397_s4 + $0x314] sm:$0xf] }
 0x4f9   :  { %v3991_v31 = vld [vmem:[#allocation2 + $0x10] sm:$0x7]  ;;  %v11462_v48 = vpack.c.bf16 %v3785_v26, %v3759_v13  ;;  %v4567_v26 = vsel %vm808_vm7, %v4539_v1, 0 }
 0x4fa   :  { %4152 = vmatpush.bf16.msra.mxu2 %v7783_v7  ;;  %v3993_v51 = vpack.c.bf16 %v3991_v31, %v3989_v0  ;;  %v7906_v7 = vor.u32 %v9113_v63, %v7903_v2  ;;  %v7751_v13 = vld [vmem:[%s12397_s4 + $0x90] sm:$0xf]  ;;  %v4115_v0 = vpack.c.b16 %v4093_v32, %v4093_v32  ;;  %v4114_v31 = vpack.c.b16 %v4092_v35, %v4092_v35  ;;  %v9105_v2 = vld [vmem:[%s12397_s4 + $0x12c] sm:$0xf] }
 0x4fb   :  { %3932 = vmatmul.bf16.vlgmr.msrb.gmra.mxu2 %v11462_v48  ;;  %v7752_v16 = vor.u32 %v9088_v15, %v7751_v13  ;;  %v4207_v39 = vld [vmem:[#allocation2 + $0x10] sm:$0xf]  ;;  %3960 = vmatmul.bf16.vlgmr.msra.gmra.mxu0 %v11462_v48  ;;  %v7811_v63 = vor.u32 %v9095_v57, %v7808_v59  ;;  %v7851_v11 = vor.u32 %v9105_v2, %v7848_v4  ;;  %v9161_v15 = vld [vmem:[%s12397_s4 + $0x304] sm:$0xf]  ;;  %v8093_v57 = vld [vmem:[%s12397_s4 + $0x2a8] sm:$0xf0] }
 0x4fc   :  { %v4019_v54 = vshll.u32 %v3993_v51, 16  ;;  %v4017_v62 = vshrl.u32 %v3993_v51, 16  ;;  %4175 = vmatpush.bf16.msra.mxu1 %v7827_v28  ;;  %v4209_v14 = vpack.c.bf16 %v4207_v39, %v4205_v37  ;;  %v11585_v48 = vld [vmem:[%s12397_s4 + $0x1f0] sm:$0xff]  ;;  %v4143_v53 = vsel %vm808_vm7, %v4115_v0, 0  ;;  %v8125_v37 = vld [vmem:[%s12397_s4 + $0x2e8] sm:$0xf0] }
 0x4fd   :  { %3944 = vmatpush.bf16.msrb.mxu3 %v7752_v16  ;;  %v4298_v12 = vunpack.c.l.b16 %v11585_v48  ;;  %4192 = vmatpush.bf16.msrb.mxu0 %v4143_v53  ;;  %v8152_v13 = vor.u32 %v9163_v41, %v8149_v22  ;;  %v7792_v16 = vld [vmem:[%s12397_s4 + $0xc0] sm:$0xf0]  ;;  %v8144_v8 = vor.u32 %v9161_v15, %v8141_v60  ;;  %v7949_v1 = vld [vmem:[%s12397_s4 + $0x1d0] sm:$0xf]  ;;  %v7787_v39 = vor.u32 %v9089_v27, %v7784_v33  ;;  %v9122_v41 = vld [vmem:[%s12397_s4 + $0x1b4] sm:$0xf0] }
 0x4fe   :  { %4379 = vmatpush.bf16.msrb.mxu2 %v7946_v34  ;;  %v4021_v40 = vrot.slane %v4019_v54, 1  ;;  %v8062_v34 = vld [vmem:[%s12397_s4 + $0x290] sm:$0xf0]  ;;  %v11574_v51 = vrot.slane %v4209_v14, 1  ;;  %v4140_v54 = vsel %vm808_vm7, %v4114_v31, 0  ;;  %v7950_v32 = vor.u32 %v9126_v29, %v7949_v1 }
 0x4ff   :  { %v9155_v14 = vld [vmem:[%s12397_s4 + $0x2d4] sm:$0xf]  ;;  %v4299_v0 = vunpack.c.h.b16 %v11585_v48  ;;  %v7941_v48 = vld [vmem:[%s12397_s4 + $0x1c0] sm:$0xf]  ;;  %v9144_v15 = vld [vmem:[%s12397_s4 + $0x26c] sm:$0xf0] }
 0x500   :  { %v11489_v46 = vor.u32 %v4021_v40, %v4017_v62  ;;  %v8065_v62 = vor.u32 %v9147_v38, %v8062_v34  ;;  %v9145_v40 = vld [vmem:[%s12397_s4 + $0x27c] sm:$0xf]  ;;  %4176 = vmatpush.bf16.msra.mxu1 %v7819_v50  ;;  %v8120_v30 = vor.u32 %v9155_v14, %v8117_v47  ;;  %v8109_v34 = vld [vmem:[%s12397_s4 + $0x2c8] sm:$0xf0]  ;;  %v8036_v1 = vld [vmem:[%s12397_s4 + $0x258] sm:$0xf] }
 0x501   :  { %3945 = vmatpush.bf16.msrb.mxu3 %v7744_v6  ;;  %v8057_v55 = vor.u32 %v9145_v40, %v8054_v61  ;;  %v9157_v6 = vld [vmem:[%s12397_s4 + $0x2e4] sm:$0xf]  ;;  %v9142_v29 = vld [vmem:[%s12397_s4 + $0x25c] sm:$0xf0]  ;;  %v9116_v14 = vld [vmem:[%s12397_s4 + $0x184] sm:$0xf0] }
 0x502   :  { %4380 = vmatpush.bf16.msrb.mxu2 %v7938_v44  ;;  %v7856_v44 = vld [vmem:[%s12397_s4 + $0x140] sm:$0xf0]  ;;  %v8128_v38 = vor.u32 %v9157_v6, %v8125_v37  ;;  %v8037_v6 = vor.u32 %v9142_v29, %v8036_v1  ;;  %v8028_v37 = vld [vmem:[%s12397_s4 + $0x248] sm:$0xf]  ;;  %v9143_v47 = vld [vmem:[%s12397_s4 + $0x26c] sm:$0xf] }
 0x503   :  { %v8014_v1 = vld [vmem:[%s12397_s4 + $0x230] sm:$0xf0] }
 0x504   :  { %4177 = vmatpush.bf16.msra.mxu1 %v7811_v63 }
 0x505   :  { %4164 = vmatpush.bf16.msra.mxu3 %v4140_v54  ;;  %v9124_v54 = vld [vmem:[%s12397_s4 + $0x1c4] sm:$0xf0] }
 0x506   :  { %4381 = vmatpush.bf16.msrb.mxu2 %v7930_v56  ;;  %v9108_v56 = vld [vmem:[%s12397_s4 + $0x13c] sm:$0xf0] }
 0x508   :  { %4178 = vmatpush.bf16.msra.mxu1 %v7803_v19  ;;  %v7962_v19 = vor.u32 %v9127_v43, %v7959_v45 }
 0x50a   :  { %4382 = vmatpush.bf16.msrb.mxu2 %v7922_v58  ;;  %v7859_v58 = vor.u32 %v9107_v42, %v7856_v44  ;;  %v9151_v42 = vld [vmem:[%s12397_s4 + $0x2b4] sm:$0xf]  ;;  %v8101_v44 = vld [vmem:[%s12397_s4 + $0x2b8] sm:$0xf0] }
 0x50b   :  { %4153 = vmatmul.bf16.vlgmr.msra.gmra.mxu2 %v11489_v46  ;;  %v8104_v53 = vor.u32 %v9151_v42, %v8101_v44  ;;  %v7901_v44 = vld [vmem:[%s12397_s4 + $0x170] sm:$0xf] }
 0x50c   :  { %4193 = vmatpush.bf16.msrb.mxu0 %v7859_v58 }
 0x50e   :  { %4383 = vmatpush.bf16.msrb.mxu2 %v7914_v3  ;;  %v7855_v3 = vor.u32 %v9108_v56, %v7854_v52  ;;  %v4321_v52 = vpack.c.b16 %v4299_v0, %v4299_v0  ;;  %v9149_v56 = vld [vmem:[%s12397_s4 + $0x2a4] sm:$0xf]  ;;  %v9138_v0 = vld [vmem:[%s12397_s4 + $0x23c] sm:$0xf0] }
 0x50f   :  { %v8096_v9 = vor.u32 %v9149_v56, %v8093_v57  ;;  %v8038_v56 = vld [vmem:[%s12397_s4 + $0x260] sm:$0xf0] }
 0x510   :  { %4165 = vmatpush.bf16.msra.mxu3 %v7855_v3  ;;  %4194 = vmatpush.bf16.msrb.mxu0 %v7851_v11  ;;  %v4349_v59 = vsel %vm808_vm7, %v4321_v52, 0  ;;  %v7942_v3 = vor.u32 %v9124_v54, %v7941_v48  ;;  %v9114_v48 = vld [vmem:[%s12397_s4 + $0x174] sm:$0xf0]  ;;  %v9141_v54 = vld [vmem:[%s12397_s4 + $0x25c] sm:$0xf] }
 0x512   :  { %4384 = vmatpush.bf16.msrb.mxu2 %v7906_v7  ;;  %v4320_v7 = vpack.c.b16 %v4298_v12, %v4298_v12 }
 0x514   :  { %v4346_v24 = vsel %vm808_vm7, %v4320_v7, 0  ;;  %4166 = vmatpush.bf16.msra.mxu3 %v7847_v18  ;;  %v9120_v18 = vld [vmem:[%s12397_s4 + $0x1a4] sm:$0xf0] }
 0x515   :  { %4370 = vmatpush.bf16.msra.mxu0 %v4346_v24  ;;  %v7925_v24 = vld [vmem:[%s12397_s4 + $0x1a0] sm:$0xf] }
 0x516   :  { %4385 = vmatpush.bf16.msrb.mxu2 %v7898_v23  ;;  %v9091_v23 = vld [vmem:[%s12397_s4 + $0xbc] sm:$0xf]  ;;  %v7926_v27 = vor.u32 %v9120_v18, %v7925_v24  ;;  %v8022_v24 = vld [vmem:[%s12397_s4 + $0x240] sm:$0xf0] }
 0x517   :  { %v7795_v28 = vor.u32 %v9091_v23, %v7792_v16  ;;  %v11838_v18 = vld [vmem:[%s12397_s4 + $0x340] sm:$0xff] }
 0x519   :  { %4371 = vmatpush.bf16.msra.mxu0 %v7958_v20  ;;  %4179 = vmatpush.bf16.msra.mxu1 %v7795_v28  ;;  %v8045_v20 = vor.u32 %v9144_v15, %v8044_v10  ;;  %v9134_v10 = vld [vmem:[%s12397_s4 + $0x21c] sm:$0xf0]  ;;  %v4413_v15 = vld [vmem:[#allocation2 + $0x10] sm:$0x1f] }
 0x51a   :  { %4386 = vmatpush.bf16.msrb.mxu2 %v7890_v36  ;;  %v8136_v36 = vor.u32 %v9159_v25, %v8133_v17  ;;  %v7951_v25 = vld [vmem:[%s12397_s4 + $0x1d8] sm:$0xf0] }
 0x51b   :  { %v7954_v33 = vor.u32 %v9125_v49, %v7951_v25 }
 0x51d   :  { %4387 = vmatmul.bf16.vlgmr.msrb.gmra.mxu2 %v11574_v51  ;;  %4372 = vmatpush.bf16.msra.mxu0 %v7950_v32  ;;  %v9118_v32 = vld [vmem:[%s12397_s4 + $0x194] sm:$0xf0] }
 0x51e   :  { %4616 = vmatpush.bf16.msra.mxu2 %v4567_v26  ;;  %4180 = vmatpush.bf16.msra.mxu1 %v7787_v39  ;;  %v9153_v26 = vld [vmem:[%s12397_s4 + $0x2c4] sm:$0xf]  ;;  %v9140_v39 = vld [vmem:[%s12397_s4 + $0x24c] sm:$0xf0] }
 0x51f   :  { %v8112_v50 = vor.u32 %v9153_v26, %v8109_v34  ;;  %v8029_v26 = vor.u32 %v9140_v39, %v8028_v37  ;;  %v8020_v34 = vld [vmem:[%s12397_s4 + $0x238] sm:$0xf] }
 0x520   :  { %v8021_v57 = vor.u32 %v9138_v0, %v8020_v34  ;;  %v8052_v34 = vld [vmem:[%s12397_s4 + $0x278] sm:$0xf]  ;;  %v9146_v0 = vld [vmem:[%s12397_s4 + $0x27c] sm:$0xf0] }
 0x522   :  { %4617 = vmatpush.bf16.msra.mxu2 %v8065_v62  ;;  %v7933_v62 = vld [vmem:[%s12397_s4 + $0x1b0] sm:$0xf] }
 0x523   :  { %v7934_v60 = vor.u32 %v9122_v41, %v7933_v62 }
 0x526   :  { %4618 = vmatpush.bf16.msra.mxu2 %v8057_v55 }
 0x52a   :  { %4803 = vmatpush.bf16.msrb.mxu2 %v8152_v13 }
 0x52e   :  { %4804 = vmatpush.bf16.msrb.mxu2 %v8144_v8 }
 0x532   :  { %4805 = vmatpush.bf16.msrb.mxu2 %v8136_v36  ;;  %v7917_v36 = vld [vmem:[%s12397_s4 + $0x190] sm:$0xf] }
 0x536   :  { %4806 = vmatpush.bf16.msrb.mxu2 %v8128_v38  ;;  %v7909_v38 = vld [vmem:[%s12397_s4 + $0x180] sm:$0xf] }
 0x53a   :  { %4807 = vmatpush.bf16.msrb.mxu2 %v8120_v30  ;;  %v8046_v30 = vld [vmem:[%s12397_s4 + $0x270] sm:$0xf0] }
 0x53b   :  { %v8049_v42 = vor.u32 %v9143_v47, %v8046_v30  ;;  %v9133_v47 = vld [vmem:[%s12397_s4 + $0x21c] sm:$0xf]  ;;  %v8006_v30 = vld [vmem:[%s12397_s4 + $0x220] sm:$0xf0] }
 0x53e   :  { %4808 = vmatpush.bf16.msrb.mxu2 %v8112_v50  ;;  %v7910_v50 = vor.u32 %v9116_v14, %v7909_v38 }
 0x542   :  { %4809 = vmatpush.bf16.msrb.mxu2 %v8104_v53  ;;  %v4631_v53 = vld [vmem:[#allocation2 + $0x10] sm:$0x3f] }
 0x546   :  { %4810 = vmatpush.bf16.msrb.mxu2 %v8096_v9  ;;  %v8004_v9 = vld [vmem:[%s12397_s4 + $0x218] sm:$0xf] }
 0x564   :  { %v3773_v35 = vpop.f32.mrf.mxu1 }
 0x565   :  { %3779 = vst.msk [vmem:[#allocation2 + $0x8] sm:$0xff] %vm667_vm6, %v3773_v35  ;;  %v7918_v35 = vor.u32 %v9118_v32, %v7917_v36  ;;  %v9148_v36 = vld [vmem:[%s12397_s4 + $0x28c] sm:$0xf0]  ;;  %v7988_v32 = vld [vmem:[%s12397_s4 + $0x1f8] sm:$0xf] }
 0x56c   :  { %v3775_v31 = vpop.f32.mrf.mxu1  ;;  %v3784_v12 = vld [vmem:[#allocation2 + $0x8] sm:$0xff] }
 0x56d   :  { %3781 = vst.msk [vmem:[#allocation2 + $0x18] sm:$0x3f] %vm670_vm11, %v3775_v31  ;;  %v3990_v40 = vld [vmem:[#allocation2 + $0x8] sm:$0xfe]  ;;  %v4629_v31 = vld [vmem:[#allocation2] sm:$0xf0] }
 0x56e   :  { %v4412_v58 = vld [vmem:[#allocation2 + $0x8] sm:$0xf8] }
 0x574   :  { %v3786_v61 = vld [vmem:[#allocation2 + $0x18] sm:$0x3] }
 0x575   :  { %v3992_v63 = vld [vmem:[#allocation2 + $0x18] sm:$0x7]  ;;  %v3788_v4 = vpack.c.bf16 %v3786_v61, %v3784_v12  ;;  %v4206_v12 = vld [vmem:[#allocation2 + $0x8] sm:$0xfc]  ;;  %v7902_v61 = vor.u32 %v9114_v48, %v7901_v44 }
 0x576   :  { %v4414_v2 = vld [vmem:[#allocation2 + $0x18] sm:$0x1f]  ;;  %v3994_v22 = vpack.c.bf16 %v3992_v63, %v3990_v40  ;;  %v4633_v40 = vpack.c.bf16 %v4631_v53, %v4629_v31  ;;  %v7893_v63 = vld [vmem:[%s12397_s4 + $0x160] sm:$0xf] }
 0x577   :  { %v4416_v7 = vpack.c.bf16 %v4414_v2, %v4412_v58  ;;  %7757 = vmatmul.msk.bf16.vlgmr.msrb.gmra.mxu3 %vm667_vm6, %v3788_v4  ;;  %7758 = vmatmul.msk.bf16.vlgmr.msrb.gmra.mxu1 %vm667_vm6, %v3788_v4  ;;  %v4208_v52 = vld [vmem:[#allocation2 + $0x18] sm:$0xf]  ;;  %v8012_v58 = vld [vmem:[%s12397_s4 + $0x228] sm:$0xf]  ;;  %v9139_v2 = vld [vmem:[%s12397_s4 + $0x24c] sm:$0xf] }
 0x578   :  { %v4026_v55 = vshll.u32 %v3994_v22, 16  ;;  %4351 = vmatpush.bf16.msrb.mxu3 %v7942_v3  ;;  %4398 = vmatpush.bf16.msrb.mxu1 %v4349_v59  ;;  %v4024_v21 = vshrl.u32 %v3994_v22, 16  ;;  %v4210_v62 = vpack.c.bf16 %v4208_v52, %v4206_v12  ;;  %v9136_v59 = vld [vmem:[%s12397_s4 + $0x22c] sm:$0xf0]  ;;  %v8041_v3 = vor.u32 %v9141_v54, %v8038_v56  ;;  %v8030_v4 = vld [vmem:[%s12397_s4 + $0x250] sm:$0xf0] }
 0x579   :  { %v4447_v11 = vshrl.u32 %v4416_v7, 16  ;;  %v4450_v13 = vshll.u32 %v4416_v7, 16  ;;  %v8013_v41 = vor.u32 %v9136_v59, %v8012_v58  ;;  %v4516_v22 = vunpack.c.l.b16 %v11508_v5  ;;  %v4411_v7 = vld [vmem:[#allocation2] sm:$0xf8]  ;;  %v7885_v5 = vld [vmem:[%s12397_s4 + $0x150] sm:$0xf] }
 0x57a   :  { %v4028_v23 = vrot.slane %v4026_v55, 1  ;;  %v4235_v43 = vrot.slane %v4210_v62, 1  ;;  %v11813_v45 = vrot.slane %v4633_v40, 2  ;;  %v9164_v44 = vld [vmem:[%s12397_s4 + $0x314] sm:$0xf0]  ;;  %v8009_v52 = vor.u32 %v9133_v47, %v8006_v30 }
 0x57b   :  { %v4449_v16 = vrot.slane %v4447_v11, 1  ;;  %v4452_v8 = vrot.slane %v4450_v13, 2  ;;  %v8033_v11 = vor.u32 %v9139_v2, %v8030_v4  ;;  %v9110_v13 = vld [vmem:[%s12397_s4 + $0x154] sm:$0xf0]  ;;  %v4538_v49 = vpack.c.b16 %v4516_v22, %v4516_v22  ;;  %v9131_v56 = vld [vmem:[%s12397_s4 + $0x20c] sm:$0xf] }
 0x57c   :  { %v4029_v17 = vor.u32 %v4028_v23, %v4024_v21  ;;  %4352 = vmatpush.bf16.msrb.mxu3 %v7934_v60  ;;  %4399 = vmatpush.bf16.msrb.mxu1 %v7962_v19  ;;  %v9137_v60 = vld [vmem:[%s12397_s4 + $0x23c] sm:$0xf]  ;;  %v8005_v19 = vor.u32 %v9134_v10, %v8004_v9  ;;  %v7996_v21 = vld [vmem:[%s12397_s4 + $0x208] sm:$0xf]  ;;  %v9132_v23 = vld [vmem:[%s12397_s4 + $0x20c] sm:$0xf0]  ;;  %v8053_v54 = vor.u32 %v9146_v0, %v8052_v34  ;;  %v4723_v62 = vunpack.c.h.b16 %v11838_v18 }
 0x57d   :  { %v11739_v28 = vor.u32 %v4452_v8, %v4449_v16  ;;  %v4415_v16 = vpack.c.bf16 %v4413_v15, %v4411_v7  ;;  %v7886_v8 = vor.u32 %v9110_v13, %v7885_v5  ;;  %v8025_v25 = vor.u32 %v9137_v60, %v8022_v24  ;;  %v9168_v48 = vld [vmem:[%s12397_s4 + $0x334] sm:$0xf0]  ;;  %v8139_v58 = vld [vmem:[%s12397_s4 + $0x300] sm:$0xf]  ;;  %v9162_v59 = vld [vmem:[%s12397_s4 + $0x304] sm:$0xf0] }
 0x57e   :  { %7861 = vmatmul.msk.bf16.vlgmr.msrb.gmra.mxu0 %vm667_vm6, %v4029_v17  ;;  %v4564_v29 = vsel %vm808_vm7, %v4538_v49, 0  ;;  %v9129_v2 = vld [vmem:[%s12397_s4 + $0x1fc] sm:$0xf]  ;;  %v7990_v4 = vld [vmem:[%s12397_s4 + $0x200] sm:$0xf0]  ;;  %v4745_v22 = vpack.c.b16 %v4723_v62, %v4723_v62 }
 0x57f   :  { %8067 = vmatmul.msk.bf16.vlgmr.msra.gmra.mxu2 %vm667_vm6, %v11739_v28  ;;  %4569 = vmatpush.bf16.msrb.mxu0 %v8045_v20  ;;  %v4722_v20 = vunpack.c.l.b16 %v11838_v18  ;;  %v4439_v37 = vshrl.u32 %v4415_v16, 16  ;;  %v4442_v39 = vshll.u32 %v4415_v16, 16  ;;  %v8131_v7 = vld [vmem:[%s12397_s4 + $0x2f0] sm:$0xf]  ;;  %v7993_v10 = vor.u32 %v9129_v2, %v7990_v4  ;;  %v9167_v5 = vld [vmem:[%s12397_s4 + $0x334] sm:$0xf] }
 0x580   :  { %4353 = vmatpush.bf16.msrb.mxu3 %v7926_v27  ;;  %4400 = vmatpush.bf16.msrb.mxu1 %v7954_v33  ;;  %v7997_v27 = vor.u32 %v9132_v23, %v7996_v21  ;;  %v8060_v33 = vld [vmem:[%s12397_s4 + $0x288] sm:$0xf]  ;;  %v8165_v13 = vld [vmem:[%s12397_s4 + $0x338] sm:$0xf0]  ;;  %v8123_v15 = vld [vmem:[%s12397_s4 + $0x2e0] sm:$0xf] }
 0x581   :  { %v4744_v38 = vpack.c.b16 %v4722_v20, %v4722_v20  ;;  %v8061_v14 = vor.u32 %v9148_v36, %v8060_v33  ;;  %v4441_v31 = vrot.slane %v4439_v37, 1  ;;  %v9158_v60 = vld [vmem:[%s12397_s4 + $0x2e4] sm:$0xf0]  ;;  %v4632_v24 = vld [vmem:[#allocation2 + $0x18] sm:$0x3f]  ;;  %v8168_v18 = vor.u32 %v9167_v5, %v8165_v13 }
 0x582   :  { %v4630_v49 = vld [vmem:[#allocation2 + $0x8] sm:$0xf0]  ;;  %v9165_v21 = vld [vmem:[%s12397_s4 + $0x324] sm:$0xf]  ;;  %v8115_v16 = vld [vmem:[%s12397_s4 + $0x2d0] sm:$0xf] }
 0x583   :  { %4570 = vmatpush.bf16.msrb.mxu0 %v8037_v6  ;;  %v9130_v6 = vld [vmem:[%s12397_s4 + $0x1fc] sm:$0xf0]  ;;  %v4770_v53 = vsel %vm808_vm7, %v4744_v38, 0  ;;  %v8157_v23 = vld [vmem:[%s12397_s4 + $0x328] sm:$0xf0] }
 0x584   :  { %4354 = vmatpush.bf16.msrb.mxu3 %v7918_v35  ;;  %v8160_v20 = vor.u32 %v9165_v21, %v8157_v23  ;;  %v8099_v33 = vld [vmem:[%s12397_s4 + $0x2b0] sm:$0xf]  ;;  %v9152_v36 = vld [vmem:[%s12397_s4 + $0x2b4] sm:$0xf0]  ;;  %v9150_v37 = vld [vmem:[%s12397_s4 + $0x2a4] sm:$0xf0] }
 0x587   :  { %4571 = vmatpush.bf16.msrb.mxu0 %v8029_v26  ;;  %7860 = vmatmul.msk.bf16.vlgmr.msra.gmra.mxu3 %vm667_vm6, %v4029_v17  ;;  %v9135_v17 = vld [vmem:[%s12397_s4 + $0x22c] sm:$0xf]  ;;  %v7989_v26 = vor.u32 %v9130_v6, %v7988_v32  ;;  %v8100_v32 = vor.u32 %v9152_v36, %v8099_v33  ;;  %v8091_v6 = vld [vmem:[%s12397_s4 + $0x2a0] sm:$0xf] }
 0x588   :  { %4181 = vmatmul.bf16.vlgmr.msra.gmra.mxu1 %v11489_v46  ;;  %4355 = vmatpush.bf16.msrb.mxu3 %v7910_v50  ;;  %v9112_v46 = vld [vmem:[%s12397_s4 + $0x164] sm:$0xf0]  ;;  %v8017_v35 = vor.u32 %v9135_v17, %v8014_v1  ;;  %v4444_v50 = vrot.slane %v4442_v39, 2  ;;  %v8092_v39 = vor.u32 %v9150_v37, %v8091_v6 }
 0x589   :  { %4597 = vmatpush.bf16.msra.mxu1 %v8049_v42  ;;  %v7894_v55 = vor.u32 %v9112_v46, %v7893_v63  ;;  %v8147_v42 = vld [vmem:[%s12397_s4 + $0x310] sm:$0xf]  ;;  %v8155_v63 = vld [vmem:[%s12397_s4 + $0x320] sm:$0xf]  ;;  %v9166_v46 = vld [vmem:[%s12397_s4 + $0x324] sm:$0xf0] }
 0x58a   :  { %v8148_v12 = vor.u32 %v9164_v44, %v8147_v42  ;;  %v4445_v40 = vor.u32 %v4444_v50, %v4441_v31  ;;  %v8156_v9 = vor.u32 %v9166_v46, %v8155_v63 }
 0x58b   :  { %4572 = vmatpush.bf16.msrb.mxu0 %v8021_v57  ;;  %v7998_v57 = vld [vmem:[%s12397_s4 + $0x210] sm:$0xf0] }
 0x58c   :  { %4356 = vmatpush.bf16.msrb.mxu3 %v7902_v61 }
 0x58d   :  { %4598 = vmatpush.bf16.msra.mxu1 %v8041_v3  ;;  %v8001_v3 = vor.u32 %v9131_v56, %v7998_v57 }
 0x58e   :  { %7963 = vmatmul.msk.bf16.vlgmr.msra.gmra.mxu0 %vm667_vm6, %v4235_v43 }
 0x58f   :  { %4811 = vmatmul.bf16.vlgmr.msrb.gmra.mxu2 %v11813_v45  ;;  %4573 = vmatpush.bf16.msrb.mxu0 %v8013_v41  ;;  %v8140_v41 = vor.u32 %v9162_v59, %v8139_v58 }
 0x590   :  { %4357 = vmatpush.bf16.msrb.mxu3 %v7894_v55 }
 0x591   :  { %4599 = vmatpush.bf16.msra.mxu1 %v8033_v11  ;;  %v4773_v11 = vsel %vm808_vm7, %v4745_v22, 0 }
 0x593   :  { %4574 = vmatpush.bf16.msrb.mxu0 %v8005_v19  ;;  %v8124_v19 = vor.u32 %v9158_v60, %v8123_v15 }
 0x594   :  { %4358 = vmatpush.bf16.msrb.mxu3 %v7886_v8  ;;  %v9156_v8 = vld [vmem:[%s12397_s4 + $0x2d4] sm:$0xf0] }
 0x595   :  { %4600 = vmatpush.bf16.msra.mxu1 %v8025_v25  ;;  %v4634_v25 = vpack.c.bf16 %v4632_v24, %v4630_v49  ;;  %v8116_v17 = vor.u32 %v9156_v8, %v8115_v16 }
 0x597   :  { %4575 = vmatpush.bf16.msrb.mxu0 %v7997_v27  ;;  %4359 = vmatmul.bf16.vlgmr.msrb.gmra.mxu3 %v11574_v51  ;;  %v8163_v51 = vld [vmem:[%s12397_s4 + $0x330] sm:$0xf]  ;;  %v4659_v1 = vrot.slane %v4634_v25, 2 }
 0x598   :  { %4588 = vmatpush.bf16.msra.mxu3 %v4564_v29  ;;  %7964 = vmatmul.msk.bf16.vlgmr.msrb.gmra.mxu1 %vm667_vm6, %v4235_v43  ;;  %v8164_v61 = vor.u32 %v9168_v48, %v8163_v51  ;;  %v9160_v43 = vld [vmem:[%s12397_s4 + $0x2f4] sm:$0xf0]  ;;  %v8107_v29 = vld [vmem:[%s12397_s4 + $0x2c0] sm:$0xf] }
 0x599   :  { %4601 = vmatpush.bf16.msra.mxu1 %v8017_v35  ;;  %v8132_v55 = vor.u32 %v9160_v43, %v8131_v7  ;;  %v3933_v35 = vpop.f32.mrf.mxu2 }
 0x59b   :  { %4576 = vmatpush.bf16.msrb.mxu0 %v7989_v26 }
 0x59c   :  { %4589 = vmatpush.bf16.msra.mxu3 %v8061_v14  ;;  %v3961_v14 = vpop.f32.mrf.mxu0 }
 0x59d   :  { %4602 = vmatpush.bf16.msra.mxu1 %v8009_v52 }
 0x59e   :  { %4577 = vmatmul.bf16.vlgmr.msrb.gmra.mxu0 %v4445_v40 }
 0x59f   :  { %4794 = vmatpush.bf16.msra.mxu0 %v4770_v53 }
 0x5a0   :  { %4590 = vmatpush.bf16.msra.mxu3 %v8053_v54 }
 0x5a1   :  { %4603 = vmatpush.bf16.msra.mxu1 %v8001_v3  ;;  %v11972_v38 = vpop.f32.mrf.mxu2  ;;  %v3782_v3 = vld [vmem:[%s12398_s5] sm:$0x3] }
 0x5a2   :  { %v3982_v4 = vperm.slane %v3782_v3, 1  ;;  %v3981_v49 = vperm.slane %v3782_v3, 0  ;;  %v9173_v3 = vld [vmem:[%s12399_s6 + $0x20] sm:$0xff] }
 0x5a3   :  { %4795 = vmatpush.bf16.msra.mxu0 %v8164_v61 }
 0x5a4   :  { %4775 = vmatpush.bf16.msrb.mxu3 %v8148_v12  ;;  %v3963_v26 = vpop.f32.mrf.mxu0 }
 0x5a5   :  { %4604 = vmatpush.bf16.msra.mxu1 %v7993_v10 }
 0x5a7   :  { %4796 = vmatpush.bf16.msra.mxu0 %v8156_v9  ;;  %8066 = vmatmul.msk.bf16.vlgmr.msra.gmra.mxu3 %vm667_vm6, %v11739_v28  ;;  %v9154_v28 = vld [vmem:[%s12397_s4 + $0x2c4] sm:$0xf0] }
 0x5a8   :  { %4776 = vmatpush.bf16.msrb.mxu3 %v8140_v41  ;;  %4605 = vmatmul.bf16.vlgmr.msra.gmra.mxu1 %v4445_v40  ;;  %v8108_v27 = vor.u32 %v9154_v28, %v8107_v29  ;;  %v9176_v28 = vld [vmem:[%s12399_s6 + $0x38] sm:$0xff] }
 0x5a9   :  { %4822 = vmatpush.bf16.msrb.mxu1 %v4773_v11  ;;  %v4154_v30 = vpop.f32.mrf.mxu2 }
 0x5ab   :  { %5007 = vmatpush.bf16.msrb.mxu0 %v9176_v28  ;;  %v9180_v28 = vld [vmem:[%s12399_s6 + $0x58] sm:$0xff] }
 0x5ac   :  { %4777 = vmatpush.bf16.msrb.mxu3 %v8132_v55 }
 0x5ad   :  { %4823 = vmatpush.bf16.msrb.mxu1 %v8168_v18 }
 0x5ae   :  { %8169 = vmatmul.msk.bf16.vlgmr.msra.gmra.mxu0 %vm667_vm6, %v4659_v1 }
 0x5b0   :  { %4778 = vmatpush.bf16.msrb.mxu3 %v8124_v19 }
 0x5b1   :  { %4824 = vmatpush.bf16.msrb.mxu1 %v8160_v20  ;;  %v11974_v31 = vpop.f32.mrf.mxu2 }
 0x5b4   :  { %4779 = vmatpush.bf16.msrb.mxu3 %v8116_v17 }
 0x5b8   :  { %4780 = vmatpush.bf16.msrb.mxu3 %v8108_v27  ;;  %8170 = vmatmul.msk.bf16.vlgmr.msrb.gmra.mxu1 %vm667_vm6, %v4659_v1  ;;  %v9186_v27 = vld [vmem:[%s12399_s6 + $0x88] sm:$0xff] }
 0x5b9   :  { %v4388_v53 = vpop.f32.mrf.mxu2  ;;  %5125 = vmatpush.bf16.msra.mxu1 %v9186_v27 }
 0x5bc   :  { %4781 = vmatpush.bf16.msrb.mxu3 %v8100_v32 }
 0x5c0   :  { %4782 = vmatpush.bf16.msrb.mxu3 %v8092_v39 }
 0x5c1   :  { %v4390_v56 = vpop.f32.mrf.mxu2 }
 0x5c3   :  { %4783 = vmatmul.bf16.vlgmr.msrb.gmra.mxu3 %v11813_v45 }
 0x5f4   :  { %v3975_v47 = vpop.f32.mrf.mxu1 }
 0x5f5   :  { %v3976_v2 = vadd.f32 %v3975_v47, %v3961_v14 }
 0x5f7   :  { %v3986_v43 = vadd.f32 %v3982_v4, %v3976_v2 }
 0x5fa   :  { %v3947_v34 = vpop.f32.mrf.mxu3 }
 0x5fb   :  { %v4196_v50 = vpop.f32.mrf.mxu0  ;;  %v3948_v21 = vadd.f32 %v3947_v34, %v3933_v35 }
 0x5fc   :  { %v3977_v0 = vpop.f32.mrf.mxu1 }
 0x5fd   :  { %v3978_v5 = vadd.f32 %v3977_v0, %v3963_v26  ;;  %v3985_v33 = vadd.f32 %v3981_v49, %v3948_v21  ;;  %v9185_v26 = vld [vmem:[%s12399_s6 + $0x80] sm:$0xff] }
 0x5fe   :  { %5126 = vmatpush.bf16.msra.mxu1 %v9185_v26 }
 0x5ff   :  { %v3988_v23 = vadd.f32 %v3982_v4, %v3978_v5  ;;  %v9187_v5 = vld [vmem:[%s12399_s6 + $0x90] sm:$0xff] }
 0x602   :  { %v11976_v42 = vpop.f32.mrf.mxu3  ;;  %v4620_v40 = vpop.f32.mrf.mxu2 }
 0x603   :  { %v4198_v51 = vpop.f32.mrf.mxu0  ;;  %v3950_v0 = vadd.f32 %v11976_v42, %v11972_v38  ;;  %v9184_v38 = vld [vmem:[%s12399_s6 + $0x78] sm:$0xff] }
 0x604   :  { %5127 = vmatpush.bf16.msra.mxu1 %v9184_v38 }
 0x605   :  { %v4182_v44 = vpop.f32.mrf.mxu1 }
 0x606   :  { %v4197_v22 = vadd.f32 %v4196_v50, %v4182_v44 }
 0x608   :  { %v4202_v10 = vadd.f32 %v4197_v22, %v3986_v43  ;;  %v9172_v43 = vld [vmem:[%s12399_s6 + $0x18] sm:$0xff] }
 0x60a   :  { %v4168_v52 = vpop.f32.mrf.mxu3  ;;  %v4622_v63 = vpop.f32.mrf.mxu2 }
 0x60b   :  { %v4374_v57 = vpop.f32.mrf.mxu0  ;;  %v4169_v20 = vadd.f32 %v4168_v52, %v4154_v30  ;;  %v9175_v30 = vld [vmem:[%s12399_s6 + $0x30] sm:$0xff] }
 0x60c   :  { %5008 = vmatpush.bf16.msrb.mxu0 %v9175_v30  ;;  %v9198_v30 = vld [vmem:[%s12399_s6 + $0xe8] sm:$0xff] }
 0x60d   :  { %v4184_v48 = vpop.f32.mrf.mxu1  ;;  %v4201_v39 = vadd.f32 %v4169_v20, %v3985_v33  ;;  %v9194_v33 = vld [vmem:[%s12399_s6 + $0xc8] sm:$0xff] }
 0x60e   :  { %v4199_v24 = vadd.f32 %v4198_v51, %v4184_v48 }
 0x610   :  { %v4204_v17 = vadd.f32 %v4199_v24, %v3988_v23 }
 0x612   :  { %v11978_v45 = vpop.f32.mrf.mxu3  ;;  %v4812_v11 = vpop.f32.mrf.mxu2 }
 0x613   :  { %v11980_v58 = vpop.f32.mrf.mxu0  ;;  %v4171_v51 = vadd.f32 %v11978_v45, %v11974_v31 }
 0x615   :  { %v4402_v54 = vpop.f32.mrf.mxu1 }
 0x616   :  { %v4403_v9 = vadd.f32 %v4402_v54, %v4388_v53 }
 0x618   :  { %v4408_v13 = vadd.f32 %v4403_v9, %v4202_v10  ;;  %v9177_v9 = vld [vmem:[%s12399_s6 + $0x40] sm:$0xff]  ;;  %v9182_v10 = vld [vmem:[%s12399_s6 + $0x68] sm:$0xff] }
 0x61a   :  { %v4360_v12 = vpop.f32.mrf.mxu3  ;;  %v4814_v6 = vpop.f32.mrf.mxu2 }
 0x61b   :  { %v4578_v46 = vpop.f32.mrf.mxu0  ;;  %v4375_v36 = vadd.f32 %v4374_v57, %v4360_v12  ;;  %v9174_v57 = vld [vmem:[%s12399_s6 + $0x28] sm:$0xff]  ;;  %v3987_v12 = vadd.f32 %v3981_v49, %v3950_v0  ;;  %v9193_v0 = vld [vmem:[%s12399_s6 + $0xc0] sm:$0xff] }
 0x61c   :  { %5009 = vmatpush.bf16.msrb.mxu0 %v9174_v57  ;;  %v9197_v57 = vld [vmem:[%s12399_s6 + $0xe0] sm:$0xff] }
 0x61d   :  { %v4404_v62 = vpop.f32.mrf.mxu1  ;;  %v4407_v50 = vadd.f32 %v4375_v36, %v4201_v39  ;;  %v4203_v31 = vadd.f32 %v4171_v51, %v3987_v12  ;;  %v9204_v36 = vld [vmem:[%s12399_s6 + $0x118] sm:$0xff] }
 0x61e   :  { %v4405_v16 = vadd.f32 %v4404_v62, %v4390_v56  ;;  %v9192_v12 = vld [vmem:[%s12399_s6 + $0xb8] sm:$0xff] }
 0x620   :  { %v4410_v32 = vadd.f32 %v4405_v16, %v4204_v17  ;;  %5010 = vmatpush.bf16.msrb.mxu0 %v9173_v3  ;;  %v9195_v16 = vld [vmem:[%s12399_s6 + $0xd0] sm:$0xff] }
 0x622   :  { %v11982_v59 = vpop.f32.mrf.mxu3 }
 0x623   :  { %v4580_v15 = vpop.f32.mrf.mxu0  ;;  %v4377_v62 = vadd.f32 %v11980_v58, %v11982_v59  ;;  %v9183_v58 = vld [vmem:[%s12399_s6 + $0x70] sm:$0xff]  ;;  %v9188_v59 = vld [vmem:[%s12399_s6 + $0x98] sm:$0xff] }
 0x624   :  { %5128 = vmatpush.bf16.msra.mxu1 %v9183_v58  ;;  %5144 = vmatpush.bf16.msra.mxu2 %v9188_v59 }
 0x625   :  { %v4606_v61 = vpop.f32.mrf.mxu1  ;;  %5011 = vmatpush.bf16.msrb.mxu0 %v9172_v43 }
 0x626   :  { %v4621_v55 = vadd.f32 %v4620_v40, %v4606_v61 }
 0x628   :  { %v4626_v18 = vadd.f32 %v4621_v55, %v4408_v13  ;;  %v9196_v13 = vld [vmem:[%s12399_s6 + $0xd8] sm:$0xff]  ;;  %5129 = vmatpush.bf16.msra.mxu1 %v9182_v10  ;;  %5145 = vmatpush.bf16.msra.mxu2 %v9187_v5  ;;  %v9190_v10 = vld [vmem:[%s12399_s6 + $0xa8] sm:$0xff] }
 0x62a   :  { %v4592_v7 = vpop.f32.mrf.mxu3 }
 0x62b   :  { %v4593_v35 = vadd.f32 %v4592_v7, %v4578_v46  ;;  %v4798_v34 = vpop.f32.mrf.mxu0  ;;  %v4409_v46 = vadd.f32 %v4377_v62, %v4203_v31  ;;  %v9202_v62 = vld [vmem:[%s12399_s6 + $0x108] sm:$0xff] }
 0x62d   :  { %v4608_v41 = vpop.f32.mrf.mxu1  ;;  %v4625_v48 = vadd.f32 %v4593_v35, %v4407_v50  ;;  %v9169_v35 = vld [vmem:[%s12399_s6] sm:$0xff]  ;;  %v9203_v50 = vld [vmem:[%s12399_s6 + $0x110] sm:$0xff] }
 0x62e   :  { %v4623_v1 = vadd.f32 %v4622_v63, %v4608_v41  ;;  %v9178_v63 = vld [vmem:[%s12399_s6 + $0x48] sm:$0xff] }
 0x62f   :  { %5026 = vmatpush.bf16.msra.mxu3 %v9178_v63 }
 0x630   :  { %v4628_v14 = vadd.f32 %v4623_v1, %v4410_v32 }
 0x632   :  { %v4594_v25 = vpop.f32.mrf.mxu3 }
 0x633   :  { %v4595_v45 = vadd.f32 %v4594_v25, %v4580_v15  ;;  %v4800_v2 = vpop.f32.mrf.mxu0  ;;  %v9206_v15 = vld [vmem:[%s12399_s6 + $0x128] sm:$0xff]  ;;  %5027 = vmatpush.bf16.msra.mxu3 %v9177_v9 }
 0x634   :  { %5361 = vmatpush.bf16.msrb.mxu2 %v9206_v15 }
 0x635   :  { %v4826_v60 = vpop.f32.mrf.mxu1  ;;  %v4627_v22 = vadd.f32 %v4595_v45, %v4409_v46  ;;  %v9207_v45 = vld [vmem:[%s12399_s6 + $0x130] sm:$0xff] }
 0x636   :  { %v4827_v19 = vadd.f32 %v4826_v60, %v4812_v11  ;;  %v9191_v46 = vld [vmem:[%s12399_s6 + $0xb0] sm:$0xff] }
 0x637   :  { %5243 = vmatpush.bf16.msrb.mxu3 %v9196_v13 }
 0x638   :  { %v4832_v8 = vadd.f32 %v4827_v19, %v4626_v18  ;;  %v9171_v18 = vld [vmem:[%s12399_s6 + $0x10] sm:$0xff]  ;;  %v9181_v19 = vld [vmem:[%s12399_s6 + $0x60] sm:$0xff] }
 0x639   :  { %5012 = vmatpush.bf16.msrb.mxu0 %v9171_v18  ;;  %5130 = vmatpush.bf16.msra.mxu1 %v9181_v19 }
 0x63a   :  { %v8172_v29 = vmul.f32 -1.442695, %v4832_v8  ;;  %v9205_v8 = vld [vmem:[%s12399_s6 + $0x120] sm:$0xff] }
 0x63b   :  { %5244 = vmatpush.bf16.msrb.mxu3 %v9195_v16  ;;  %5362 = vmatpush.bf16.msrb.mxu2 %v9205_v8 }
 0x63c   :  { %9364 = vpow2.f32 %v8172_v29  ;;  %v9170_v29 = vld [vmem:[%s12399_s6 + $0x8] sm:$0xff] }
 0x63d   :  { %v4828_v37 = vpop.f32.mrf.mxu1  ;;  %5013 = vmatpush.bf16.msrb.mxu0 %v9170_v29  ;;  %5131 = vmatpush.bf16.msra.mxu1 %v9180_v28 }
 0x63e   :  { %v4829_v47 = vadd.f32 %v4828_v37, %v4814_v6 }
 0x63f   :  { %5245 = vmatpush.bf16.msrb.mxu3 %v9194_v33  ;;  %5363 = vmatpush.bf16.msrb.mxu2 %v9204_v36  ;;  %v9226_v33 = vld [vmem:[%s12399_s6 + $0x1c8] sm:$0xff] }
 0x640   :  { %v4834_v44 = vadd.f32 %v4829_v47, %v4628_v14  ;;  %v9179_v47 = vld [vmem:[%s12399_s6 + $0x50] sm:$0xff]  ;;  %v9218_v36 = vld [vmem:[%s12399_s6 + $0x188] sm:$0xff] }
 0x641   :  { %5014 = vmatpush.bf16.msrb.mxu0 %v9169_v35  ;;  %5132 = vmatpush.bf16.msra.mxu1 %v9179_v47  ;;  %v9227_v35 = vld [vmem:[%s12399_s6 + $0x1d0] sm:$0xff]  ;;  %v9224_v47 = vld [vmem:[%s12399_s6 + $0x1b8] sm:$0xff] }
 0x642   :  { %v9365_v53 = vpop.eup %9364  ;;  %v8174_v54 = vmul.f32 -1.442695, %v4834_v44 }
 0x643   :  { %v12009_v42 = vadd.f32 1.0, %v9365_v53  ;;  %5246 = vmatpush.bf16.msrb.mxu3 %v9193_v0  ;;  %5364 = vmatpush.bf16.msrb.mxu2 %v9203_v50  ;;  %v9223_v0 = vld [vmem:[%s12399_s6 + $0x1b0] sm:$0xff] }
 0x644   :  { %9366 = vpow2.f32 %v8174_v54 }
 0x645   :  { %9368 = vrcp.f32 %v12009_v42  ;;  %v4877_v25 = vand.u32 2147483648, %v12009_v42  ;;  %v4875_v1 = vand.u32 2147483647, %v12009_v42  ;;  %vm4871_vm3 = vweird.f32 %v12009_v42  ;;  %5262 = vmatpush.bf16.msra.mxu0 %v9198_v30 }
 0x646   :  { %v4784_v52 = vpop.f32.mrf.mxu3 }
 0x647   :  { %v4799_v56 = vadd.f32 %v4798_v34, %v4784_v52  ;;  %v4878_v6 = vor.u32 1.1754944e-38, %v4877_v25  ;;  %vm4876_vm11 = vcmp.eq.f32.partialorder %v4875_v1, 8.507059e+37  ;;  %5247 = vmatpush.bf16.msrb.mxu3 %v9192_v12  ;;  %5365 = vmatpush.bf16.msrb.mxu2 %v9202_v62  ;;  %v9246_v12 = vld [vmem:[%s12399_s6 + $0x268] sm:$0xff]  ;;  %v9211_v62 = vld [vmem:[%s12399_s6 + $0x150] sm:$0xff] }
 0x649   :  { %v4831_v40 = vadd.f32 %v4799_v56, %v4625_v48  ;;  %v9208_v48 = vld [vmem:[%s12399_s6 + $0x138] sm:$0xff]  ;;  %5263 = vmatpush.bf16.msra.mxu0 %v9197_v57 }
 0x64a   :  { %v9367_v41 = vpop.eup %9366  ;;  %5380 = vmatpush.bf16.msrb.mxu1 %v9208_v48 }
 0x64b   :  { %v8171_v61 = vmul.f32 -1.442695, %v4831_v40  ;;  %v9369_v55 = vpop.eup %9368  ;;  %v12035_v11 = vadd.f32 1.0, %v9367_v41  ;;  %5248 = vmatpush.bf16.msrb.mxu3 %v9191_v46 }
 0x64c   :  { %v4867_v60 = vmul.f32 %v9369_v55, %v12009_v42  ;;  %vm4872_vm8 = vweird.f32 %v9369_v55 }
 0x64d   :  { %9370 = vpow2.f32 %v8171_v61  ;;  %vm4873_vm6 = vmor %vm4871_vm3, %vm4872_vm8  ;;  %v4905_v52 = vand.u32 2147483647, %v12035_v11  ;;  %v4907_v53 = vand.u32 2147483648, %v12035_v11  ;;  %vm4901_vm14 = vweird.f32 %v12035_v11 }
 0x64e   :  { %v4786_v4 = vpop.f32.mrf.mxu3  ;;  %9372 = vrcp.f32 %v12035_v11  ;;  %v4868_v21 = vsub.f32 1.0, %v4867_v60  ;;  %5381 = vmatpush.bf16.msrb.mxu1 %v9207_v45  ;;  %v9189_v60 = vld [vmem:[%s12399_s6 + $0xa0] sm:$0xff] }
 0x64f   :  { %v4801_v7 = vadd.f32 %v4800_v2, %v4786_v4  ;;  %vm4906_vm2 = vcmp.eq.f32.partialorder %v4905_v52, 8.507059e+37  ;;  %v4908_v40 = vor.u32 1.1754944e-38, %v4907_v53  ;;  %v9201_v2 = vld [vmem:[%s12399_s6 + $0x100] sm:$0xff]  ;;  %5249 = vmatpush.bf16.msrb.mxu3 %v9190_v10  ;;  %v9248_v10 = vld [vmem:[%s12399_s6 + $0x278] sm:$0xff] }
 0x650   :  { %v4869_v17 = vmul.f32 %v9369_v55, %v4868_v21  ;;  %5366 = vmatpush.bf16.msrb.mxu2 %v9201_v2  ;;  %v9245_v45 = vld [vmem:[%s12399_s6 + $0x260] sm:$0xff] }
 0x651   :  { %v4833_v24 = vadd.f32 %v4801_v7, %v4627_v22  ;;  %v9209_v2 = vld [vmem:[%s12399_s6 + $0x140] sm:$0xff] }
 0x652   :  { %v4870_v27 = vadd.f32 %v9369_v55, %v4869_v17 }
 0x653   :  { %v9371_v49 = vpop.eup %9370  ;;  %v8173_v23 = vmul.f32 -1.442695, %v4833_v24  ;;  %v9199_v24 = vld [vmem:[%s12399_s6 + $0xf0] sm:$0xff]  ;;  %5250 = vmatpush.bf16.msrb.mxu3 %v9189_v60  ;;  %v9237_v60 = vld [vmem:[%s12399_s6 + $0x220] sm:$0xff] }
 0x654   :  { %v12061_v20 = vadd.f32 1.0, %v9371_v49  ;;  %v9373_v32 = vpop.eup %9372  ;;  %v4874_v37 = vsel %vm4873_vm6, %v9369_v55, %v4870_v27  ;;  %v9200_v55 = vld [vmem:[%s12399_s6 + $0xf8] sm:$0xff] }
 0x655   :  { %9374 = vpow2.f32 %v8173_v23  ;;  %v4897_v39 = vmul.f32 %v9373_v32, %v12035_v11  ;;  %v4879_v14 = vsel %vm4876_vm11, %v4878_v6, %v4874_v37  ;;  %vm4902_vm1 = vweird.f32 %v9373_v32  ;;  %5367 = vmatpush.bf16.msrb.mxu2 %v9200_v55  ;;  %v9216_v27 = vld [vmem:[%s12399_s6 + $0x178] sm:$0xff]  ;;  %v9215_v6 = vld [vmem:[%s12399_s6 + $0x170] sm:$0xff]  ;;  %v9225_v37 = vld [vmem:[%s12399_s6 + $0x1c0] sm:$0xff] }
 0x656   :  { %9376 = vrcp.f32 %v12061_v20  ;;  %4912 = vst.msk [vmem:[#allocation3 + $0x8] sm:$0xff] %vm74_vm0, %v4879_v14  ;;  %vm4903_vm4 = vmor %vm4901_vm14, %vm4902_vm1  ;;  %v4862_v31 = vand.u32 2147483648, %v12061_v20  ;;  %v4860_v63 = vand.u32 2147483647, %v12061_v20  ;;  %vm4856_vm13 = vweird.f32 %v12061_v20  ;;  %v9214_v14 = vld [vmem:[%s12399_s6 + $0x168] sm:$0xff] }
 0x657   :  { %v4898_v34 = vsub.f32 1.0, %v4897_v39  ;;  %v9217_v39 = vld [vmem:[%s12399_s6 + $0x180] sm:$0xff]  ;;  %vm12442_vm11 = vcmask 687104   ;;  %vm12443_vm1 = vcmask 73728  }
 0x658   :  { %v4863_v41 = vor.u32 1.1754944e-38, %v4862_v31  ;;  %vm4861_vm15 = vcmp.eq.f32.partialorder %v4860_v63, 8.507059e+37  ;;  %v9235_v31 = vld [vmem:[%s12399_s6 + $0x210] sm:$0xff]  ;;  %v9234_v63 = vld [vmem:[%s12399_s6 + $0x208] sm:$0xff] }
 0x659   :  { %v4899_v54 = vmul.f32 %v9373_v32, %v4898_v34  ;;  %5368 = vmatpush.bf16.msrb.mxu2 %v9199_v24  ;;  %v9213_v34 = vld [vmem:[%s12399_s6 + $0x160] sm:$0xff] }
 0x65b   :  { %v9375_v26 = vpop.eup %9374  ;;  %v4900_v38 = vadd.f32 %v9373_v32, %v4899_v54  ;;  %v9212_v54 = vld [vmem:[%s12399_s6 + $0x158] sm:$0xff] }
 0x65c   :  { %v9377_v44 = vpop.eup %9376  ;;  %v12098_v51 = vadd.f32 1.0, %v9375_v26 }
 0x65d   :  { %v4852_v56 = vmul.f32 %v9377_v44, %v12061_v20  ;;  %v4904_v61 = vsel %vm4903_vm4, %v9373_v32, %v4900_v38  ;;  %vm4857_vm10 = vweird.f32 %v9377_v44  ;;  %v9228_v32 = vld [vmem:[%s12399_s6 + $0x1d8] sm:$0xff] }
 0x65e   :  { %9378 = vrcp.f32 %v12098_v51  ;;  %v4909_v58 = vsel %vm4906_vm2, %v4908_v40, %v4904_v61  ;;  %vm4858_vm12 = vmor %vm4856_vm13, %vm4857_vm10  ;;  %v4892_v11 = vand.u32 2147483648, %v12098_v51  ;;  %v4890_v13 = vand.u32 2147483647, %v12098_v51  ;;  %v9221_v40 = vld [vmem:[%s12399_s6 + $0x1a0] sm:$0xff]  ;;  %v9210_v61 = vld [vmem:[%s12399_s6 + $0x148] sm:$0xff] }
 0x65f   :  { %v4853_v42 = vsub.f32 1.0, %v4852_v56  ;;  %4914 = vst.msk [vmem:[#allocation3 + $0x18] sm:$0x3] %vm12439_vm9, %v4909_v58  ;;  %vm4886_vm8 = vweird.f32 %v12098_v51  ;;  %v9222_v56 = vld [vmem:[%s12399_s6 + $0x1a8] sm:$0xff]  ;;  %v9244_v58 = vld [vmem:[%s12399_s6 + $0x258] sm:$0xff] }
 0x660   :  { %v4893_v18 = vor.u32 1.1754944e-38, %v4892_v11  ;;  %vm4891_vm6 = vcmp.eq.f32.partialorder %v4890_v13, 8.507059e+37 }
 0x661   :  { %v4854_v3 = vmul.f32 %v9377_v44, %v4853_v42  ;;  %v9236_v42 = vld [vmem:[%s12399_s6 + $0x218] sm:$0xff] }
 0x663   :  { %v4855_v59 = vadd.f32 %v9377_v44, %v4854_v3  ;;  %v9220_v3 = vld [vmem:[%s12399_s6 + $0x198] sm:$0xff] }
 0x664   :  { %v9379_v4 = vpop.eup %9378 }
 0x665   :  { %v4859_v22 = vsel %vm4858_vm12, %v9377_v44, %v4855_v59  ;;  %v4882_v7 = vmul.f32 %v9379_v4, %v12098_v51  ;;  %vm4887_vm5 = vweird.f32 %v9379_v4 }
 0x666   :  { %v4864_v43 = vsel %vm4861_vm15, %v4863_v41, %v4859_v22  ;;  %vm4888_vm3 = vmor %vm4886_vm8, %vm4887_vm5  ;;  %v9233_v41 = vld [vmem:[%s12399_s6 + $0x200] sm:$0xff]  ;;  %v9238_v22 = vld [vmem:[%s12399_s6 + $0x228] sm:$0xff] }
 0x667   :  { %4911 = vst [vmem:[#allocation3] sm:$0xff] %v4864_v43  ;;  %v4883_v9 = vsub.f32 1.0, %v4882_v7 }
 0x669   :  { %v4884_v5 = vmul.f32 %v9379_v4, %v4883_v9  ;;  %v9243_v9 = vld [vmem:[%s12399_s6 + $0x250] sm:$0xff] }
 0x66b   :  { %v4885_v15 = vadd.f32 %v9379_v4, %v4884_v5 }
 0x66d   :  { %v4889_v19 = vsel %vm4888_vm3, %v9379_v4, %v4885_v15  ;;  %v9219_v4 = vld [vmem:[%s12399_s6 + $0x190] sm:$0xff]  ;;  %v9232_v15 = vld [vmem:[%s12399_s6 + $0x1f8] sm:$0xff] }
 0x66e   :  { %v4894_v49 = vsel %vm4891_vm6, %v4893_v18, %v4889_v19  ;;  %v4916_v21 = vld [vmem:[#allocation3] ss:$8 sm:$0x3]  ;;  %v5034_v23 = vld [vmem:[#allocation3 + $0x1] ss:$8 sm:$0x3] }
 0x66f   :  { %4913 = vst [vmem:[#allocation3 + $0x10] sm:$0x3] %v4894_v49  ;;  %v4918_v16 = vperm.slane %v4916_v21, 0  ;;  %v4919_v8 = vperm.slane %v4916_v21, 1  ;;  %v5036_v25 = vperm.slane %v5034_v23, 0  ;;  %v5037_v20 = vperm.slane %v5034_v23, 1 }
 0x670   :  { %v5152_v30 = vld [vmem:[#allocation3 + $0x2] ss:$8 sm:$0x3]  ;;  %v5270_v26 = vld [vmem:[#allocation3 + $0x3] ss:$8 sm:$0x3] }
 0x671   :  { %v4922_v17 = vpack.c.bf16 %v4918_v16, %v4918_v16  ;;  %v4923_v1 = vpack.c.bf16 %v4919_v8, %v4919_v8  ;;  %v5040_v29 = vpack.c.bf16 %v5036_v25, %v5036_v25  ;;  %v5041_v28 = vpack.c.bf16 %v5037_v20, %v5037_v20  ;;  %v5388_v59 = vld [vmem:[#allocation3 + $0x4] ss:$8 sm:$0x3]  ;;  %v5506_v46 = vld [vmem:[#allocation3 + $0x5] ss:$8 sm:$0x3] }
 0x672   :  { %v5154_v50 = vperm.slane %v5152_v30, 0  ;;  %v5155_v44 = vperm.slane %v5152_v30, 1  ;;  %v5272_v52 = vperm.slane %v5270_v26, 0  ;;  %v5273_v53 = vperm.slane %v5270_v26, 1  ;;  %v9242_v19 = vld [vmem:[%s12399_s6 + $0x248] sm:$0xff]  ;;  %v9247_v49 = vld [vmem:[%s12399_s6 + $0x270] sm:$0xff] }
 0x673   :  { %5015 = vmatmul.bf16.vlgmr.msrb.gmra.mxu0 %v4922_v17  ;;  %8215 = vmatmul.msk.bf16.vlgmr.msra.gmra.mxu3 %vm74_vm0, %v4923_v1  ;;  %v5390_v7 = vperm.slane %v5388_v59, 0  ;;  %v5391_v43 = vperm.slane %v5388_v59, 1  ;;  %v5508_v55 = vperm.slane %v5506_v46, 0  ;;  %v5509_v11 = vperm.slane %v5506_v46, 1  ;;  %v9256_v21 = vld [vmem:[%s12399_s6 + $0x2b8] sm:$0xff]  ;;  %v9266_v23 = vld [vmem:[%s12399_s6 + $0x308] sm:$0xff] }
 0x674   :  { %5133 = vmatmul.bf16.vlgmr.msra.gmra.mxu1 %v5040_v29  ;;  %8276 = vmatmul.msk.bf16.vlgmr.msra.gmra.mxu2 %vm74_vm0, %v5041_v28  ;;  %v5158_v51 = vpack.c.bf16 %v5154_v50, %v5154_v50  ;;  %v5159_v48 = vpack.c.bf16 %v5155_v44, %v5155_v44  ;;  %v5276_v57 = vpack.c.bf16 %v5272_v52, %v5272_v52  ;;  %v9231_v16 = vld [vmem:[%s12399_s6 + $0x1f0] sm:$0xff]  ;;  %v9241_v8 = vld [vmem:[%s12399_s6 + $0x240] sm:$0xff]  ;;  %v9230_v17 = vld [vmem:[%s12399_s6 + $0x1e8] sm:$0xff] }
 0x675   :  { %5479 = vmatpush.bf16.msrb.mxu0 %v9216_v27  ;;  %5597 = vmatpush.bf16.msra.mxu1 %v9226_v33  ;;  %v5277_v38 = vpack.c.bf16 %v5273_v53, %v5273_v53  ;;  %v5394_v5 = vpack.c.bf16 %v5390_v7, %v5390_v7  ;;  %v5395_v13 = vpack.c.bf16 %v5391_v43, %v5391_v43  ;;  %v9255_v25 = vld [vmem:[%s12399_s6 + $0x2b0] sm:$0xff]  ;;  %v9265_v20 = vld [vmem:[%s12399_s6 + $0x300] sm:$0xff]  ;;  %v9240_v1 = vld [vmem:[%s12399_s6 + $0x238] sm:$0xff] }
 0x676   :  { %5498 = vmatpush.bf16.msra.mxu3 %v9218_v36  ;;  %5616 = vmatpush.bf16.msra.mxu2 %v9228_v32  ;;  %v5512_v24 = vpack.c.bf16 %v5508_v55, %v5508_v55  ;;  %v5513_v18 = vpack.c.bf16 %v5509_v11, %v5509_v11  ;;  %v9254_v29 = vld [vmem:[%s12399_s6 + $0x2a8] sm:$0xff]  ;;  %v9264_v28 = vld [vmem:[%s12399_s6 + $0x2f8] sm:$0xff]  ;;  %v9229_v36 = vld [vmem:[%s12399_s6 + $0x1e0] sm:$0xff] }
 0x677   :  { %v5624_v27 = vld [vmem:[#allocation3 + $0x6] ss:$8 sm:$0x3]  ;;  %v5742_v33 = vld [vmem:[#allocation3 + $0x7] ss:$8 sm:$0x3] }
 0x678   :  { %v9239_v32 = vld [vmem:[%s12399_s6 + $0x230] sm:$0xff]  ;;  %v5745_v30 = vperm.slane %v5742_v33, 1  ;;  %v9257_v50 = vld [vmem:[%s12399_s6 + $0x2c0] sm:$0xff]  ;;  %v9252_v53 = vld [vmem:[%s12399_s6 + $0x298] sm:$0xff] }
 0x679   :  { %5480 = vmatpush.bf16.msrb.mxu0 %v9215_v6  ;;  %5598 = vmatpush.bf16.msra.mxu1 %v9225_v37  ;;  %v5626_v6 = vperm.slane %v5624_v27, 0  ;;  %v5627_v37 = vperm.slane %v5624_v27, 1 }
 0x67a   :  { %5499 = vmatpush.bf16.msra.mxu3 %v9217_v39  ;;  %5617 = vmatpush.bf16.msra.mxu2 %v9227_v35  ;;  %v9258_v39 = vld [vmem:[%s12399_s6 + $0x2c8] sm:$0xff]  ;;  %v9253_v35 = vld [vmem:[%s12399_s6 + $0x2a0] sm:$0xff]  ;;  %v5749_v52 = vpack.c.bf16 %v5745_v30, %v5745_v30 }
 0x67b   :  { %v5630_v26 = vpack.c.bf16 %v5626_v6, %v5626_v6 }
 0x67d   :  { %5481 = vmatpush.bf16.msrb.mxu0 %v9214_v14  ;;  %5599 = vmatpush.bf16.msra.mxu1 %v9224_v47  ;;  %v9263_v14 = vld [vmem:[%s12399_s6 + $0x2f0] sm:$0xff]  ;;  %v5744_v47 = vperm.slane %v5742_v33, 0 }
 0x67e   :  { %v9271_v33 = vld [vmem:[%s12401_s8 + $0x10] sm:$0xff] }
 0x67f   :  { %v5748_v44 = vpack.c.bf16 %v5744_v47, %v5744_v47  ;;  %v6188_v47 = vld [vmem:[%s12403_s10 + $0x28] sm:$0x3] }
 0x681   :  { %5482 = vmatpush.bf16.msrb.mxu0 %v9213_v34  ;;  %5600 = vmatpush.bf16.msra.mxu1 %v9223_v0  ;;  %v5631_v34 = vpack.c.bf16 %v5627_v37, %v5627_v37  ;;  %v9268_v0 = vld [vmem:[%s12399_s6 + $0x318] sm:$0xff]  ;;  %v9270_v37 = vld [vmem:[%s12401_s8 + $0x8] sm:$0xff] }
 0x683   :  { %5251 = vmatmul.bf16.vlgmr.msrb.gmra.mxu3 %v5158_v51  ;;  %8337 = vmatmul.msk.bf16.vlgmr.msra.gmra.mxu0 %vm74_vm0, %v5159_v48  ;;  %v9262_v51 = vld [vmem:[%s12399_s6 + $0x2e8] sm:$0xff]  ;;  %v9267_v48 = vld [vmem:[%s12399_s6 + $0x310] sm:$0xff] }
 0x684   :  { %5369 = vmatmul.bf16.vlgmr.msrb.gmra.mxu2 %v5276_v57  ;;  %8398 = vmatmul.msk.bf16.vlgmr.msrb.gmra.mxu1 %vm74_vm0, %v5277_v38  ;;  %v9250_v57 = vld [vmem:[%s12399_s6 + $0x288] sm:$0xff]  ;;  %v9260_v38 = vld [vmem:[%s12399_s6 + $0x2d8] sm:$0xff] }
 0x685   :  { %5483 = vmatpush.bf16.msrb.mxu0 %v9212_v54  ;;  %5601 = vmatpush.bf16.msra.mxu1 %v9222_v56  ;;  %v9251_v54 = vld [vmem:[%s12399_s6 + $0x290] sm:$0xff]  ;;  %v9261_v56 = vld [vmem:[%s12399_s6 + $0x2e0] sm:$0xff] }
 0x686   :  { %5715 = vmatpush.bf16.msrb.mxu3 %v9236_v42  ;;  %5833 = vmatpush.bf16.msrb.mxu2 %v9246_v12  ;;  %v5860_v42 = vld [vmem:[#allocation3 + $0x10] ss:$8 sm:$0x3]  ;;  %v5978_v12 = vld [vmem:[#allocation3 + $0x11] ss:$8 sm:$0x3] }
 0x689   :  { %5484 = vmatpush.bf16.msrb.mxu0 %v9211_v62  ;;  %5602 = vmatpush.bf16.msra.mxu1 %v9221_v40  ;;  %v5863_v62 = vperm.slane %v5860_v42, 1  ;;  %v9249_v40 = vld [vmem:[%s12399_s6 + $0x280] sm:$0xff] }
 0x68a   :  { %5716 = vmatpush.bf16.msrb.mxu3 %v9235_v31  ;;  %5834 = vmatpush.bf16.msrb.mxu2 %v9245_v45  ;;  %v9259_v31 = vld [vmem:[%s12399_s6 + $0x2d0] sm:$0xff]  ;;  %v5981_v45 = vperm.slane %v5978_v12, 1 }
 0x68d   :  { %5485 = vmatpush.bf16.msrb.mxu0 %v9210_v61  ;;  %5603 = vmatpush.bf16.msra.mxu1 %v9220_v3  ;;  %v5862_v61 = vperm.slane %v5860_v42, 0  ;;  %v5980_v3 = vperm.slane %v5978_v12, 0 }
 0x68e   :  { %5717 = vmatpush.bf16.msrb.mxu3 %v9234_v63  ;;  %5835 = vmatpush.bf16.msrb.mxu2 %v9244_v58  ;;  %v5867_v63 = vpack.c.bf16 %v5863_v62, %v5863_v62  ;;  %v5985_v58 = vpack.c.bf16 %v5981_v45, %v5981_v45 }
 0x68f   :  { %v5866_v59 = vpack.c.bf16 %v5862_v61, %v5862_v61  ;;  %v5984_v46 = vpack.c.bf16 %v5980_v3, %v5980_v3  ;;  %v9278_v61 = vld [vmem:[%s12403_s10 + $0x10] sm:$0xff] }
 0x691   :  { %5486 = vmatpush.bf16.msrb.mxu0 %v9209_v2  ;;  %5604 = vmatpush.bf16.msra.mxu1 %v9219_v4 }
 0x692   :  { %5718 = vmatpush.bf16.msrb.mxu3 %v9233_v41  ;;  %5836 = vmatpush.bf16.msrb.mxu2 %v9243_v9 }
 0x693   :  { %8459 = vmatmul.msk.bf16.vlgmr.msra.gmra.mxu3 %vm74_vm0, %v5395_v13 }
 0x694   :  { %5487 = vmatmul.bf16.vlgmr.msrb.gmra.mxu0 %v5394_v5  ;;  %5605 = vmatmul.bf16.vlgmr.msra.gmra.mxu1 %v5512_v24  ;;  %v6111_v5 = vld [vmem:[%s12401_s8 + $0x38] sm:$0xf] }
 0x695   :  { %5734 = vmatpush.bf16.msra.mxu0 %v9238_v22  ;;  %5852 = vmatpush.bf16.msrb.mxu1 %v9248_v10  ;;  %v6142_v13 = vunpack.c.l.b16 %v6111_v5 }
 0x696   :  { %8520 = vmatmul.msk.bf16.vlgmr.msra.gmra.mxu2 %vm74_vm0, %v5513_v18  ;;  %5719 = vmatpush.bf16.msrb.mxu3 %v9232_v15 }
 0x697   :  { %5837 = vmatpush.bf16.msrb.mxu2 %v9242_v19 }
 0x699   :  { %5735 = vmatpush.bf16.msra.mxu0 %v9237_v60  ;;  %5853 = vmatpush.bf16.msrb.mxu1 %v9247_v49  ;;  %v6150_v60 = vpack.c.b16 %v6142_v13, %v6142_v13 }
 0x69a   :  { %5720 = vmatpush.bf16.msrb.mxu3 %v9231_v16 }
 0x69b   :  { %5838 = vmatpush.bf16.msrb.mxu2 %v9241_v8  ;;  %v6162_v19 = vsel %vm808_vm7, %v6150_v60, 0  ;;  %vm12441_vm7 = vcmask 982016  }
 0x69d   :  { %5951 = vmatpush.bf16.msrb.mxu0 %v9256_v21  ;;  %6069 = vmatpush.bf16.msra.mxu1 %v9266_v23  ;;  %v9275_v21 = vld [vmem:[%s12401_s8 + $0x30] sm:$0xff]  ;;  %v9274_v23 = vld [vmem:[%s12401_s8 + $0x28] sm:$0xff] }
 0x69e   :  { %5721 = vmatpush.bf16.msrb.mxu3 %v9230_v17 }
 0x69f   :  { %5839 = vmatpush.bf16.msrb.mxu2 %v9240_v1  ;;  %v9272_v1 = vld [vmem:[%s12401_s8 + $0x18] sm:$0xff] }
 0x6a1   :  { %5952 = vmatpush.bf16.msrb.mxu0 %v9255_v25  ;;  %6070 = vmatpush.bf16.msra.mxu1 %v9265_v20  ;;  %v9273_v20 = vld [vmem:[%s12401_s8 + $0x20] sm:$0xff] }
 0x6a2   :  { %5722 = vmatpush.bf16.msrb.mxu3 %v9229_v36 }
 0x6a3   :  { %5840 = vmatpush.bf16.msrb.mxu2 %v9239_v32 }
 0x6a4   :  { %8581 = vmatmul.msk.bf16.vlgmr.msra.gmra.mxu0 %vm74_vm0, %v5631_v34  ;;  %8642 = vmatmul.msk.bf16.vlgmr.msrb.gmra.mxu1 %vm74_vm0, %v5749_v52 }
 0x6a5   :  { %5953 = vmatpush.bf16.msrb.mxu0 %v9254_v29  ;;  %6071 = vmatpush.bf16.msra.mxu1 %v9264_v28 }
 0x6a6   :  { %5970 = vmatpush.bf16.msra.mxu3 %v9258_v39  ;;  %5841 = vmatmul.bf16.vlgmr.msrb.gmra.mxu2 %v5748_v44  ;;  %v4915_v39 = vld [vmem:[%s12400_s7] sm:$0x1] }
 0x6a7   :  { %5723 = vmatmul.bf16.vlgmr.msrb.gmra.mxu3 %v5630_v26  ;;  %6088 = vmatpush.bf16.msra.mxu2 %v9268_v0  ;;  %v6211_v26 = vunpack.c.l.b16 %v6188_v47 }
 0x6a9   :  { %5954 = vmatpush.bf16.msrb.mxu0 %v9253_v35  ;;  %6072 = vmatpush.bf16.msra.mxu1 %v9263_v14  ;;  %v9269_v14 = vld [vmem:[%s12401_s8] sm:$0xff] }
 0x6aa   :  { %5971 = vmatpush.bf16.msra.mxu3 %v9257_v50  ;;  %v6217_v50 = vpack.c.b16 %v6211_v26, %v6211_v26 }
 0x6ab   :  { %6089 = vmatpush.bf16.msra.mxu2 %v9267_v48  ;;  %v9280_v48 = vld [vmem:[%s12403_s10 + $0x20] sm:$0xff] }
 0x6ad   :  { %5955 = vmatpush.bf16.msrb.mxu0 %v9252_v53  ;;  %6073 = vmatpush.bf16.msra.mxu1 %v9262_v51 }
 0x6ae   :  { %6164 = vmatpush.bf16.msrb.mxu3 %v6162_v19 }
 0x6b1   :  { %5956 = vmatpush.bf16.msrb.mxu0 %v9251_v54  ;;  %6074 = vmatpush.bf16.msra.mxu1 %v9261_v56 }
 0x6b2   :  { %6165 = vmatpush.bf16.msrb.mxu3 %v9275_v21  ;;  %v6112_v21 = vld [vmem:[%s12402_s9] sm:$0x1] }
 0x6b5   :  { %5957 = vmatpush.bf16.msrb.mxu0 %v9250_v57  ;;  %6075 = vmatpush.bf16.msra.mxu1 %v9260_v38 }
 0x6b6   :  { %8764 = vmatmul.msk.bf16.vlgmr.msra.gmra.mxu2 %vm74_vm0, %v5985_v58  ;;  %6166 = vmatpush.bf16.msrb.mxu3 %v9274_v23 }
 0x6b7   :  { %8703 = vmatmul.msk.bf16.vlgmr.msra.gmra.mxu3 %vm74_vm0, %v5867_v63  ;;  %vm12440_vm0 = vcmask 1041408  }
 0x6b8   :  { %v6227_v53 = vsel %vm12440_vm0, %v6217_v50, 0 }
 0x6b9   :  { %5958 = vmatpush.bf16.msrb.mxu0 %v9249_v40  ;;  %6076 = vmatpush.bf16.msra.mxu1 %v9259_v31  ;;  %v9279_v40 = vld [vmem:[%s12403_s10 + $0x18] sm:$0xff] }
 0x6ba   :  { %6167 = vmatpush.bf16.msrb.mxu3 %v9273_v20  ;;  %v6189_v20 = vld [vmem:[%s12404_s11] sm:$0x1] }
 0x6bc   :  { %5959 = vmatmul.bf16.vlgmr.msrb.gmra.mxu0 %v5866_v59  ;;  %6077 = vmatmul.bf16.vlgmr.msra.gmra.mxu1 %v5984_v46 }
 0x6bd   :  { %6231 = vmatpush.bf16.msra.mxu0 %v6227_v53 }
 0x6be   :  { %6168 = vmatpush.bf16.msrb.mxu3 %v9272_v1 }
 0x6c1   :  { %6232 = vmatpush.bf16.msra.mxu0 %v9280_v48 }
 0x6c2   :  { %6169 = vmatpush.bf16.msrb.mxu3 %v9271_v33 }
 0x6c5   :  { %6233 = vmatpush.bf16.msra.mxu0 %v9279_v40 }
 0x6c6   :  { %6170 = vmatpush.bf16.msrb.mxu3 %v9270_v37 }
 0x6c9   :  { %6234 = vmatpush.bf16.msra.mxu0 %v9278_v61 }
 0x6ca   :  { %6171 = vmatpush.bf16.msrb.mxu3 %v9269_v14 }
 0x6f0   :  { %v5016_v2 = vpop.f32.mrf.mxu0 }
 0x6f1   :  { %v5134_v4 = vpop.f32.mrf.mxu1 }
 0x6f6   :  { %v5029_v41 = vpop.f32.mrf.mxu3 }
 0x6f7   :  { %v5147_v22 = vpop.f32.mrf.mxu2  ;;  %v5030_v32 = vadd.f32 %v5029_v41, %v5016_v2  ;;  %v9277_v2 = vld [vmem:[%s12403_s10 + $0x8] sm:$0xff] }
 0x6f8   :  { %v5018_v7 = vpop.f32.mrf.mxu0  ;;  %v5148_v44 = vadd.f32 %v5147_v22, %v5134_v4  ;;  %6235 = vmatpush.bf16.msra.mxu0 %v9277_v2 }
 0x6f9   :  { %v5136_v43 = vpop.f32.mrf.mxu1  ;;  %v5033_v34 = vadd.f32 %v5030_v32, %v4915_v39 }
 0x6fb   :  { %v5151_v51 = vadd.f32 %v5148_v44, %v5033_v34 }
 0x6fe   :  { %v5031_v9 = vpop.f32.mrf.mxu3 }
 0x6ff   :  { %v5149_v10 = vpop.f32.mrf.mxu2 }
 0x700   :  { %v5265_v55 = vpop.f32.mrf.mxu0 }
 0x701   :  { %v5383_v11 = vpop.f32.mrf.mxu1 }
 0x706   :  { %v5252_v15 = vpop.f32.mrf.mxu3 }
 0x707   :  { %v5370_v24 = vpop.f32.mrf.mxu2  ;;  %v5266_v52 = vadd.f32 %v5265_v55, %v5252_v15 }
 0x708   :  { %v5267_v18 = vpop.f32.mrf.mxu0  ;;  %v5384_v42 = vadd.f32 %v5383_v11, %v5370_v24 }
 0x709   :  { %v5385_v49 = vpop.f32.mrf.mxu1  ;;  %v5269_v56 = vadd.f32 %v5266_v52, %v5151_v51 }
 0x70a   :  { %v9276_v49 = vld [vmem:[%s12403_s10] sm:$0xff]  ;;  %s6250_s10 = sshll.u32 %s12405_s12, 4  ;;  %s6251_s10 = int_to_ptr.hbm [resolvable:$true] %s6250_s10 }
 0x70b   :  { %v5387_v31 = vadd.f32 %v5384_v42, %v5269_v56  ;;  %6236 = vmatpush.bf16.msra.mxu0 %v9276_v49 }
 0x70e   :  { %v5254_v16 = vpop.f32.mrf.mxu3 }
 0x70f   :  { %v5372_v8 = vpop.f32.mrf.mxu2 }
 0x711   :  { %v5488_v25 = vpop.f32.mrf.mxu0  ;;  %v5606_v17 = vpop.f32.mrf.mxu1 }
 0x716   :  { %v5501_v29 = vpop.f32.mrf.mxu3 }
 0x717   :  { %v5502_v12 = vadd.f32 %v5501_v29, %v5488_v25 }
 0x719   :  { %v5619_v28 = vpop.f32.mrf.mxu2  ;;  %v5490_v27 = vpop.f32.mrf.mxu0  ;;  %v5505_v45 = vadd.f32 %v5502_v12, %v5387_v31 }
 0x71a   :  { %v5608_v36 = vpop.f32.mrf.mxu1  ;;  %v5620_v63 = vadd.f32 %v5619_v28, %v5606_v17 }
 0x71c   :  { %v5623_v46 = vadd.f32 %v5620_v63, %v5505_v45 }
 0x71e   :  { %v5503_v6 = vpop.f32.mrf.mxu3 }
 0x721   :  { %v5621_v35 = vpop.f32.mrf.mxu2  ;;  %v5737_v30 = vpop.f32.mrf.mxu0 }
 0x722   :  { %v5855_v0 = vpop.f32.mrf.mxu1 }
 0x729   :  { %v5842_v57 = vpop.f32.mrf.mxu2  ;;  %v5739_v38 = vpop.f32.mrf.mxu0 }
 0x72a   :  { %v5724_v54 = vpop.f32.mrf.mxu3  ;;  %v5857_v62 = vpop.f32.mrf.mxu1  ;;  %v5856_v7 = vadd.f32 %v5855_v0, %v5842_v57 }
 0x72b   :  { %v5738_v58 = vadd.f32 %v5737_v30, %v5724_v54 }
 0x72d   :  { %v5741_v22 = vadd.f32 %v5738_v58, %v5623_v46 }
 0x72f   :  { %v5859_v9 = vadd.f32 %v5856_v7, %v5741_v22 }
 0x731   :  { %v5844_v59 = vpop.f32.mrf.mxu2 }
 0x732   :  { %v5726_v3 = vpop.f32.mrf.mxu3 }
 0x739   :  { %v5960_v4 = vpop.f32.mrf.mxu0  ;;  %v6078_v41 = vpop.f32.mrf.mxu1 }
 0x73a   :  { %v5973_v43 = vpop.f32.mrf.mxu3  ;;  %v6091_v55 = vpop.f32.mrf.mxu2 }
 0x73b   :  { %v5974_v10 = vadd.f32 %v5973_v43, %v5960_v4  ;;  %v6092_v5 = vadd.f32 %v6091_v55, %v6078_v41 }
 0x73d   :  { %v5977_v11 = vadd.f32 %v5974_v10, %v5859_v9 }
 0x73f   :  { %v6095_v60 = vadd.f32 %v6092_v5, %v5977_v11 }
 0x741   :  { %v5962_v13 = vpop.f32.mrf.mxu0  ;;  %v6080_v15 = vpop.f32.mrf.mxu1  ;;  %v6096_v24 = vpack.c.bf16 %v6095_v60, %v6095_v60 }
 0x742   :  { %v5975_v18 = vpop.f32.mrf.mxu3  ;;  %v6093_v19 = vpop.f32.mrf.mxu2 }
 0x743   :  { %8793 = vmatmul.msk.bf16.vlgmr.msrb.gmra.mxu3 %vm12441_vm7, %v6096_v24 }
 0x7c6   :  { %v6173_v23 = vpop.f32.mrf.mxu3 }
 0x7c7   :  { %v6174_v16 = vadd.f32 %v6173_v23, %v6112_v21 }
 0x7c9   :  { %v6177_v8 = vpack.c.bf16 %v6174_v16, %v6174_v16 }
 0x7cb   :  { %8814 = vmatmul.msk.bf16.vlgmr.msra.gmra.mxu0 %vm12442_vm11, %v6177_v8 }
 0x7ce   :  { %v6175_v25 = vpop.f32.mrf.mxu3 }
 0x848   :  { %v6238_v17 = vpop.f32.mrf.mxu0 }
 0x849   :  { %v6239_v1 = vadd.f32 %v6238_v17, %v6189_v20 }
 0x84b   :  { %6242 = vst.msk [vmem:[#allocation4 + $0x1] sm:$0x1] %vm12443_vm1, %v6239_v1 }
 0x84c   :  { %6253 = dma.vmem_to_hbm [thread:$0]  %s6249_s20, 32, %s6251_s10, [#allocation5]  }
 0x850   :  { %v6240_v29 = vpop.f32.mrf.mxu0 }
 0x851   :  { %9404 = dma.done.wait [#allocation5], 32  }
 0x852   :  { %9405 = vsyncadd [#allocation5], 4294967264 }
 0x853   :  { %6258 = vsyncpa [#allocation5], 1 }

</bundles_post_ra>
